<compile_context>
chip_gen: v5e
topology: v5e:2x2
jax: 0.10.0
libtpu: 0.0.40
codegen_flags: <defaults>
</compile_context>

<pallas_src>
import numpy as np
import jax
import jax.numpy as jnp
from jax import lax
from jax.experimental import pallas as pl
from jax.experimental.pallas import tpu as pltpu  # noqa: F401  (TPU backend; defaults suffice)

# ----------------------------- hyper-parameters (small) -----------------------------
NUM_FEATURES = 8
HIDDEN_DIMS = [16, 32]
D_MODEL = HIDDEN_DIMS[-1]          # transformer width actually used by the module
NHEAD = 4
HEAD_DIM = D_MODEL // NHEAD
NUM_LAYERS = 2
MAX_NODES = 16
NEG_SLOPE = 0.1
BN_EPS = 1e-5
LN_EPS = 1e-5
NEG_INF = -1e30


# ================================ in-kernel helpers ==================================

def _mxu(a, b):
    # bf16 operands -> native MXU path on v6e/v7x; f32 accumulation; callers keep f32 math.
    return jnp.dot(a.astype(jnp.bfloat16), b.astype(jnp.bfloat16),
                   preferred_element_type=jnp.float32)


def _leaky(t):
    return jnp.where(t >= 0, t, NEG_SLOPE * t)


def _layernorm(x, g, b):
    mu = jnp.mean(x, axis=-1, keepdims=True)
    var = jnp.mean((x - mu) ** 2, axis=-1, keepdims=True)
    return (x - mu) * lax.rsqrt(var + LN_EPS) * g + b


def _gelu_tanh(x):
    # TODO(synk): PyTorch F.gelu defaults to exact-erf GELU; tanh approximation used here
    # (lowers to the otherwise-idle EUP slot; max abs deviation ~1e-3).
    c = 0.7978845608028654  # sqrt(2/pi)
    return 0.5 * x * (1.0 + jnp.tanh(c * (x + 0.044715 * x * x * x)))


# =========================== fused BertEncoder kernel factory ========================

def make_bert_encoder_kernel(node_counts):
    """Builds the single fused kernel, specialized to the (static) per-graph node counts."""
    node_counts = [int(n) for n in node_counts]
    B = len(node_counts)
    Sn = max(node_counts)               # max nodes in batch
    S = Sn + 1                          # + CLS token
    BS = B * S
    N = sum(node_counts)
    offsets = [0]
    for n in node_counts:
        offsets.append(offsets[-1] + n)

    D = D_MODEL
    hd = HEAD_DIM
    scale = 1.0 / float(np.sqrt(hd))
    d0, d1 = HIDDEN_DIMS

    # -------- iota helpers (everything built in-kernel; NO captured array constants) ----
    def _graph_of(idx):
        # graph id of a token index in [0, B*S)
        g = jnp.zeros(idx.shape, jnp.int32)
        for b in range(1, B):
            g = jnp.where(idx >= b * S, b, g)
        return g

    def _lookup(g, values):
        # per-graph static int lookup (values: python list of ints)
        out = jnp.zeros(g.shape, jnp.int32)
        for b in range(B):
            out = jnp.where(g == b, values[b], out)
        return out

    def kernel(x_ref, a_ref, gw_ref, gv_ref, pin_ref, wpos_ref, misc_ref,
               twa_ref, twb_ref, tvec_ref, o_ref):
        f32 = jnp.float32

        # ------------------- GCN encoder: both ResidualBlocks fused ------------------
        adj = a_ref[...]                 # (N, N) normalized propagation matrix
        gw = gw_ref[...]                 # packed [shortcut | conv.lin*bn_scale] weights
        gv = gv_ref[...]                 # packed [bs ; folded conv bias] rows

        def residual_block(h, w, bs, bfold, dout):
            hw = _mxu(h, w)                               # one matmul: [residual | conv.lin]
            res = hw[:, :dout] + bs                       # shortcut Linear
            t = _mxu(adj, hw[:, dout:2 * dout]) + bfold   # propagate + folded BN/bias
            t = _leaky(t)                                 # LeakyReLU; dropout = identity
            return _leaky(t + res)

        h = residual_block(x_ref[...], gw[0:NUM_FEATURES, 0:2 * d0],
                           gv[0:1, 0:d0], gv[1:2, 0:d0], d0)
        h = residual_block(h, gw[NUM_FEATURES:NUM_FEATURES + d0, 0:2 * d1],
                           gv[2:3, 0:d1], gv[3:4, 0:d1], d1)
        # F.normalize(p=2, dim=1) with eps=1e-12
        n2 = jnp.sum(h * h, axis=-1, keepdims=True)
        h = h * lax.rsqrt(jnp.maximum(n2, 1e-24))

        # ---------------- token assembly: placement matmul + pos-enc + CLS -----------
        # placement P[token_row, node] (one-hot for real tokens, zero for CLS/pad rows)
        rt = lax.broadcasted_iota(jnp.int32, (BS, N), 0)
        cn = lax.broadcasted_iota(jnp.int32, (BS, N), 1)
        g_t = _graph_of(rt)
        pos_t = rt - g_t * S
        off_t = _lookup(g_t, offsets[:B])
        cnt_t = _lookup(g_t, node_counts)
        place = jnp.where((cn == off_t + pos_t - 1) & (pos_t >= 1) & (pos_t <= cnt_t),
                          1.0, 0.0).astype(f32)
        tokens = jnp.dot(place, h, preferred_element_type=f32)     # exact f32 placement

        # batched GraphBert positional encoding: [wsp|le] @ blockdiag(ww, wl) + [bw|bl]
        misc = misc_ref[...]                                        # (2, D): [pos bias ; cls]
        pos = _mxu(pin_ref[...], wpos_ref[...]) + misc[0:1, :]

        rr = lax.broadcasted_iota(jnp.int32, (BS, D), 0)
        g_r = _graph_of(rr)
        pos_r = rr - g_r * S
        cnt_r = _lookup(g_r, node_counts)
        node_valid = jnp.where((pos_r >= 1) & (pos_r <= cnt_r), 1.0, 0.0).astype(f32)
        is_cls = jnp.where(pos_r == 0, 1.0, 0.0).astype(f32)
        tokens = tokens + pos * node_valid + misc[1:2, :] * is_cls   # (B*S, D)

        # ---------------- transformer encoder: block-diagonal batched attention -------
        # all graphs in one (BS, BS) score matrix; cross-graph + padded keys masked.
        rq = lax.broadcasted_iota(jnp.int32, (BS, BS), 0)
        ck = lax.broadcasted_iota(jnp.int32, (BS, BS), 1)
        g_q = _graph_of(rq)
        g_k = _graph_of(ck)
        kpos = ck - g_k * S
        kcnt = _lookup(g_k, node_counts)
        attn_mask = jnp.where((g_q == g_k) & (kpos <= kcnt), 0.0, NEG_INF).astype(f32)

        xt = tokens
        for l in range(NUM_LAYERS):
            wa = twa_ref[l]          # (D, 8D) = [wqkv(3D) | wo(D) | w1(4D)]
            w2 = twb_ref[l]          # (4D, D)
            vec = tvec_ref[l]        # (8, 4D) packed biases / LayerNorm params

            qkv = _mxu(xt, wa[:, 0:3 * D]) + vec[0:1, 0:3 * D]      # fused QKV matmul
            q = qkv[:, 0:D]
            k = qkv[:, D:2 * D]
            v = qkv[:, 2 * D:3 * D]

            ctx = []
            for hh in range(NHEAD):
                lo = hh * hd
                qh = q[:, lo:lo + hd]
                kh = k[:, lo:lo + hd]
                vh = v[:, lo:lo + hd]
                s = lax.dot_general(qh.astype(jnp.bfloat16), kh.astype(jnp.bfloat16),
                                    (((1,), (1,)), ((), ())),
                                    preferred_element_type=f32) * scale
                s = s + attn_mask
                s = s - jnp.max(s, axis=-1, keepdims=True)
                e = jnp.exp(s)
                p = e / jnp.sum(e, axis=-1, keepdims=True)          # exact softmax (f32)
                ctx.append(_mxu(p, vh))
            attn = jnp.concatenate(ctx, axis=-1)                     # (BS, D)
            attn = _mxu(attn, wa[:, 3 * D:4 * D]) + vec[1:2, 0:D]    # out-proj
            xt = _layernorm(xt + attn, vec[2:3, 0:D], vec[3:4, 0:D])  # dropout = identity
            ff = _gelu_tanh(_mxu(xt, wa[:, 4 * D:8 * D]) + vec[4:5, 0:4 * D])
            ff = _mxu(ff, w2) + vec[5:6, 0:D]
            xt = _layernorm(xt + ff, vec[6:7, 0:D], vec[7:8, 0:D])

        # -------- emit final (N, D) node-embedding slab directly (no host slicing) ----
        nr = lax.broadcasted_iota(jnp.int32, (N, BS), 0)    # output node row
        tc = lax.broadcasted_iota(jnp.int32, (N, BS), 1)    # token index
        g_o = _graph_of(tc)
        opos = tc - g_o * S
        ooff = _lookup(g_o, offsets[:B])
        ocnt = _lookup(g_o, node_counts)
        gather = jnp.where((nr == ooff + opos - 1) & (opos >= 1) & (opos <= ocnt),
                           1.0, 0.0).astype(f32)
        o_ref[...] = jnp.dot(gather, xt, preferred_element_type=f32)

    return kernel, B, S, N


def bert_encoder_pallas(x, adj, posin, packed, node_counts):
    """Single pallas_call covering GCN encoder, pos-encoding, assembly, transformer, gather."""
    kernel, _, _, N = make_bert_encoder_kernel(node_counts)
    return pl.pallas_call(
        kernel,
        out_shape=jax.ShapeDtypeStruct((N, D_MODEL), jnp.float32),
    )(x, adj, packed["gcn_w"], packed["gcn_vec"], posin, packed["wpos"],
      packed["misc"], packed["tw_a"], packed["tw_b"], packed["tvec"])


# ============================ host-side graph glue (numpy) ===========================

def gcn_effective_adj(edge_index, n):
    """Dense propagation matrix equivalent to ResidualBlock's manual norm + GCNConv(gcn_norm)."""
    src = edge_index[0].astype(np.int64)
    dst = edge_index[1].astype(np.int64)
    loop = np.arange(n, dtype=np.int64)
    # ResidualBlock: add_self_loops + symmetric degree normalization
    src1 = np.concatenate([src, loop])
    dst1 = np.concatenate([dst, loop])
    deg = np.bincount(src1, minlength=n).astype(np.float32)
    with np.errstate(divide="ignore"):
        dis = deg ** -0.5
    dis[np.isinf(dis)] = 0.0
    w = dis[src1] * dis[dst1]
    # GCNConv(normalize=True, improved=True): add_remaining_self_loops(fill=2.0) preserves
    # existing self-loop weights, then re-normalizes by weighted target degree.
    nonloop = src1 != dst1
    loop_w = np.full(n, 2.0, np.float32)
    loop_w[src1[~nonloop]] = w[~nonloop]
    src2 = np.concatenate([src1[nonloop], loop])
    dst2 = np.concatenate([dst1[nonloop], loop])
    w2 = np.concatenate([w[nonloop], loop_w]).astype(np.float32)
    deg2 = np.zeros(n, np.float32)
    np.add.at(deg2, dst2, w2)
    with np.errstate(divide="ignore"):
        dis2 = deg2 ** -0.5
    dis2[np.isinf(dis2)] = 0.0
    norm = dis2[src2] * w2 * dis2[dst2]
    A = np.zeros((n, n), np.float32)
    np.add.at(A, (dst2, src2), norm)          # out_i = sum_j A[i, j] * x_j
    return A


def shortest_path_matrix(edges, n, max_nodes):
    # TODO(synk): reference uses networkx BFS; Floyd-Warshall here (identical lengths).
    INF = 1e9
    d = np.full((n, n), INF)
    np.fill_diagonal(d, 0.0)
    for s, t in edges:
        d[s, t] = 1.0
        d[t, s] = 1.0
    for k in range(n):
        d = np.minimum(d, d[:, k:k + 1] + d[k:k + 1, :])
    spl = np.zeros((n, max_nodes), np.float32)
    for i in range(n):
        for j in range(min(n, max_nodes)):
            if i != j:
                spl[i, j] = d[i, j] if d[i, j] < INF / 2 else max_nodes
    return spl


def laplacian_eigvecs(edges, n, max_nodes):
    # TODO(synk): eigendecomposition has no Pallas equivalent; host-side (eigvec sign is impl-defined).
    A = np.zeros((n, n), np.float64)
    for s, t in edges:
        if s != t:
            A[s, t] = 1.0
            A[t, s] = 1.0
    deg = A.sum(1)
    dis = np.where(deg > 0, deg ** -0.5, 0.0)
    L = np.eye(n) - dis[:, None] * A * dis[None, :]
    _, vecs = np.linalg.eigh(L)
    out = np.zeros((n, max_nodes), np.float32)
    out[:, :n] = vecs.astype(np.float32)
    return out


# =============================== parameters (deterministic) ==========================

def init_params(key):
    keys = iter(jax.random.split(key, 64))

    def xavier(shape, gain=1.0):
        limit = gain * np.sqrt(6.0 / (shape[0] + shape[1]))
        return jax.random.uniform(next(keys), shape, jnp.float32, -limit, limit)

    params = {"gcn_blocks": []}
    dims = [NUM_FEATURES] + HIDDEN_DIMS
    gain_lrelu = float(np.sqrt(2.0 / (1.0 + NEG_SLOPE ** 2)))
    for i in range(len(dims) - 1):
        din, dout = dims[i], dims[i + 1]
        params["gcn_blocks"].append(dict(
            wc=xavier((din, dout), gain_lrelu),
            bc=jnp.zeros((1, dout), jnp.float32),
            ws=xavier((din, dout)),
            bs=jnp.zeros((1, dout), jnp.float32),
            # fresh BatchNorm1d in eval: running_mean=0, running_var=1, gamma=1, beta=0
            bn_scale=jnp.full((1, dout), 1.0 / np.sqrt(1.0 + BN_EPS), jnp.float32),
            bn_shift=jnp.zeros((1, dout), jnp.float32),
        ))
    dh = D_MODEL // 2
    params["ww"] = xavier((MAX_NODES, dh)); params["bw"] = jnp.zeros((1, dh), jnp.float32)
    params["wl"] = xavier((MAX_NODES, dh)); params["bl"] = jnp.zeros((1, dh), jnp.float32)
    params["cls_token"] = jax.random.normal(next(keys), (1, 1, D_MODEL), jnp.float32)
    params["mask_token"] = jax.random.normal(next(keys), (1, D_MODEL), jnp.float32)  # unused (eval)

    D = D_MODEL
    layers = []
    for _ in range(NUM_LAYERS):
        layers.append(dict(
            wq=xavier((D, D)), bq=jnp.zeros((1, D), jnp.float32),
            wk=xavier((D, D)), bk=jnp.zeros((1, D), jnp.float32),
            wv=xavier((D, D)), bv=jnp.zeros((1, D), jnp.float32),
            wo=xavier((D, D)), bo=jnp.zeros((1, D), jnp.float32),
            g1=jnp.ones((1, D), jnp.float32), be1=jnp.zeros((1, D), jnp.float32),
            w1=xavier((D, 4 * D)), bf1=jnp.zeros((1, 4 * D), jnp.float32),
            w2=xavier((4 * D, D)), bf2=jnp.zeros((1, D), jnp.float32),
            g2=jnp.ones((1, D), jnp.float32), be2=jnp.zeros((1, D), jnp.float32),
        ))
    params["layers"] = layers
    # predicter exists in the module but its output is unused at inference (dead matmul removed)
    params["w_pred"] = xavier((D, NUM_FEATURES))
    params["b_pred"] = jnp.zeros((1, NUM_FEATURES), jnp.float32)
    return params


def pack_params(params):
    """One-time host-side packing of ~30 tiny parameter tensors into 8 slabs (fewer DMAs)."""
    f = np.float32
    d0, d1 = HIDDEN_DIMS
    D = D_MODEL
    dh = D // 2
    b0, b1 = params["gcn_blocks"]

    def fold(blk):
        ws = np.asarray(blk["ws"], f); wc = np.asarray(blk["wc"], f)
        bs = np.asarray(blk["bs"], f); bc = np.asarray(blk["bc"], f)
        sc = np.asarray(blk["bn_scale"], f); sh = np.asarray(blk["bn_shift"], f)
        # fold BatchNorm (eval) into the conv: y = (A@(h@wc)+bc)*sc + sh = A@(h@(wc*sc)) + (bc*sc+sh)
        return np.concatenate([ws, wc * sc], axis=1), bs, bc * sc + sh

    w0, bs0, bf0 = fold(b0)                             # (8, 32)
    w1, bs1, bf1 = fold(b1)                             # (16, 64)
    gcn_w = np.zeros((NUM_FEATURES + d0, 2 * d1), f)    # (24, 64)
    gcn_w[:NUM_FEATURES, :2 * d0] = w0
    gcn_w[NUM_FEATURES:, :2 * d1] = w1
    gcn_vec = np.zeros((4, d1), f)
    gcn_vec[0, :d0] = bs0[0]; gcn_vec[1, :d0] = bf0[0]
    gcn_vec[2, :d1] = bs1[0]; gcn_vec[3, :d1] = bf1[0]

    wpos = np.zeros((2 * MAX_NODES, D), f)              # block-diag [ww ⊕ wl]
    wpos[:MAX_NODES, :dh] = np.asarray(params["ww"], f)
    wpos[MAX_NODES:, dh:] = np.asarray(params["wl"], f)
    misc = np.zeros((2, D), f)                          # row0 = [bw|bl], row1 = cls token
    misc[0, :dh] = np.asarray(params["bw"], f)[0]
    misc[0, dh:] = np.asarray(params["bl"], f)[0]
    misc[1] = np.asarray(params["cls_token"], f)[0, 0]

    L = NUM_LAYERS
    tw_a = np.zeros((L, D, 8 * D), f)                   # [wqkv(3D) | wo(D) | w1(4D)]
    tw_b = np.zeros((L, 4 * D, D), f)                   # w2
    tvec = np.zeros((L, 8, 4 * D), f)                   # packed biases / LN params
    for l, lp in enumerate(params["layers"]):
        tw_a[l, :, 0:3 * D] = np.concatenate(
            [np.asarray(lp["wq"], f), np.asarray(lp["wk"], f), np.asarray(lp["wv"], f)], axis=1)
        tw_a[l, :, 3 * D:4 * D] = np.asarray(lp["wo"], f)
        tw_a[l, :, 4 * D:8 * D] = np.asarray(lp["w1"], f)
        tw_b[l] = np.asarray(lp["w2"], f)
        tvec[l, 0, 0:3 * D] = np.concatenate(
            [np.asarray(lp["bq"], f)[0], np.asarray(lp["bk"], f)[0], np.asarray(lp["bv"], f)[0]])
        tvec[l, 1, :D] = np.asarray(lp["bo"], f)[0]
        tvec[l, 2, :D] = np.asarray(lp["g1"], f)[0]
        tvec[l, 3, :D] = np.asarray(lp["be1"], f)[0]
        tvec[l, 4, :4 * D] = np.asarray(lp["bf1"], f)[0]
        tvec[l, 5, :D] = np.asarray(lp["bf2"], f)[0]
        tvec[l, 6, :D] = np.asarray(lp["g2"], f)[0]
        tvec[l, 7, :D] = np.asarray(lp["be2"], f)[0]

    packed = dict(gcn_w=gcn_w, gcn_vec=gcn_vec, wpos=wpos, misc=misc,
                  tw_a=tw_a, tw_b=tw_b, tvec=tvec)
    return {k: jnp.asarray(v) for k, v in packed.items()}


# ==================================== forward ========================================

def bert_encoder_forward(x, edge_index, batch, num_graphs, params, packed=None):
    if packed is None:
        packed = pack_params(params)
    x = jnp.asarray(x, jnp.float32)
    N = x.shape[0]
    ei = np.asarray(edge_index)
    bvec = np.asarray(batch)

    node_counts = [int((bvec == i).sum()) for i in range(num_graphs)]
    offsets = np.concatenate([[0], np.cumsum(node_counts)]).astype(int)
    Sn = max(node_counts)
    S = Sn + 1

    # host-side: dense normalized propagation matrix for the GCNConv aggregation
    adj = jnp.asarray(gcn_effective_adj(ei, N))

    # host-side graph algorithms -> positional-encoding inputs, laid out token-row aligned
    # (row g*S is the CLS slot and stays zero; pad rows stay zero)
    posin = np.zeros((num_graphs * S, 2 * MAX_NODES), np.float32)
    for g in range(num_graphs):
        s0, n_g = int(offsets[g]), node_counts[g]
        sel = (ei[0] >= s0) & (ei[0] < s0 + n_g)
        local_edges = (ei[:, sel] - s0).T
        posin[g * S + 1: g * S + 1 + n_g, :MAX_NODES] = shortest_path_matrix(local_edges, n_g, MAX_NODES)
        posin[g * S + 1: g * S + 1 + n_g, MAX_NODES:] = laplacian_eigvecs(local_edges, n_g, MAX_NODES)
    posin = jnp.asarray(posin)

    # single fused Pallas launch -> final (N, D_MODEL) node embeddings
    return bert_encoder_pallas(x, adj, posin, packed, node_counts)


# ===================================== main ==========================================

if __name__ == "__main__":
    key = jax.random.PRNGKey(0)
    pkey, xkey = jax.random.split(key)
    params = init_params(pkey)
    packed = pack_params(params)

    # Two graphs: 5 and 7 nodes (12 nodes total), undirected edges stored in both directions.
    node_counts = [5, 7]
    N = sum(node_counts)
    x = jax.random.normal(xkey, (N, NUM_FEATURES), jnp.float32)
    batch = np.array([0] * 5 + [1] * 7, np.int32)

    g0 = [(0, 1), (1, 2), (2, 3), (3, 4), (4, 0)]
    g1 = [(0, 1), (1, 2), (2, 3), (3, 4), (4, 5), (5, 6), (6, 0), (1, 4)]
    edges = g0 + [(s + 5, t + 5) for s, t in g1]
    src = [s for s, t in edges] + [t for s, t in edges]
    dst = [t for s, t in edges] + [s for s, t in edges]
    edge_index = np.array([src, dst], np.int32)

    out = bert_encoder_forward(x, edge_index, batch, num_graphs=2, params=params, packed=packed)
    out = jax.block_until_ready(out)
    assert out.shape == (N, D_MODEL)
    assert bool(jnp.all(jnp.isfinite(out)))
    print("KERNEL_OK")
</pallas_src>

<mosaic_0001>
module attributes {stable_mosaic.version = 11 : i64} {
  func.func @kernel(%arg0: memref<12x8xf32, #tpu.memory_space<vmem>>, %arg1: memref<12x12xf32, #tpu.memory_space<vmem>>, %arg2: memref<24x64xf32, #tpu.memory_space<vmem>>, %arg3: memref<4x32xf32, #tpu.memory_space<vmem>>, %arg4: memref<16x32xf32, #tpu.memory_space<vmem>>, %arg5: memref<32x32xf32, #tpu.memory_space<vmem>>, %arg6: memref<2x32xf32, #tpu.memory_space<vmem>>, %arg7: memref<2x32x256xf32, #tpu.memory_space<vmem>>, %arg8: memref<2x128x32xf32, #tpu.memory_space<vmem>>, %arg9: memref<2x8x128xf32, #tpu.memory_space<vmem>>, %arg10: memref<12x32xf32, #tpu.memory_space<vmem>>) attributes {dimension_semantics = [], scalar_prefetch = 0 : i64, scratch_operands = 0 : i64, tpu.core_type = #tpu.core_type<tc>} {
    %c0 = arith.constant 0 : index
    %c0_0 = arith.constant 0 : index
    %0 = vector.load %arg1[%c0, %c0_0] : memref<12x12xf32, #tpu.memory_space<vmem>>, vector<12x12xf32>
    %c0_1 = arith.constant 0 : index
    %c0_2 = arith.constant 0 : index
    %1 = vector.load %arg2[%c0_1, %c0_2] : memref<24x64xf32, #tpu.memory_space<vmem>>, vector<24x64xf32>
    %c0_3 = arith.constant 0 : index
    %c0_4 = arith.constant 0 : index
    %2 = vector.load %arg3[%c0_3, %c0_4] : memref<4x32xf32, #tpu.memory_space<vmem>>, vector<4x32xf32>
    %c0_5 = arith.constant 0 : index
    %c0_6 = arith.constant 0 : index
    %3 = vector.load %arg0[%c0_5, %c0_6] : memref<12x8xf32, #tpu.memory_space<vmem>>, vector<12x8xf32>
    %4 = vector.extract_strided_slice %1 {offsets = [0, 0], sizes = [8, 32], strides = [1, 1]} : vector<24x64xf32> to vector<8x32xf32>
    %5 = vector.extract_strided_slice %2 {offsets = [0, 0], sizes = [1, 16], strides = [1, 1]} : vector<4x32xf32> to vector<1x16xf32>
    %6 = vector.extract_strided_slice %2 {offsets = [1, 0], sizes = [1, 16], strides = [1, 1]} : vector<4x32xf32> to vector<1x16xf32>
    %7 = arith.truncf %3 : vector<12x8xf32> to vector<12x8xbf16>
    %8 = arith.truncf %4 : vector<8x32xf32> to vector<8x32xbf16>
    %cst = arith.constant dense<0.000000e+00> : vector<12x32xf32>
    %9 = tpu.matmul %7, %8, %cst {dimension_numbers = #tpu.dot_dimension_numbers<[1], [0], [0], [1], [0, 0, 1, 1], [], []>} : vector<12x8xbf16>, vector<8x32xbf16>, vector<12x32xf32> -> vector<12x32xf32>
    %10 = vector.extract_strided_slice %9 {offsets = [0, 0], sizes = [12, 16], strides = [1, 1]} : vector<12x32xf32> to vector<12x16xf32>
    %11 = vector.broadcast %5 : vector<1x16xf32> to vector<12x16xf32>
    %12 = arith.addf %10, %11 : vector<12x16xf32>
    %13 = vector.extract_strided_slice %9 {offsets = [0, 16], sizes = [12, 16], strides = [1, 1]} : vector<12x32xf32> to vector<12x16xf32>
    %14 = arith.truncf %0 : vector<12x12xf32> to vector<12x12xbf16>
    %15 = arith.truncf %13 : vector<12x16xf32> to vector<12x16xbf16>
    %cst_7 = arith.constant dense<0.000000e+00> : vector<12x16xf32>
    %16 = tpu.matmul %14, %15, %cst_7 {dimension_numbers = #tpu.dot_dimension_numbers<[1], [0], [0], [1], [0, 0, 1, 1], [], []>} : vector<12x12xbf16>, vector<12x16xbf16>, vector<12x16xf32> -> vector<12x16xf32>
    %17 = vector.broadcast %6 : vector<1x16xf32> to vector<12x16xf32>
    %18 = arith.addf %16, %17 : vector<12x16xf32>
    %cst_8 = arith.constant 0.000000e+00 : f32
    %19 = vector.broadcast %cst_8 : f32 to vector<12x16xf32>
    %20 = arith.cmpf oge, %18, %19 : vector<12x16xf32>
    %cst_9 = arith.constant 1.000000e-01 : f32
    %21 = vector.broadcast %cst_9 : f32 to vector<12x16xf32>
    %22 = arith.mulf %21, %18 : vector<12x16xf32>
    %23 = arith.select %20, %18, %22 : vector<12x16xi1>, vector<12x16xf32>
    %24 = arith.addf %23, %12 : vector<12x16xf32>
    %cst_10 = arith.constant 0.000000e+00 : f32
    %25 = vector.broadcast %cst_10 : f32 to vector<12x16xf32>
    %26 = arith.cmpf oge, %24, %25 : vector<12x16xf32>
    %cst_11 = arith.constant 1.000000e-01 : f32
    %27 = vector.broadcast %cst_11 : f32 to vector<12x16xf32>
    %28 = arith.mulf %27, %24 : vector<12x16xf32>
    %29 = arith.select %26, %24, %28 : vector<12x16xi1>, vector<12x16xf32>
    %30 = vector.extract_strided_slice %1 {offsets = [8, 0], sizes = [16, 64], strides = [1, 1]} : vector<24x64xf32> to vector<16x64xf32>
    %31 = vector.extract_strided_slice %2 {offsets = [2, 0], sizes = [1, 32], strides = [1, 1]} : vector<4x32xf32> to vector<1x32xf32>
    %32 = vector.extract_strided_slice %2 {offsets = [3, 0], sizes = [1, 32], strides = [1, 1]} : vector<4x32xf32> to vector<1x32xf32>
    %33 = arith.truncf %29 : vector<12x16xf32> to vector<12x16xbf16>
    %34 = arith.truncf %30 : vector<16x64xf32> to vector<16x64xbf16>
    %cst_12 = arith.constant dense<0.000000e+00> : vector<12x64xf32>
    %35 = tpu.matmul %33, %34, %cst_12 {dimension_numbers = #tpu.dot_dimension_numbers<[1], [0], [0], [1], [0, 0, 1, 1], [], []>} : vector<12x16xbf16>, vector<16x64xbf16>, vector<12x64xf32> -> vector<12x64xf32>
    %36 = vector.extract_strided_slice %35 {offsets = [0, 0], sizes = [12, 32], strides = [1, 1]} : vector<12x64xf32> to vector<12x32xf32>
    %37 = vector.broadcast %31 : vector<1x32xf32> to vector<12x32xf32>
    %38 = arith.addf %36, %37 : vector<12x32xf32>
    %39 = vector.extract_strided_slice %35 {offsets = [0, 32], sizes = [12, 32], strides = [1, 1]} : vector<12x64xf32> to vector<12x32xf32>
    %40 = arith.truncf %0 : vector<12x12xf32> to vector<12x12xbf16>
    %41 = arith.truncf %39 : vector<12x32xf32> to vector<12x32xbf16>
    %cst_13 = arith.constant dense<0.000000e+00> : vector<12x32xf32>
    %42 = tpu.matmul %40, %41, %cst_13 {dimension_numbers = #tpu.dot_dimension_numbers<[1], [0], [0], [1], [0, 0, 1, 1], [], []>} : vector<12x12xbf16>, vector<12x32xbf16>, vector<12x32xf32> -> vector<12x32xf32>
    %43 = vector.broadcast %32 : vector<1x32xf32> to vector<12x32xf32>
    %44 = arith.addf %42, %43 : vector<12x32xf32>
    %cst_14 = arith.constant 0.000000e+00 : f32
    %45 = vector.broadcast %cst_14 : f32 to vector<12x32xf32>
    %46 = arith.cmpf oge, %44, %45 : vector<12x32xf32>
    %cst_15 = arith.constant 1.000000e-01 : f32
    %47 = vector.broadcast %cst_15 : f32 to vector<12x32xf32>
    %48 = arith.mulf %47, %44 : vector<12x32xf32>
    %49 = arith.select %46, %44, %48 : vector<12x32xi1>, vector<12x32xf32>
    %50 = arith.addf %49, %38 : vector<12x32xf32>
    %cst_16 = arith.constant 0.000000e+00 : f32
    %51 = vector.broadcast %cst_16 : f32 to vector<12x32xf32>
    %52 = arith.cmpf oge, %50, %51 : vector<12x32xf32>
    %cst_17 = arith.constant 1.000000e-01 : f32
    %53 = vector.broadcast %cst_17 : f32 to vector<12x32xf32>
    %54 = arith.mulf %53, %50 : vector<12x32xf32>
    %55 = arith.select %52, %50, %54 : vector<12x32xi1>, vector<12x32xf32>
    %56 = arith.mulf %55, %55 : vector<12x32xf32>
    %cst_18 = arith.constant dense<0.000000e+00> : vector<12xf32>
    %57 = vector.multi_reduction <add>, %56, %cst_18 [1] : vector<12x32xf32> to vector<12xf32>
    %58 = vector.shape_cast %57 : vector<12xf32> to vector<12x1xf32>
    %cst_19 = arith.constant 1.000000e-24 : f32
    %59 = vector.broadcast %cst_19 : f32 to vector<12x1xf32>
    %60 = arith.maximumf %58, %59 : vector<12x1xf32>
    %61 = math.rsqrt %60 : vector<12x1xf32>
    %62 = vector.broadcast %61 : vector<12x1xf32> to vector<12x32xf32>
    %63 = arith.mulf %55, %62 : vector<12x32xf32>
    %64 = tpu.iota {dimensions = array<i32: 0>} : vector<16x12xi32>
    %65 = tpu.iota {dimensions = array<i32: 1>} : vector<16x12xi32>
    %c0_i32 = arith.constant 0 : i32
    %66 = vector.broadcast %c0_i32 : i32 to vector<16x12xi32>
    %c8_i32 = arith.constant 8 : i32
    %67 = vector.broadcast %c8_i32 : i32 to vector<16x12xi32>
    %68 = arith.cmpi sge, %64, %67 : vector<16x12xi32>
    %c1_i32 = arith.constant 1 : i32
    %69 = vector.broadcast %c1_i32 : i32 to vector<16x12xi32>
    %70 = arith.select %68, %69, %66 : vector<16x12xi1>, vector<16x12xi32>
    %c8_i32_20 = arith.constant 8 : i32
    %71 = vector.broadcast %c8_i32_20 : i32 to vector<16x12xi32>
    %72 = arith.muli %70, %71 : vector<16x12xi32>
    %73 = arith.subi %64, %72 : vector<16x12xi32>
    %c0_i32_21 = arith.constant 0 : i32
    %74 = vector.broadcast %c0_i32_21 : i32 to vector<16x12xi32>
    %c0_i32_22 = arith.constant 0 : i32
    %75 = vector.broadcast %c0_i32_22 : i32 to vector<16x12xi32>
    %76 = arith.cmpi eq, %70, %75 : vector<16x12xi32>
    %c0_i32_23 = arith.constant 0 : i32
    %77 = vector.broadcast %c0_i32_23 : i32 to vector<16x12xi32>
    %78 = arith.select %76, %77, %74 : vector<16x12xi1>, vector<16x12xi32>
    %c1_i32_24 = arith.constant 1 : i32
    %79 = vector.broadcast %c1_i32_24 : i32 to vector<16x12xi32>
    %80 = arith.cmpi eq, %70, %79 : vector<16x12xi32>
    %c5_i32 = arith.constant 5 : i32
    %81 = vector.broadcast %c5_i32 : i32 to vector<16x12xi32>
    %82 = arith.select %80, %81, %78 : vector<16x12xi1>, vector<16x12xi32>
    %c0_i32_25 = arith.constant 0 : i32
    %83 = vector.broadcast %c0_i32_25 : i32 to vector<16x12xi32>
    %c0_i32_26 = arith.constant 0 : i32
    %84 = vector.broadcast %c0_i32_26 : i32 to vector<16x12xi32>
    %85 = arith.cmpi eq, %70, %84 : vector<16x12xi32>
    %c5_i32_27 = arith.constant 5 : i32
    %86 = vector.broadcast %c5_i32_27 : i32 to vector<16x12xi32>
    %87 = arith.select %85, %86, %83 : vector<16x12xi1>, vector<16x12xi32>
    %c1_i32_28 = arith.constant 1 : i32
    %88 = vector.broadcast %c1_i32_28 : i32 to vector<16x12xi32>
    %89 = arith.cmpi eq, %70, %88 : vector<16x12xi32>
    %c7_i32 = arith.constant 7 : i32
    %90 = vector.broadcast %c7_i32 : i32 to vector<16x12xi32>
    %91 = arith.select %89, %90, %87 : vector<16x12xi1>, vector<16x12xi32>
    %92 = arith.addi %82, %73 : vector<16x12xi32>
    %c1_i32_29 = arith.constant 1 : i32
    %93 = vector.broadcast %c1_i32_29 : i32 to vector<16x12xi32>
    %94 = arith.subi %92, %93 : vector<16x12xi32>
    %95 = arith.cmpi eq, %65, %94 : vector<16x12xi32>
    %c1_i32_30 = arith.constant 1 : i32
    %96 = vector.broadcast %c1_i32_30 : i32 to vector<16x12xi32>
    %97 = arith.cmpi sge, %73, %96 : vector<16x12xi32>
    %98 = arith.andi %95, %97 : vector<16x12xi1>
    %99 = arith.cmpi sle, %73, %91 : vector<16x12xi32>
    %100 = arith.andi %98, %99 : vector<16x12xi1>
    %cst_31 = arith.constant 1.000000e+00 : f32
    %cst_32 = arith.constant 0.000000e+00 : f32
    %101 = vector.broadcast %cst_31 : f32 to vector<16x12xf32>
    %102 = vector.broadcast %cst_32 : f32 to vector<16x12xf32>
    %103 = arith.select %100, %101, %102 : vector<16x12xi1>, vector<16x12xf32>
    %cst_33 = arith.constant dense<0.000000e+00> : vector<16x32xf32>
    %104 = tpu.matmul %103, %63, %cst_33 {dimension_numbers = #tpu.dot_dimension_numbers<[1], [0], [0], [1], [0, 0, 1, 1], [], []>} : vector<16x12xf32>, vector<12x32xf32>, vector<16x32xf32> -> vector<16x32xf32>
    %c0_34 = arith.constant 0 : index
    %c0_35 = arith.constant 0 : index
    %105 = vector.load %arg6[%c0_34, %c0_35] : memref<2x32xf32, #tpu.memory_space<vmem>>, vector<2x32xf32>
    %c0_36 = arith.constant 0 : index
    %c0_37 = arith.constant 0 : index
    %106 = vector.load %arg4[%c0_36, %c0_37] : memref<16x32xf32, #tpu.memory_space<vmem>>, vector<16x32xf32>
    %c0_38 = arith.constant 0 : index
    %c0_39 = arith.constant 0 : index
    %107 = vector.load %arg5[%c0_38, %c0_39] : memref<32x32xf32, #tpu.memory_space<vmem>>, vector<32x32xf32>
    %108 = arith.truncf %106 : vector<16x32xf32> to vector<16x32xbf16>
    %109 = arith.truncf %107 : vector<32x32xf32> to vector<32x32xbf16>
    %cst_40 = arith.constant dense<0.000000e+00> : vector<16x32xf32>
    %110 = tpu.matmul %108, %109, %cst_40 {dimension_numbers = #tpu.dot_dimension_numbers<[1], [0], [0], [1], [0, 0, 1, 1], [], []>} : vector<16x32xbf16>, vector<32x32xbf16>, vector<16x32xf32> -> vector<16x32xf32>
    %111 = vector.extract_strided_slice %105 {offsets = [0, 0], sizes = [1, 32], strides = [1, 1]} : vector<2x32xf32> to vector<1x32xf32>
    %112 = vector.broadcast %111 : vector<1x32xf32> to vector<16x32xf32>
    %113 = arith.addf %110, %112 : vector<16x32xf32>
    %114 = tpu.iota {dimensions = array<i32: 0>} : vector<16x32xi32>
    %c0_i32_41 = arith.constant 0 : i32
    %115 = vector.broadcast %c0_i32_41 : i32 to vector<16x32xi32>
    %c8_i32_42 = arith.constant 8 : i32
    %116 = vector.broadcast %c8_i32_42 : i32 to vector<16x32xi32>
    %117 = arith.cmpi sge, %114, %116 : vector<16x32xi32>
    %c1_i32_43 = arith.constant 1 : i32
    %118 = vector.broadcast %c1_i32_43 : i32 to vector<16x32xi32>
    %119 = arith.select %117, %118, %115 : vector<16x32xi1>, vector<16x32xi32>
    %c8_i32_44 = arith.constant 8 : i32
    %120 = vector.broadcast %c8_i32_44 : i32 to vector<16x32xi32>
    %121 = arith.muli %119, %120 : vector<16x32xi32>
    %122 = arith.subi %114, %121 : vector<16x32xi32>
    %c0_i32_45 = arith.constant 0 : i32
    %123 = vector.broadcast %c0_i32_45 : i32 to vector<16x32xi32>
    %c0_i32_46 = arith.constant 0 : i32
    %124 = vector.broadcast %c0_i32_46 : i32 to vector<16x32xi32>
    %125 = arith.cmpi eq, %119, %124 : vector<16x32xi32>
    %c5_i32_47 = arith.constant 5 : i32
    %126 = vector.broadcast %c5_i32_47 : i32 to vector<16x32xi32>
    %127 = arith.select %125, %126, %123 : vector<16x32xi1>, vector<16x32xi32>
    %c1_i32_48 = arith.constant 1 : i32
    %128 = vector.broadcast %c1_i32_48 : i32 to vector<16x32xi32>
    %129 = arith.cmpi eq, %119, %128 : vector<16x32xi32>
    %c7_i32_49 = arith.constant 7 : i32
    %130 = vector.broadcast %c7_i32_49 : i32 to vector<16x32xi32>
    %131 = arith.select %129, %130, %127 : vector<16x32xi1>, vector<16x32xi32>
    %c1_i32_50 = arith.constant 1 : i32
    %132 = vector.broadcast %c1_i32_50 : i32 to vector<16x32xi32>
    %133 = arith.cmpi sge, %122, %132 : vector<16x32xi32>
    %134 = arith.cmpi sle, %122, %131 : vector<16x32xi32>
    %135 = arith.andi %133, %134 : vector<16x32xi1>
    %cst_51 = arith.constant 1.000000e+00 : f32
    %cst_52 = arith.constant 0.000000e+00 : f32
    %136 = vector.broadcast %cst_51 : f32 to vector<16x32xf32>
    %137 = vector.broadcast %cst_52 : f32 to vector<16x32xf32>
    %138 = arith.select %135, %136, %137 : vector<16x32xi1>, vector<16x32xf32>
    %c0_i32_53 = arith.constant 0 : i32
    %139 = vector.broadcast %c0_i32_53 : i32 to vector<16x32xi32>
    %140 = arith.cmpi eq, %122, %139 : vector<16x32xi32>
    %cst_54 = arith.constant 1.000000e+00 : f32
    %cst_55 = arith.constant 0.000000e+00 : f32
    %141 = vector.broadcast %cst_54 : f32 to vector<16x32xf32>
    %142 = vector.broadcast %cst_55 : f32 to vector<16x32xf32>
    %143 = arith.select %140, %141, %142 : vector<16x32xi1>, vector<16x32xf32>
    %144 = arith.mulf %113, %138 : vector<16x32xf32>
    %145 = arith.addf %104, %144 : vector<16x32xf32>
    %146 = vector.extract_strided_slice %105 {offsets = [1, 0], sizes = [1, 32], strides = [1, 1]} : vector<2x32xf32> to vector<1x32xf32>
    %147 = vector.broadcast %146 : vector<1x32xf32> to vector<16x32xf32>
    %148 = arith.mulf %147, %143 : vector<16x32xf32>
    %149 = arith.addf %145, %148 : vector<16x32xf32>
    %150 = tpu.iota {dimensions = array<i32: 0>} : vector<16x16xi32>
    %151 = tpu.iota {dimensions = array<i32: 1>} : vector<16x16xi32>
    %c0_i32_56 = arith.constant 0 : i32
    %152 = vector.broadcast %c0_i32_56 : i32 to vector<16x16xi32>
    %c8_i32_57 = arith.constant 8 : i32
    %153 = vector.broadcast %c8_i32_57 : i32 to vector<16x16xi32>
    %154 = arith.cmpi sge, %150, %153 : vector<16x16xi32>
    %c1_i32_58 = arith.constant 1 : i32
    %155 = vector.broadcast %c1_i32_58 : i32 to vector<16x16xi32>
    %156 = arith.select %154, %155, %152 : vector<16x16xi1>, vector<16x16xi32>
    %c0_i32_59 = arith.constant 0 : i32
    %157 = vector.broadcast %c0_i32_59 : i32 to vector<16x16xi32>
    %c8_i32_60 = arith.constant 8 : i32
    %158 = vector.broadcast %c8_i32_60 : i32 to vector<16x16xi32>
    %159 = arith.cmpi sge, %151, %158 : vector<16x16xi32>
    %c1_i32_61 = arith.constant 1 : i32
    %160 = vector.broadcast %c1_i32_61 : i32 to vector<16x16xi32>
    %161 = arith.select %159, %160, %157 : vector<16x16xi1>, vector<16x16xi32>
    %c8_i32_62 = arith.constant 8 : i32
    %162 = vector.broadcast %c8_i32_62 : i32 to vector<16x16xi32>
    %163 = arith.muli %161, %162 : vector<16x16xi32>
    %164 = arith.subi %151, %163 : vector<16x16xi32>
    %c0_i32_63 = arith.constant 0 : i32
    %165 = vector.broadcast %c0_i32_63 : i32 to vector<16x16xi32>
    %c0_i32_64 = arith.constant 0 : i32
    %166 = vector.broadcast %c0_i32_64 : i32 to vector<16x16xi32>
    %167 = arith.cmpi eq, %161, %166 : vector<16x16xi32>
    %c5_i32_65 = arith.constant 5 : i32
    %168 = vector.broadcast %c5_i32_65 : i32 to vector<16x16xi32>
    %169 = arith.select %167, %168, %165 : vector<16x16xi1>, vector<16x16xi32>
    %c1_i32_66 = arith.constant 1 : i32
    %170 = vector.broadcast %c1_i32_66 : i32 to vector<16x16xi32>
    %171 = arith.cmpi eq, %161, %170 : vector<16x16xi32>
    %c7_i32_67 = arith.constant 7 : i32
    %172 = vector.broadcast %c7_i32_67 : i32 to vector<16x16xi32>
    %173 = arith.select %171, %172, %169 : vector<16x16xi1>, vector<16x16xi32>
    %174 = arith.cmpi eq, %156, %161 : vector<16x16xi32>
    %175 = arith.cmpi sle, %164, %173 : vector<16x16xi32>
    %176 = arith.andi %174, %175 : vector<16x16xi1>
    %cst_68 = arith.constant 0.000000e+00 : f32
    %cst_69 = arith.constant -1.000000e+30 : f32
    %177 = vector.broadcast %cst_68 : f32 to vector<16x16xf32>
    %178 = vector.broadcast %cst_69 : f32 to vector<16x16xf32>
    %179 = arith.select %176, %177, %178 : vector<16x16xi1>, vector<16x16xf32>
    %c0_70 = arith.constant 0 : index
    %c0_71 = arith.constant 0 : index
    %c0_72 = arith.constant 0 : index
    %180 = vector.load %arg7[%c0_70, %c0_71, %c0_72] : memref<2x32x256xf32, #tpu.memory_space<vmem>>, vector<1x32x256xf32>
    %181 = vector.shape_cast %180 : vector<1x32x256xf32> to vector<32x256xf32>
    %c0_73 = arith.constant 0 : index
    %c0_74 = arith.constant 0 : index
    %c0_75 = arith.constant 0 : index
    %182 = vector.load %arg8[%c0_73, %c0_74, %c0_75] : memref<2x128x32xf32, #tpu.memory_space<vmem>>, vector<1x128x32xf32>
    %183 = vector.shape_cast %182 : vector<1x128x32xf32> to vector<128x32xf32>
    %c0_76 = arith.constant 0 : index
    %c0_77 = arith.constant 0 : index
    %c0_78 = arith.constant 0 : index
    %184 = vector.load %arg9[%c0_76, %c0_77, %c0_78] : memref<2x8x128xf32, #tpu.memory_space<vmem>>, vector<1x8x128xf32>
    %185 = vector.shape_cast %184 : vector<1x8x128xf32> to vector<8x128xf32>
    %186 = vector.extract_strided_slice %181 {offsets = [0, 0], sizes = [32, 96], strides = [1, 1]} : vector<32x256xf32> to vector<32x96xf32>
    %187 = arith.truncf %149 : vector<16x32xf32> to vector<16x32xbf16>
    %188 = arith.truncf %186 : vector<32x96xf32> to vector<32x96xbf16>
    %cst_79 = arith.constant dense<0.000000e+00> : vector<16x96xf32>
    %189 = tpu.matmul %187, %188, %cst_79 {dimension_numbers = #tpu.dot_dimension_numbers<[1], [0], [0], [1], [0, 0, 1, 1], [], []>} : vector<16x32xbf16>, vector<32x96xbf16>, vector<16x96xf32> -> vector<16x96xf32>
    %190 = vector.extract_strided_slice %185 {offsets = [0, 0], sizes = [1, 96], strides = [1, 1]} : vector<8x128xf32> to vector<1x96xf32>
    %191 = vector.broadcast %190 : vector<1x96xf32> to vector<16x96xf32>
    %192 = arith.addf %189, %191 : vector<16x96xf32>
    %193 = vector.extract_strided_slice %192 {offsets = [0, 0], sizes = [16, 32], strides = [1, 1]} : vector<16x96xf32> to vector<16x32xf32>
    %194 = vector.extract_strided_slice %192 {offsets = [0, 32], sizes = [16, 32], strides = [1, 1]} : vector<16x96xf32> to vector<16x32xf32>
    %195 = vector.extract_strided_slice %192 {offsets = [0, 64], sizes = [16, 32], strides = [1, 1]} : vector<16x96xf32> to vector<16x32xf32>
    %196 = vector.extract_strided_slice %193 {offsets = [0, 0], sizes = [16, 8], strides = [1, 1]} : vector<16x32xf32> to vector<16x8xf32>
    %197 = vector.extract_strided_slice %194 {offsets = [0, 0], sizes = [16, 8], strides = [1, 1]} : vector<16x32xf32> to vector<16x8xf32>
    %198 = vector.extract_strided_slice %195 {offsets = [0, 0], sizes = [16, 8], strides = [1, 1]} : vector<16x32xf32> to vector<16x8xf32>
    %199 = arith.truncf %196 : vector<16x8xf32> to vector<16x8xbf16>
    %200 = arith.truncf %197 : vector<16x8xf32> to vector<16x8xbf16>
    %cst_80 = arith.constant dense<0.000000e+00> : vector<16x16xf32>
    %201 = tpu.matmul %199, %200, %cst_80 {dimension_numbers = #tpu.dot_dimension_numbers<[1], [1], [0], [0], [0, 0, 1, 0], [], []>} : vector<16x8xbf16>, vector<16x8xbf16>, vector<16x16xf32> -> vector<16x16xf32>
    %cst_81 = arith.constant 0.353553385 : f32
    %202 = vector.broadcast %cst_81 : f32 to vector<16x16xf32>
    %203 = arith.mulf %201, %202 : vector<16x16xf32>
    %204 = arith.addf %203, %179 : vector<16x16xf32>
    %cst_82 = arith.constant dense<0xFF800000> : vector<16xf32>
    %205 = vector.multi_reduction <maximumf>, %204, %cst_82 [1] : vector<16x16xf32> to vector<16xf32>
    %206 = vector.shape_cast %205 : vector<16xf32> to vector<16x1xf32>
    %207 = vector.broadcast %206 : vector<16x1xf32> to vector<16x16xf32>
    %208 = arith.subf %204, %207 : vector<16x16xf32>
    %209 = math.exp %208 : vector<16x16xf32>
    %cst_83 = arith.constant dense<0.000000e+00> : vector<16xf32>
    %210 = vector.multi_reduction <add>, %209, %cst_83 [1] : vector<16x16xf32> to vector<16xf32>
    %211 = vector.shape_cast %210 : vector<16xf32> to vector<16x1xf32>
    %212 = vector.broadcast %211 : vector<16x1xf32> to vector<16x16xf32>
    %213 = arith.divf %209, %212 : vector<16x16xf32>
    %214 = arith.truncf %213 : vector<16x16xf32> to vector<16x16xbf16>
    %215 = arith.truncf %198 : vector<16x8xf32> to vector<16x8xbf16>
    %cst_84 = arith.constant dense<0.000000e+00> : vector<16x8xf32>
    %216 = tpu.matmul %214, %215, %cst_84 {dimension_numbers = #tpu.dot_dimension_numbers<[1], [0], [0], [1], [0, 0, 1, 1], [], []>} : vector<16x16xbf16>, vector<16x8xbf16>, vector<16x8xf32> -> vector<16x8xf32>
    %217 = vector.extract_strided_slice %193 {offsets = [0, 8], sizes = [16, 8], strides = [1, 1]} : vector<16x32xf32> to vector<16x8xf32>
    %218 = vector.extract_strided_slice %194 {offsets = [0, 8], sizes = [16, 8], strides = [1, 1]} : vector<16x32xf32> to vector<16x8xf32>
    %219 = vector.extract_strided_slice %195 {offsets = [0, 8], sizes = [16, 8], strides = [1, 1]} : vector<16x32xf32> to vector<16x8xf32>
    %220 = arith.truncf %217 : vector<16x8xf32> to vector<16x8xbf16>
    %221 = arith.truncf %218 : vector<16x8xf32> to vector<16x8xbf16>
    %cst_85 = arith.constant dense<0.000000e+00> : vector<16x16xf32>
    %222 = tpu.matmul %220, %221, %cst_85 {dimension_numbers = #tpu.dot_dimension_numbers<[1], [1], [0], [0], [0, 0, 1, 0], [], []>} : vector<16x8xbf16>, vector<16x8xbf16>, vector<16x16xf32> -> vector<16x16xf32>
    %cst_86 = arith.constant 0.353553385 : f32
    %223 = vector.broadcast %cst_86 : f32 to vector<16x16xf32>
    %224 = arith.mulf %222, %223 : vector<16x16xf32>
    %225 = arith.addf %224, %179 : vector<16x16xf32>
    %cst_87 = arith.constant dense<0xFF800000> : vector<16xf32>
    %226 = vector.multi_reduction <maximumf>, %225, %cst_87 [1] : vector<16x16xf32> to vector<16xf32>
    %227 = vector.shape_cast %226 : vector<16xf32> to vector<16x1xf32>
    %228 = vector.broadcast %227 : vector<16x1xf32> to vector<16x16xf32>
    %229 = arith.subf %225, %228 : vector<16x16xf32>
    %230 = math.exp %229 : vector<16x16xf32>
    %cst_88 = arith.constant dense<0.000000e+00> : vector<16xf32>
    %231 = vector.multi_reduction <add>, %230, %cst_88 [1] : vector<16x16xf32> to vector<16xf32>
    %232 = vector.shape_cast %231 : vector<16xf32> to vector<16x1xf32>
    %233 = vector.broadcast %232 : vector<16x1xf32> to vector<16x16xf32>
    %234 = arith.divf %230, %233 : vector<16x16xf32>
    %235 = arith.truncf %234 : vector<16x16xf32> to vector<16x16xbf16>
    %236 = arith.truncf %219 : vector<16x8xf32> to vector<16x8xbf16>
    %cst_89 = arith.constant dense<0.000000e+00> : vector<16x8xf32>
    %237 = tpu.matmul %235, %236, %cst_89 {dimension_numbers = #tpu.dot_dimension_numbers<[1], [0], [0], [1], [0, 0, 1, 1], [], []>} : vector<16x16xbf16>, vector<16x8xbf16>, vector<16x8xf32> -> vector<16x8xf32>
    %238 = vector.extract_strided_slice %193 {offsets = [0, 16], sizes = [16, 8], strides = [1, 1]} : vector<16x32xf32> to vector<16x8xf32>
    %239 = vector.extract_strided_slice %194 {offsets = [0, 16], sizes = [16, 8], strides = [1, 1]} : vector<16x32xf32> to vector<16x8xf32>
    %240 = vector.extract_strided_slice %195 {offsets = [0, 16], sizes = [16, 8], strides = [1, 1]} : vector<16x32xf32> to vector<16x8xf32>
    %241 = arith.truncf %238 : vector<16x8xf32> to vector<16x8xbf16>
    %242 = arith.truncf %239 : vector<16x8xf32> to vector<16x8xbf16>
    %cst_90 = arith.constant dense<0.000000e+00> : vector<16x16xf32>
    %243 = tpu.matmul %241, %242, %cst_90 {dimension_numbers = #tpu.dot_dimension_numbers<[1], [1], [0], [0], [0, 0, 1, 0], [], []>} : vector<16x8xbf16>, vector<16x8xbf16>, vector<16x16xf32> -> vector<16x16xf32>
    %cst_91 = arith.constant 0.353553385 : f32
    %244 = vector.broadcast %cst_91 : f32 to vector<16x16xf32>
    %245 = arith.mulf %243, %244 : vector<16x16xf32>
    %246 = arith.addf %245, %179 : vector<16x16xf32>
    %cst_92 = arith.constant dense<0xFF800000> : vector<16xf32>
    %247 = vector.multi_reduction <maximumf>, %246, %cst_92 [1] : vector<16x16xf32> to vector<16xf32>
    %248 = vector.shape_cast %247 : vector<16xf32> to vector<16x1xf32>
    %249 = vector.broadcast %248 : vector<16x1xf32> to vector<16x16xf32>
    %250 = arith.subf %246, %249 : vector<16x16xf32>
    %251 = math.exp %250 : vector<16x16xf32>
    %cst_93 = arith.constant dense<0.000000e+00> : vector<16xf32>
    %252 = vector.multi_reduction <add>, %251, %cst_93 [1] : vector<16x16xf32> to vector<16xf32>
    %253 = vector.shape_cast %252 : vector<16xf32> to vector<16x1xf32>
    %254 = vector.broadcast %253 : vector<16x1xf32> to vector<16x16xf32>
    %255 = arith.divf %251, %254 : vector<16x16xf32>
    %256 = arith.truncf %255 : vector<16x16xf32> to vector<16x16xbf16>
    %257 = arith.truncf %240 : vector<16x8xf32> to vector<16x8xbf16>
    %cst_94 = arith.constant dense<0.000000e+00> : vector<16x8xf32>
    %258 = tpu.matmul %256, %257, %cst_94 {dimension_numbers = #tpu.dot_dimension_numbers<[1], [0], [0], [1], [0, 0, 1, 1], [], []>} : vector<16x16xbf16>, vector<16x8xbf16>, vector<16x8xf32> -> vector<16x8xf32>
    %259 = vector.extract_strided_slice %193 {offsets = [0, 24], sizes = [16, 8], strides = [1, 1]} : vector<16x32xf32> to vector<16x8xf32>
    %260 = vector.extract_strided_slice %194 {offsets = [0, 24], sizes = [16, 8], strides = [1, 1]} : vector<16x32xf32> to vector<16x8xf32>
    %261 = vector.extract_strided_slice %195 {offsets = [0, 24], sizes = [16, 8], strides = [1, 1]} : vector<16x32xf32> to vector<16x8xf32>
    %262 = arith.truncf %259 : vector<16x8xf32> to vector<16x8xbf16>
    %263 = arith.truncf %260 : vector<16x8xf32> to vector<16x8xbf16>
    %cst_95 = arith.constant dense<0.000000e+00> : vector<16x16xf32>
    %264 = tpu.matmul %262, %263, %cst_95 {dimension_numbers = #tpu.dot_dimension_numbers<[1], [1], [0], [0], [0, 0, 1, 0], [], []>} : vector<16x8xbf16>, vector<16x8xbf16>, vector<16x16xf32> -> vector<16x16xf32>
    %cst_96 = arith.constant 0.353553385 : f32
    %265 = vector.broadcast %cst_96 : f32 to vector<16x16xf32>
    %266 = arith.mulf %264, %265 : vector<16x16xf32>
    %267 = arith.addf %266, %179 : vector<16x16xf32>
    %cst_97 = arith.constant dense<0xFF800000> : vector<16xf32>
    %268 = vector.multi_reduction <maximumf>, %267, %cst_97 [1] : vector<16x16xf32> to vector<16xf32>
    %269 = vector.shape_cast %268 : vector<16xf32> to vector<16x1xf32>
    %270 = vector.broadcast %269 : vector<16x1xf32> to vector<16x16xf32>
    %271 = arith.subf %267, %270 : vector<16x16xf32>
    %272 = math.exp %271 : vector<16x16xf32>
    %cst_98 = arith.constant dense<0.000000e+00> : vector<16xf32>
    %273 = vector.multi_reduction <add>, %272, %cst_98 [1] : vector<16x16xf32> to vector<16xf32>
    %274 = vector.shape_cast %273 : vector<16xf32> to vector<16x1xf32>
    %275 = vector.broadcast %274 : vector<16x1xf32> to vector<16x16xf32>
    %276 = arith.divf %272, %275 : vector<16x16xf32>
    %277 = arith.truncf %276 : vector<16x16xf32> to vector<16x16xbf16>
    %278 = arith.truncf %261 : vector<16x8xf32> to vector<16x8xbf16>
    %cst_99 = arith.constant dense<0.000000e+00> : vector<16x8xf32>
    %279 = tpu.matmul %277, %278, %cst_99 {dimension_numbers = #tpu.dot_dimension_numbers<[1], [0], [0], [1], [0, 0, 1, 1], [], []>} : vector<16x16xbf16>, vector<16x8xbf16>, vector<16x8xf32> -> vector<16x8xf32>
    %280 = tpu.concatenate %216, %237, %258, %279 in 1 : vector<16x8xf32>, vector<16x8xf32>, vector<16x8xf32>, vector<16x8xf32> -> vector<16x32xf32>
    %281 = vector.extract_strided_slice %181 {offsets = [0, 96], sizes = [32, 32], strides = [1, 1]} : vector<32x256xf32> to vector<32x32xf32>
    %282 = arith.truncf %280 : vector<16x32xf32> to vector<16x32xbf16>
    %283 = arith.truncf %281 : vector<32x32xf32> to vector<32x32xbf16>
    %cst_100 = arith.constant dense<0.000000e+00> : vector<16x32xf32>
    %284 = tpu.matmul %282, %283, %cst_100 {dimension_numbers = #tpu.dot_dimension_numbers<[1], [0], [0], [1], [0, 0, 1, 1], [], []>} : vector<16x32xbf16>, vector<32x32xbf16>, vector<16x32xf32> -> vector<16x32xf32>
    %285 = vector.extract_strided_slice %185 {offsets = [1, 0], sizes = [1, 32], strides = [1, 1]} : vector<8x128xf32> to vector<1x32xf32>
    %286 = vector.broadcast %285 : vector<1x32xf32> to vector<16x32xf32>
    %287 = arith.addf %284, %286 : vector<16x32xf32>
    %288 = arith.addf %149, %287 : vector<16x32xf32>
    %289 = vector.extract_strided_slice %185 {offsets = [2, 0], sizes = [1, 32], strides = [1, 1]} : vector<8x128xf32> to vector<1x32xf32>
    %290 = vector.extract_strided_slice %185 {offsets = [3, 0], sizes = [1, 32], strides = [1, 1]} : vector<8x128xf32> to vector<1x32xf32>
    %cst_101 = arith.constant dense<0.000000e+00> : vector<16xf32>
    %291 = vector.multi_reduction <add>, %288, %cst_101 [1] : vector<16x32xf32> to vector<16xf32>
    %292 = vector.shape_cast %291 : vector<16xf32> to vector<16x1xf32>
    %cst_102 = arith.constant 3.200000e+01 : f32
    %293 = vector.broadcast %cst_102 : f32 to vector<16x1xf32>
    %294 = arith.divf %292, %293 : vector<16x1xf32>
    %295 = vector.broadcast %294 : vector<16x1xf32> to vector<16x32xf32>
    %296 = arith.subf %288, %295 : vector<16x32xf32>
    %297 = arith.mulf %296, %296 : vector<16x32xf32>
    %cst_103 = arith.constant dense<0.000000e+00> : vector<16xf32>
    %298 = vector.multi_reduction <add>, %297, %cst_103 [1] : vector<16x32xf32> to vector<16xf32>
    %299 = vector.shape_cast %298 : vector<16xf32> to vector<16x1xf32>
    %cst_104 = arith.constant 3.200000e+01 : f32
    %300 = vector.broadcast %cst_104 : f32 to vector<16x1xf32>
    %301 = arith.divf %299, %300 : vector<16x1xf32>
    %302 = vector.broadcast %294 : vector<16x1xf32> to vector<16x32xf32>
    %303 = arith.subf %288, %302 : vector<16x32xf32>
    %cst_105 = arith.constant 9.99999974E-6 : f32
    %304 = vector.broadcast %cst_105 : f32 to vector<16x1xf32>
    %305 = arith.addf %301, %304 : vector<16x1xf32>
    %306 = math.rsqrt %305 : vector<16x1xf32>
    %307 = vector.broadcast %306 : vector<16x1xf32> to vector<16x32xf32>
    %308 = arith.mulf %303, %307 : vector<16x32xf32>
    %309 = vector.broadcast %289 : vector<1x32xf32> to vector<16x32xf32>
    %310 = arith.mulf %308, %309 : vector<16x32xf32>
    %311 = vector.broadcast %290 : vector<1x32xf32> to vector<16x32xf32>
    %312 = arith.addf %310, %311 : vector<16x32xf32>
    %313 = vector.extract_strided_slice %181 {offsets = [0, 128], sizes = [32, 128], strides = [1, 1]} : vector<32x256xf32> to vector<32x128xf32>
    %314 = arith.truncf %312 : vector<16x32xf32> to vector<16x32xbf16>
    %315 = arith.truncf %313 : vector<32x128xf32> to vector<32x128xbf16>
    %cst_106 = arith.constant dense<0.000000e+00> : vector<16x128xf32>
    %316 = tpu.matmul %314, %315, %cst_106 {dimension_numbers = #tpu.dot_dimension_numbers<[1], [0], [0], [1], [0, 0, 1, 1], [], []>} : vector<16x32xbf16>, vector<32x128xbf16>, vector<16x128xf32> -> vector<16x128xf32>
    %317 = vector.extract_strided_slice %185 {offsets = [4, 0], sizes = [1, 128], strides = [1, 1]} : vector<8x128xf32> to vector<1x128xf32>
    %318 = vector.broadcast %317 : vector<1x128xf32> to vector<16x128xf32>
    %319 = arith.addf %316, %318 : vector<16x128xf32>
    %cst_107 = arith.constant 5.000000e-01 : f32
    %320 = vector.broadcast %cst_107 : f32 to vector<16x128xf32>
    %321 = arith.mulf %320, %319 : vector<16x128xf32>
    %cst_108 = arith.constant 4.471500e-02 : f32
    %322 = vector.broadcast %cst_108 : f32 to vector<16x128xf32>
    %323 = arith.mulf %322, %319 : vector<16x128xf32>
    %324 = arith.mulf %323, %319 : vector<16x128xf32>
    %325 = arith.mulf %324, %319 : vector<16x128xf32>
    %326 = arith.addf %319, %325 : vector<16x128xf32>
    %cst_109 = arith.constant 0.797884583 : f32
    %327 = vector.broadcast %cst_109 : f32 to vector<16x128xf32>
    %328 = arith.mulf %327, %326 : vector<16x128xf32>
    %329 = math.tanh %328 : vector<16x128xf32>
    %cst_110 = arith.constant 1.000000e+00 : f32
    %330 = vector.broadcast %cst_110 : f32 to vector<16x128xf32>
    %331 = arith.addf %330, %329 : vector<16x128xf32>
    %332 = arith.mulf %321, %331 : vector<16x128xf32>
    %333 = arith.truncf %332 : vector<16x128xf32> to vector<16x128xbf16>
    %334 = arith.truncf %183 : vector<128x32xf32> to vector<128x32xbf16>
    %cst_111 = arith.constant dense<0.000000e+00> : vector<16x32xf32>
    %335 = tpu.matmul %333, %334, %cst_111 {dimension_numbers = #tpu.dot_dimension_numbers<[1], [0], [0], [1], [0, 0, 1, 1], [], []>} : vector<16x128xbf16>, vector<128x32xbf16>, vector<16x32xf32> -> vector<16x32xf32>
    %336 = vector.extract_strided_slice %185 {offsets = [5, 0], sizes = [1, 32], strides = [1, 1]} : vector<8x128xf32> to vector<1x32xf32>
    %337 = vector.broadcast %336 : vector<1x32xf32> to vector<16x32xf32>
    %338 = arith.addf %335, %337 : vector<16x32xf32>
    %339 = arith.addf %312, %338 : vector<16x32xf32>
    %340 = vector.extract_strided_slice %185 {offsets = [6, 0], sizes = [1, 32], strides = [1, 1]} : vector<8x128xf32> to vector<1x32xf32>
    %341 = vector.extract_strided_slice %185 {offsets = [7, 0], sizes = [1, 32], strides = [1, 1]} : vector<8x128xf32> to vector<1x32xf32>
    %cst_112 = arith.constant dense<0.000000e+00> : vector<16xf32>
    %342 = vector.multi_reduction <add>, %339, %cst_112 [1] : vector<16x32xf32> to vector<16xf32>
    %343 = vector.shape_cast %342 : vector<16xf32> to vector<16x1xf32>
    %cst_113 = arith.constant 3.200000e+01 : f32
    %344 = vector.broadcast %cst_113 : f32 to vector<16x1xf32>
    %345 = arith.divf %343, %344 : vector<16x1xf32>
    %346 = vector.broadcast %345 : vector<16x1xf32> to vector<16x32xf32>
    %347 = arith.subf %339, %346 : vector<16x32xf32>
    %348 = arith.mulf %347, %347 : vector<16x32xf32>
    %cst_114 = arith.constant dense<0.000000e+00> : vector<16xf32>
    %349 = vector.multi_reduction <add>, %348, %cst_114 [1] : vector<16x32xf32> to vector<16xf32>
    %350 = vector.shape_cast %349 : vector<16xf32> to vector<16x1xf32>
    %cst_115 = arith.constant 3.200000e+01 : f32
    %351 = vector.broadcast %cst_115 : f32 to vector<16x1xf32>
    %352 = arith.divf %350, %351 : vector<16x1xf32>
    %353 = vector.broadcast %345 : vector<16x1xf32> to vector<16x32xf32>
    %354 = arith.subf %339, %353 : vector<16x32xf32>
    %cst_116 = arith.constant 9.99999974E-6 : f32
    %355 = vector.broadcast %cst_116 : f32 to vector<16x1xf32>
    %356 = arith.addf %352, %355 : vector<16x1xf32>
    %357 = math.rsqrt %356 : vector<16x1xf32>
    %358 = vector.broadcast %357 : vector<16x1xf32> to vector<16x32xf32>
    %359 = arith.mulf %354, %358 : vector<16x32xf32>
    %360 = vector.broadcast %340 : vector<1x32xf32> to vector<16x32xf32>
    %361 = arith.mulf %359, %360 : vector<16x32xf32>
    %362 = vector.broadcast %341 : vector<1x32xf32> to vector<16x32xf32>
    %363 = arith.addf %361, %362 : vector<16x32xf32>
    %c1 = arith.constant 1 : index
    %c0_117 = arith.constant 0 : index
    %c0_118 = arith.constant 0 : index
    %364 = vector.load %arg7[%c1, %c0_117, %c0_118] : memref<2x32x256xf32, #tpu.memory_space<vmem>>, vector<1x32x256xf32>
    %365 = vector.shape_cast %364 : vector<1x32x256xf32> to vector<32x256xf32>
    %c1_119 = arith.constant 1 : index
    %c0_120 = arith.constant 0 : index
    %c0_121 = arith.constant 0 : index
    %366 = vector.load %arg8[%c1_119, %c0_120, %c0_121] : memref<2x128x32xf32, #tpu.memory_space<vmem>>, vector<1x128x32xf32>
    %367 = vector.shape_cast %366 : vector<1x128x32xf32> to vector<128x32xf32>
    %c1_122 = arith.constant 1 : index
    %c0_123 = arith.constant 0 : index
    %c0_124 = arith.constant 0 : index
    %368 = vector.load %arg9[%c1_122, %c0_123, %c0_124] : memref<2x8x128xf32, #tpu.memory_space<vmem>>, vector<1x8x128xf32>
    %369 = vector.shape_cast %368 : vector<1x8x128xf32> to vector<8x128xf32>
    %370 = vector.extract_strided_slice %365 {offsets = [0, 0], sizes = [32, 96], strides = [1, 1]} : vector<32x256xf32> to vector<32x96xf32>
    %371 = arith.truncf %363 : vector<16x32xf32> to vector<16x32xbf16>
    %372 = arith.truncf %370 : vector<32x96xf32> to vector<32x96xbf16>
    %cst_125 = arith.constant dense<0.000000e+00> : vector<16x96xf32>
    %373 = tpu.matmul %371, %372, %cst_125 {dimension_numbers = #tpu.dot_dimension_numbers<[1], [0], [0], [1], [0, 0, 1, 1], [], []>} : vector<16x32xbf16>, vector<32x96xbf16>, vector<16x96xf32> -> vector<16x96xf32>
    %374 = vector.extract_strided_slice %369 {offsets = [0, 0], sizes = [1, 96], strides = [1, 1]} : vector<8x128xf32> to vector<1x96xf32>
    %375 = vector.broadcast %374 : vector<1x96xf32> to vector<16x96xf32>
    %376 = arith.addf %373, %375 : vector<16x96xf32>
    %377 = vector.extract_strided_slice %376 {offsets = [0, 0], sizes = [16, 32], strides = [1, 1]} : vector<16x96xf32> to vector<16x32xf32>
    %378 = vector.extract_strided_slice %376 {offsets = [0, 32], sizes = [16, 32], strides = [1, 1]} : vector<16x96xf32> to vector<16x32xf32>
    %379 = vector.extract_strided_slice %376 {offsets = [0, 64], sizes = [16, 32], strides = [1, 1]} : vector<16x96xf32> to vector<16x32xf32>
    %380 = vector.extract_strided_slice %377 {offsets = [0, 0], sizes = [16, 8], strides = [1, 1]} : vector<16x32xf32> to vector<16x8xf32>
    %381 = vector.extract_strided_slice %378 {offsets = [0, 0], sizes = [16, 8], strides = [1, 1]} : vector<16x32xf32> to vector<16x8xf32>
    %382 = vector.extract_strided_slice %379 {offsets = [0, 0], sizes = [16, 8], strides = [1, 1]} : vector<16x32xf32> to vector<16x8xf32>
    %383 = arith.truncf %380 : vector<16x8xf32> to vector<16x8xbf16>
    %384 = arith.truncf %381 : vector<16x8xf32> to vector<16x8xbf16>
    %cst_126 = arith.constant dense<0.000000e+00> : vector<16x16xf32>
    %385 = tpu.matmul %383, %384, %cst_126 {dimension_numbers = #tpu.dot_dimension_numbers<[1], [1], [0], [0], [0, 0, 1, 0], [], []>} : vector<16x8xbf16>, vector<16x8xbf16>, vector<16x16xf32> -> vector<16x16xf32>
    %cst_127 = arith.constant 0.353553385 : f32
    %386 = vector.broadcast %cst_127 : f32 to vector<16x16xf32>
    %387 = arith.mulf %385, %386 : vector<16x16xf32>
    %388 = arith.addf %387, %179 : vector<16x16xf32>
    %cst_128 = arith.constant dense<0xFF800000> : vector<16xf32>
    %389 = vector.multi_reduction <maximumf>, %388, %cst_128 [1] : vector<16x16xf32> to vector<16xf32>
    %390 = vector.shape_cast %389 : vector<16xf32> to vector<16x1xf32>
    %391 = vector.broadcast %390 : vector<16x1xf32> to vector<16x16xf32>
    %392 = arith.subf %388, %391 : vector<16x16xf32>
    %393 = math.exp %392 : vector<16x16xf32>
    %cst_129 = arith.constant dense<0.000000e+00> : vector<16xf32>
    %394 = vector.multi_reduction <add>, %393, %cst_129 [1] : vector<16x16xf32> to vector<16xf32>
    %395 = vector.shape_cast %394 : vector<16xf32> to vector<16x1xf32>
    %396 = vector.broadcast %395 : vector<16x1xf32> to vector<16x16xf32>
    %397 = arith.divf %393, %396 : vector<16x16xf32>
    %398 = arith.truncf %397 : vector<16x16xf32> to vector<16x16xbf16>
    %399 = arith.truncf %382 : vector<16x8xf32> to vector<16x8xbf16>
    %cst_130 = arith.constant dense<0.000000e+00> : vector<16x8xf32>
    %400 = tpu.matmul %398, %399, %cst_130 {dimension_numbers = #tpu.dot_dimension_numbers<[1], [0], [0], [1], [0, 0, 1, 1], [], []>} : vector<16x16xbf16>, vector<16x8xbf16>, vector<16x8xf32> -> vector<16x8xf32>
    %401 = vector.extract_strided_slice %377 {offsets = [0, 8], sizes = [16, 8], strides = [1, 1]} : vector<16x32xf32> to vector<16x8xf32>
    %402 = vector.extract_strided_slice %378 {offsets = [0, 8], sizes = [16, 8], strides = [1, 1]} : vector<16x32xf32> to vector<16x8xf32>
    %403 = vector.extract_strided_slice %379 {offsets = [0, 8], sizes = [16, 8], strides = [1, 1]} : vector<16x32xf32> to vector<16x8xf32>
    %404 = arith.truncf %401 : vector<16x8xf32> to vector<16x8xbf16>
    %405 = arith.truncf %402 : vector<16x8xf32> to vector<16x8xbf16>
    %cst_131 = arith.constant dense<0.000000e+00> : vector<16x16xf32>
    %406 = tpu.matmul %404, %405, %cst_131 {dimension_numbers = #tpu.dot_dimension_numbers<[1], [1], [0], [0], [0, 0, 1, 0], [], []>} : vector<16x8xbf16>, vector<16x8xbf16>, vector<16x16xf32> -> vector<16x16xf32>
    %cst_132 = arith.constant 0.353553385 : f32
    %407 = vector.broadcast %cst_132 : f32 to vector<16x16xf32>
    %408 = arith.mulf %406, %407 : vector<16x16xf32>
    %409 = arith.addf %408, %179 : vector<16x16xf32>
    %cst_133 = arith.constant dense<0xFF800000> : vector<16xf32>
    %410 = vector.multi_reduction <maximumf>, %409, %cst_133 [1] : vector<16x16xf32> to vector<16xf32>
    %411 = vector.shape_cast %410 : vector<16xf32> to vector<16x1xf32>
    %412 = vector.broadcast %411 : vector<16x1xf32> to vector<16x16xf32>
    %413 = arith.subf %409, %412 : vector<16x16xf32>
    %414 = math.exp %413 : vector<16x16xf32>
    %cst_134 = arith.constant dense<0.000000e+00> : vector<16xf32>
    %415 = vector.multi_reduction <add>, %414, %cst_134 [1] : vector<16x16xf32> to vector<16xf32>
    %416 = vector.shape_cast %415 : vector<16xf32> to vector<16x1xf32>
    %417 = vector.broadcast %416 : vector<16x1xf32> to vector<16x16xf32>
    %418 = arith.divf %414, %417 : vector<16x16xf32>
    %419 = arith.truncf %418 : vector<16x16xf32> to vector<16x16xbf16>
    %420 = arith.truncf %403 : vector<16x8xf32> to vector<16x8xbf16>
    %cst_135 = arith.constant dense<0.000000e+00> : vector<16x8xf32>
    %421 = tpu.matmul %419, %420, %cst_135 {dimension_numbers = #tpu.dot_dimension_numbers<[1], [0], [0], [1], [0, 0, 1, 1], [], []>} : vector<16x16xbf16>, vector<16x8xbf16>, vector<16x8xf32> -> vector<16x8xf32>
    %422 = vector.extract_strided_slice %377 {offsets = [0, 16], sizes = [16, 8], strides = [1, 1]} : vector<16x32xf32> to vector<16x8xf32>
    %423 = vector.extract_strided_slice %378 {offsets = [0, 16], sizes = [16, 8], strides = [1, 1]} : vector<16x32xf32> to vector<16x8xf32>
    %424 = vector.extract_strided_slice %379 {offsets = [0, 16], sizes = [16, 8], strides = [1, 1]} : vector<16x32xf32> to vector<16x8xf32>
    %425 = arith.truncf %422 : vector<16x8xf32> to vector<16x8xbf16>
    %426 = arith.truncf %423 : vector<16x8xf32> to vector<16x8xbf16>
    %cst_136 = arith.constant dense<0.000000e+00> : vector<16x16xf32>
    %427 = tpu.matmul %425, %426, %cst_136 {dimension_numbers = #tpu.dot_dimension_numbers<[1], [1], [0], [0], [0, 0, 1, 0], [], []>} : vector<16x8xbf16>, vector<16x8xbf16>, vector<16x16xf32> -> vector<16x16xf32>
    %cst_137 = arith.constant 0.353553385 : f32
    %428 = vector.broadcast %cst_137 : f32 to vector<16x16xf32>
    %429 = arith.mulf %427, %428 : vector<16x16xf32>
    %430 = arith.addf %429, %179 : vector<16x16xf32>
    %cst_138 = arith.constant dense<0xFF800000> : vector<16xf32>
    %431 = vector.multi_reduction <maximumf>, %430, %cst_138 [1] : vector<16x16xf32> to vector<16xf32>
    %432 = vector.shape_cast %431 : vector<16xf32> to vector<16x1xf32>
    %433 = vector.broadcast %432 : vector<16x1xf32> to vector<16x16xf32>
    %434 = arith.subf %430, %433 : vector<16x16xf32>
    %435 = math.exp %434 : vector<16x16xf32>
    %cst_139 = arith.constant dense<0.000000e+00> : vector<16xf32>
    %436 = vector.multi_reduction <add>, %435, %cst_139 [1] : vector<16x16xf32> to vector<16xf32>
    %437 = vector.shape_cast %436 : vector<16xf32> to vector<16x1xf32>
    %438 = vector.broadcast %437 : vector<16x1xf32> to vector<16x16xf32>
    %439 = arith.divf %435, %438 : vector<16x16xf32>
    %440 = arith.truncf %439 : vector<16x16xf32> to vector<16x16xbf16>
    %441 = arith.truncf %424 : vector<16x8xf32> to vector<16x8xbf16>
    %cst_140 = arith.constant dense<0.000000e+00> : vector<16x8xf32>
    %442 = tpu.matmul %440, %441, %cst_140 {dimension_numbers = #tpu.dot_dimension_numbers<[1], [0], [0], [1], [0, 0, 1, 1], [], []>} : vector<16x16xbf16>, vector<16x8xbf16>, vector<16x8xf32> -> vector<16x8xf32>
    %443 = vector.extract_strided_slice %377 {offsets = [0, 24], sizes = [16, 8], strides = [1, 1]} : vector<16x32xf32> to vector<16x8xf32>
    %444 = vector.extract_strided_slice %378 {offsets = [0, 24], sizes = [16, 8], strides = [1, 1]} : vector<16x32xf32> to vector<16x8xf32>
    %445 = vector.extract_strided_slice %379 {offsets = [0, 24], sizes = [16, 8], strides = [1, 1]} : vector<16x32xf32> to vector<16x8xf32>
    %446 = arith.truncf %443 : vector<16x8xf32> to vector<16x8xbf16>
    %447 = arith.truncf %444 : vector<16x8xf32> to vector<16x8xbf16>
    %cst_141 = arith.constant dense<0.000000e+00> : vector<16x16xf32>
    %448 = tpu.matmul %446, %447, %cst_141 {dimension_numbers = #tpu.dot_dimension_numbers<[1], [1], [0], [0], [0, 0, 1, 0], [], []>} : vector<16x8xbf16>, vector<16x8xbf16>, vector<16x16xf32> -> vector<16x16xf32>
    %cst_142 = arith.constant 0.353553385 : f32
    %449 = vector.broadcast %cst_142 : f32 to vector<16x16xf32>
    %450 = arith.mulf %448, %449 : vector<16x16xf32>
    %451 = arith.addf %450, %179 : vector<16x16xf32>
    %cst_143 = arith.constant dense<0xFF800000> : vector<16xf32>
    %452 = vector.multi_reduction <maximumf>, %451, %cst_143 [1] : vector<16x16xf32> to vector<16xf32>
    %453 = vector.shape_cast %452 : vector<16xf32> to vector<16x1xf32>
    %454 = vector.broadcast %453 : vector<16x1xf32> to vector<16x16xf32>
    %455 = arith.subf %451, %454 : vector<16x16xf32>
    %456 = math.exp %455 : vector<16x16xf32>
    %cst_144 = arith.constant dense<0.000000e+00> : vector<16xf32>
    %457 = vector.multi_reduction <add>, %456, %cst_144 [1] : vector<16x16xf32> to vector<16xf32>
    %458 = vector.shape_cast %457 : vector<16xf32> to vector<16x1xf32>
    %459 = vector.broadcast %458 : vector<16x1xf32> to vector<16x16xf32>
    %460 = arith.divf %456, %459 : vector<16x16xf32>
    %461 = arith.truncf %460 : vector<16x16xf32> to vector<16x16xbf16>
    %462 = arith.truncf %445 : vector<16x8xf32> to vector<16x8xbf16>
    %cst_145 = arith.constant dense<0.000000e+00> : vector<16x8xf32>
    %463 = tpu.matmul %461, %462, %cst_145 {dimension_numbers = #tpu.dot_dimension_numbers<[1], [0], [0], [1], [0, 0, 1, 1], [], []>} : vector<16x16xbf16>, vector<16x8xbf16>, vector<16x8xf32> -> vector<16x8xf32>
    %464 = tpu.concatenate %400, %421, %442, %463 in 1 : vector<16x8xf32>, vector<16x8xf32>, vector<16x8xf32>, vector<16x8xf32> -> vector<16x32xf32>
    %465 = vector.extract_strided_slice %365 {offsets = [0, 96], sizes = [32, 32], strides = [1, 1]} : vector<32x256xf32> to vector<32x32xf32>
    %466 = arith.truncf %464 : vector<16x32xf32> to vector<16x32xbf16>
    %467 = arith.truncf %465 : vector<32x32xf32> to vector<32x32xbf16>
    %cst_146 = arith.constant dense<0.000000e+00> : vector<16x32xf32>
    %468 = tpu.matmul %466, %467, %cst_146 {dimension_numbers = #tpu.dot_dimension_numbers<[1], [0], [0], [1], [0, 0, 1, 1], [], []>} : vector<16x32xbf16>, vector<32x32xbf16>, vector<16x32xf32> -> vector<16x32xf32>
    %469 = vector.extract_strided_slice %369 {offsets = [1, 0], sizes = [1, 32], strides = [1, 1]} : vector<8x128xf32> to vector<1x32xf32>
    %470 = vector.broadcast %469 : vector<1x32xf32> to vector<16x32xf32>
    %471 = arith.addf %468, %470 : vector<16x32xf32>
    %472 = arith.addf %363, %471 : vector<16x32xf32>
    %473 = vector.extract_strided_slice %369 {offsets = [2, 0], sizes = [1, 32], strides = [1, 1]} : vector<8x128xf32> to vector<1x32xf32>
    %474 = vector.extract_strided_slice %369 {offsets = [3, 0], sizes = [1, 32], strides = [1, 1]} : vector<8x128xf32> to vector<1x32xf32>
    %cst_147 = arith.constant dense<0.000000e+00> : vector<16xf32>
    %475 = vector.multi_reduction <add>, %472, %cst_147 [1] : vector<16x32xf32> to vector<16xf32>
    %476 = vector.shape_cast %475 : vector<16xf32> to vector<16x1xf32>
    %cst_148 = arith.constant 3.200000e+01 : f32
    %477 = vector.broadcast %cst_148 : f32 to vector<16x1xf32>
    %478 = arith.divf %476, %477 : vector<16x1xf32>
    %479 = vector.broadcast %478 : vector<16x1xf32> to vector<16x32xf32>
    %480 = arith.subf %472, %479 : vector<16x32xf32>
    %481 = arith.mulf %480, %480 : vector<16x32xf32>
    %cst_149 = arith.constant dense<0.000000e+00> : vector<16xf32>
    %482 = vector.multi_reduction <add>, %481, %cst_149 [1] : vector<16x32xf32> to vector<16xf32>
    %483 = vector.shape_cast %482 : vector<16xf32> to vector<16x1xf32>
    %cst_150 = arith.constant 3.200000e+01 : f32
    %484 = vector.broadcast %cst_150 : f32 to vector<16x1xf32>
    %485 = arith.divf %483, %484 : vector<16x1xf32>
    %486 = vector.broadcast %478 : vector<16x1xf32> to vector<16x32xf32>
    %487 = arith.subf %472, %486 : vector<16x32xf32>
    %cst_151 = arith.constant 9.99999974E-6 : f32
    %488 = vector.broadcast %cst_151 : f32 to vector<16x1xf32>
    %489 = arith.addf %485, %488 : vector<16x1xf32>
    %490 = math.rsqrt %489 : vector<16x1xf32>
    %491 = vector.broadcast %490 : vector<16x1xf32> to vector<16x32xf32>
    %492 = arith.mulf %487, %491 : vector<16x32xf32>
    %493 = vector.broadcast %473 : vector<1x32xf32> to vector<16x32xf32>
    %494 = arith.mulf %492, %493 : vector<16x32xf32>
    %495 = vector.broadcast %474 : vector<1x32xf32> to vector<16x32xf32>
    %496 = arith.addf %494, %495 : vector<16x32xf32>
    %497 = vector.extract_strided_slice %365 {offsets = [0, 128], sizes = [32, 128], strides = [1, 1]} : vector<32x256xf32> to vector<32x128xf32>
    %498 = arith.truncf %496 : vector<16x32xf32> to vector<16x32xbf16>
    %499 = arith.truncf %497 : vector<32x128xf32> to vector<32x128xbf16>
    %cst_152 = arith.constant dense<0.000000e+00> : vector<16x128xf32>
    %500 = tpu.matmul %498, %499, %cst_152 {dimension_numbers = #tpu.dot_dimension_numbers<[1], [0], [0], [1], [0, 0, 1, 1], [], []>} : vector<16x32xbf16>, vector<32x128xbf16>, vector<16x128xf32> -> vector<16x128xf32>
    %501 = vector.extract_strided_slice %369 {offsets = [4, 0], sizes = [1, 128], strides = [1, 1]} : vector<8x128xf32> to vector<1x128xf32>
    %502 = vector.broadcast %501 : vector<1x128xf32> to vector<16x128xf32>
    %503 = arith.addf %500, %502 : vector<16x128xf32>
    %cst_153 = arith.constant 5.000000e-01 : f32
    %504 = vector.broadcast %cst_153 : f32 to vector<16x128xf32>
    %505 = arith.mulf %504, %503 : vector<16x128xf32>
    %cst_154 = arith.constant 4.471500e-02 : f32
    %506 = vector.broadcast %cst_154 : f32 to vector<16x128xf32>
    %507 = arith.mulf %506, %503 : vector<16x128xf32>
    %508 = arith.mulf %507, %503 : vector<16x128xf32>
    %509 = arith.mulf %508, %503 : vector<16x128xf32>
    %510 = arith.addf %503, %509 : vector<16x128xf32>
    %cst_155 = arith.constant 0.797884583 : f32
    %511 = vector.broadcast %cst_155 : f32 to vector<16x128xf32>
    %512 = arith.mulf %511, %510 : vector<16x128xf32>
    %513 = math.tanh %512 : vector<16x128xf32>
    %cst_156 = arith.constant 1.000000e+00 : f32
    %514 = vector.broadcast %cst_156 : f32 to vector<16x128xf32>
    %515 = arith.addf %514, %513 : vector<16x128xf32>
    %516 = arith.mulf %505, %515 : vector<16x128xf32>
    %517 = arith.truncf %516 : vector<16x128xf32> to vector<16x128xbf16>
    %518 = arith.truncf %367 : vector<128x32xf32> to vector<128x32xbf16>
    %cst_157 = arith.constant dense<0.000000e+00> : vector<16x32xf32>
    %519 = tpu.matmul %517, %518, %cst_157 {dimension_numbers = #tpu.dot_dimension_numbers<[1], [0], [0], [1], [0, 0, 1, 1], [], []>} : vector<16x128xbf16>, vector<128x32xbf16>, vector<16x32xf32> -> vector<16x32xf32>
    %520 = vector.extract_strided_slice %369 {offsets = [5, 0], sizes = [1, 32], strides = [1, 1]} : vector<8x128xf32> to vector<1x32xf32>
    %521 = vector.broadcast %520 : vector<1x32xf32> to vector<16x32xf32>
    %522 = arith.addf %519, %521 : vector<16x32xf32>
    %523 = arith.addf %496, %522 : vector<16x32xf32>
    %524 = vector.extract_strided_slice %369 {offsets = [6, 0], sizes = [1, 32], strides = [1, 1]} : vector<8x128xf32> to vector<1x32xf32>
    %525 = vector.extract_strided_slice %369 {offsets = [7, 0], sizes = [1, 32], strides = [1, 1]} : vector<8x128xf32> to vector<1x32xf32>
    %cst_158 = arith.constant dense<0.000000e+00> : vector<16xf32>
    %526 = vector.multi_reduction <add>, %523, %cst_158 [1] : vector<16x32xf32> to vector<16xf32>
    %527 = vector.shape_cast %526 : vector<16xf32> to vector<16x1xf32>
    %cst_159 = arith.constant 3.200000e+01 : f32
    %528 = vector.broadcast %cst_159 : f32 to vector<16x1xf32>
    %529 = arith.divf %527, %528 : vector<16x1xf32>
    %530 = vector.broadcast %529 : vector<16x1xf32> to vector<16x32xf32>
    %531 = arith.subf %523, %530 : vector<16x32xf32>
    %532 = arith.mulf %531, %531 : vector<16x32xf32>
    %cst_160 = arith.constant dense<0.000000e+00> : vector<16xf32>
    %533 = vector.multi_reduction <add>, %532, %cst_160 [1] : vector<16x32xf32> to vector<16xf32>
    %534 = vector.shape_cast %533 : vector<16xf32> to vector<16x1xf32>
    %cst_161 = arith.constant 3.200000e+01 : f32
    %535 = vector.broadcast %cst_161 : f32 to vector<16x1xf32>
    %536 = arith.divf %534, %535 : vector<16x1xf32>
    %537 = vector.broadcast %529 : vector<16x1xf32> to vector<16x32xf32>
    %538 = arith.subf %523, %537 : vector<16x32xf32>
    %cst_162 = arith.constant 9.99999974E-6 : f32
    %539 = vector.broadcast %cst_162 : f32 to vector<16x1xf32>
    %540 = arith.addf %536, %539 : vector<16x1xf32>
    %541 = math.rsqrt %540 : vector<16x1xf32>
    %542 = vector.broadcast %541 : vector<16x1xf32> to vector<16x32xf32>
    %543 = arith.mulf %538, %542 : vector<16x32xf32>
    %544 = vector.broadcast %524 : vector<1x32xf32> to vector<16x32xf32>
    %545 = arith.mulf %543, %544 : vector<16x32xf32>
    %546 = vector.broadcast %525 : vector<1x32xf32> to vector<16x32xf32>
    %547 = arith.addf %545, %546 : vector<16x32xf32>
    %548 = tpu.iota {dimensions = array<i32: 0>} : vector<12x16xi32>
    %549 = tpu.iota {dimensions = array<i32: 1>} : vector<12x16xi32>
    %c0_i32_163 = arith.constant 0 : i32
    %550 = vector.broadcast %c0_i32_163 : i32 to vector<12x16xi32>
    %c8_i32_164 = arith.constant 8 : i32
    %551 = vector.broadcast %c8_i32_164 : i32 to vector<12x16xi32>
    %552 = arith.cmpi sge, %549, %551 : vector<12x16xi32>
    %c1_i32_165 = arith.constant 1 : i32
    %553 = vector.broadcast %c1_i32_165 : i32 to vector<12x16xi32>
    %554 = arith.select %552, %553, %550 : vector<12x16xi1>, vector<12x16xi32>
    %c8_i32_166 = arith.constant 8 : i32
    %555 = vector.broadcast %c8_i32_166 : i32 to vector<12x16xi32>
    %556 = arith.muli %554, %555 : vector<12x16xi32>
    %557 = arith.subi %549, %556 : vector<12x16xi32>
    %c0_i32_167 = arith.constant 0 : i32
    %558 = vector.broadcast %c0_i32_167 : i32 to vector<12x16xi32>
    %c0_i32_168 = arith.constant 0 : i32
    %559 = vector.broadcast %c0_i32_168 : i32 to vector<12x16xi32>
    %560 = arith.cmpi eq, %554, %559 : vector<12x16xi32>
    %c0_i32_169 = arith.constant 0 : i32
    %561 = vector.broadcast %c0_i32_169 : i32 to vector<12x16xi32>
    %562 = arith.select %560, %561, %558 : vector<12x16xi1>, vector<12x16xi32>
    %c1_i32_170 = arith.constant 1 : i32
    %563 = vector.broadcast %c1_i32_170 : i32 to vector<12x16xi32>
    %564 = arith.cmpi eq, %554, %563 : vector<12x16xi32>
    %c5_i32_171 = arith.constant 5 : i32
    %565 = vector.broadcast %c5_i32_171 : i32 to vector<12x16xi32>
    %566 = arith.select %564, %565, %562 : vector<12x16xi1>, vector<12x16xi32>
    %c0_i32_172 = arith.constant 0 : i32
    %567 = vector.broadcast %c0_i32_172 : i32 to vector<12x16xi32>
    %c0_i32_173 = arith.constant 0 : i32
    %568 = vector.broadcast %c0_i32_173 : i32 to vector<12x16xi32>
    %569 = arith.cmpi eq, %554, %568 : vector<12x16xi32>
    %c5_i32_174 = arith.constant 5 : i32
    %570 = vector.broadcast %c5_i32_174 : i32 to vector<12x16xi32>
    %571 = arith.select %569, %570, %567 : vector<12x16xi1>, vector<12x16xi32>
    %c1_i32_175 = arith.constant 1 : i32
    %572 = vector.broadcast %c1_i32_175 : i32 to vector<12x16xi32>
    %573 = arith.cmpi eq, %554, %572 : vector<12x16xi32>
    %c7_i32_176 = arith.constant 7 : i32
    %574 = vector.broadcast %c7_i32_176 : i32 to vector<12x16xi32>
    %575 = arith.select %573, %574, %571 : vector<12x16xi1>, vector<12x16xi32>
    %576 = arith.addi %566, %557 : vector<12x16xi32>
    %c1_i32_177 = arith.constant 1 : i32
    %577 = vector.broadcast %c1_i32_177 : i32 to vector<12x16xi32>
    %578 = arith.subi %576, %577 : vector<12x16xi32>
    %579 = arith.cmpi eq, %548, %578 : vector<12x16xi32>
    %c1_i32_178 = arith.constant 1 : i32
    %580 = vector.broadcast %c1_i32_178 : i32 to vector<12x16xi32>
    %581 = arith.cmpi sge, %557, %580 : vector<12x16xi32>
    %582 = arith.andi %579, %581 : vector<12x16xi1>
    %583 = arith.cmpi sle, %557, %575 : vector<12x16xi32>
    %584 = arith.andi %582, %583 : vector<12x16xi1>
    %cst_179 = arith.constant 1.000000e+00 : f32
    %cst_180 = arith.constant 0.000000e+00 : f32
    %585 = vector.broadcast %cst_179 : f32 to vector<12x16xf32>
    %586 = vector.broadcast %cst_180 : f32 to vector<12x16xf32>
    %587 = arith.select %584, %585, %586 : vector<12x16xi1>, vector<12x16xf32>
    %cst_181 = arith.constant dense<0.000000e+00> : vector<12x32xf32>
    %588 = tpu.matmul %587, %547, %cst_181 {dimension_numbers = #tpu.dot_dimension_numbers<[1], [0], [0], [1], [0, 0, 1, 1], [], []>} : vector<12x16xf32>, vector<16x32xf32>, vector<12x32xf32> -> vector<12x32xf32>
    %c0_182 = arith.constant 0 : index
    %c0_183 = arith.constant 0 : index
    %589 = vector.load %arg10[%c0_182, %c0_183] : memref<12x32xf32, #tpu.memory_space<vmem>>, vector<12x32xf32>
    tpu.vector_store %arg10[%c0_182, %c0_183], %588 {strides = array<i32>} : memref<12x32xf32, #tpu.memory_space<vmem>>, vector<12x32xf32>,
    return
  }
}

</mosaic_0001>

<bundles_post_ra>
// kernel: tpu_custom_call.1
= control target key start
LH: loop header
LB: loop body
LE: loop exit
PB: predicated region body
PF: predicated region fallthrough
CT: control target
= control target key end

     0   :  { %vm51_vm0 = vcmask 1043456   ;;  %s2737_s0 = inlined_call_operand.vmem [shape: f32[12,8], index: 0, kind: input, shape index: {}]   ;;  %s2738_s1 = inlined_call_operand.vmem [shape: f32[12,12], index: 1, kind: input, shape index: {}]   ;;  %s2739_s2 = inlined_call_operand.vmem [shape: f32[24,64], index: 2, kind: input, shape index: {}]   ;;  %s2740_s3 = inlined_call_operand.vmem [shape: f32[4,32], index: 3, kind: input, shape index: {}]   ;;  %s2741_s4 = inlined_call_operand.vmem [shape: f32[16,32], index: 4, kind: input, shape index: {}]   ;;  %s2742_s5 = inlined_call_operand.vmem [shape: f32[32,32], index: 5, kind: input, shape index: {}]   ;;  %s2743_s6 = inlined_call_operand.vmem [shape: f32[2,32], index: 6, kind: input, shape index: {}]   ;;  %s2744_s7 = inlined_call_operand.vmem [shape: f32[2,32,256], index: 7, kind: input, shape index: {}]   ;;  %s2745_s8 = inlined_call_operand.vmem [shape: f32[2,128,32], index: 8, kind: input, shape index: {}]   ;;  %s2746_s9 = inlined_call_operand.vmem [shape: f32[2,8,128], index: 9, kind: input, shape index: {}]   ;;  %s2747_s10 = inlined_call_operand.hbm [shape: f32[12,32], index: 10, kind: output, shape index: {}]  }
   0x1   :  { %v39_v0 = vld [vmem:[%s2739_s2] sm:$0xff]  ;;  %v44_v2 = vld [vmem:[%s2737_s0 + $0x8] sm:$0xf] }
   0x2   :  { %v43_v1 = vld [vmem:[%s2737_s0] sm:$0xff]  ;;  %v46_v3 = vpack.c.bf16 %v39_v0, %v39_v0 }
   0x3   :  { %15 = vsyncpa [#allocation3], 0  ;;  %v45_v5 = vpack.c.bf16 %v44_v2, %v43_v1  ;;  %vm47_vm1 = vcmask 64512   ;;  %s1963_s19 = smov 112   ;;  %vm82_vm2 = vcmask 1045504   ;;  %v37_v9 = vld [vmem:[%s2738_s1] sm:$0xff] }
   0x4   :  { %v53_v4 = vsel %vm51_vm0, %v46_v3, 0  ;;  %v38_v10 = vld [vmem:[%s2738_s1 + $0x8] sm:$0xf]  ;;  %vm78_vm3 = vcmask 97280   ;;  %v41_v15 = vld [vmem:[%s2739_s2 + $0x10] sm:$0xff]  ;;  %vm116_vm8 = vcmask 130048  }
   0x5   :  { %62 = vmatpush.bf16.msra.mxu0 %v53_v4  ;;  %v72_v13 = vpack.c.bf16 %v38_v10, %v37_v9  ;;  %v40_v14 = vld [vmem:[%s2739_s2 + $0x8] sm:$0xff]  ;;  %v42_v17 = vld [vmem:[%s2740_s3] sm:$0xf]  ;;  %s1964_s2 = smov 96   ;;  %vm179_vm12 = vcmask 257024   ;;  %vm175_vm14 = vcmask 261120  }
   0x6   :  { %v115_v16 = vpack.c.bf16 %v41_v15, %v40_v14  ;;  %v74_v18 = vperm.slane %v42_v17, 1  ;;  %v69_v22 = vperm.slane %v42_v17, 0  ;;  %v138_v42 = vperm.slane %v42_v17, 3  ;;  %v251_v0 = vld [vmem:[%s2742_s5 + $0x10] sm:$0xff]  ;;  %v252_v1 = vld [vmem:[%s2742_s5 + $0x18] sm:$0xff]  ;;  %v249_v3 = vld [vmem:[%s2742_s5] sm:$0xff] }
   0x7   :  { %v134_v46 = vperm.slane %v42_v17, 2  ;;  %v255_v2 = vpack.c.bf16 %v252_v1, %v251_v0  ;;  %v250_v4 = vld [vmem:[%s2742_s5 + $0x8] sm:$0xff]  ;;  %s1966_s1 = smov 80   ;;  %s1967_s3 = smov 120  }
   0x8   :  { %1724 = vmatmul.msk.bf16.vlgmr.msra.gmra.mxu0 %vm47_vm1, %v45_v5  ;;  %127 = vmatpush.bf16.msra.mxu2 %v115_v16  ;;  %v254_v5 = vpack.c.bf16 %v250_v4, %v249_v3  ;;  %s1968_s28 = smov 88   ;;  %s1969_s29 = smov 72  }
   0x9   :  { %266 = vmatpush.bf16.msrb.mxu0 %v255_v2  ;;  %s1970_s30 = smov 104   ;;  %s1974_s11 = smov 56  }
   0xa   :  { %s1975_s12 = smov 48   ;;  %s1976_s13 = smov 64  }
   0xb   :  { %s1977_s14 = smov 40   ;;  %s1978_s15 = smov 32  }
   0xc   :  { %s1979_s16 = smov 8   ;;  %s1980_s17 = smov 16  }
   0xd   :  { %267 = vmatpush.bf16.msrb.mxu0 %v254_v5  ;;  %v2158_v5 = vld [vmem:[%s2746_s9] sm:$0xff]  ;;  %s1981_s18 = smov 24   ;;  %s1984_s0 = smov 128  }
  0x85   :  { %v64_v6 = vpop.f32.mrf.mxu0 }
  0x86   :  { %v70_v24 = vadd.f32 %v69_v22, %v64_v6 }
  0x8d   :  { %v66_v7 = vpop.f32.mrf.mxu0 }
  0x8e   :  { %v73_v8 = vpack.c.bf16 %v66_v7, %v64_v6  ;;  %v71_v29 = vadd.f32 %v69_v22, %v66_v7  ;;  %v247_v6 = vld [vmem:[%s2741_s4] sm:$0xff]  ;;  %v248_v7 = vld [vmem:[%s2741_s4 + $0x8] sm:$0xff] }
  0x90   :  { %76 = vrot.lane.b32.xlu0 %v73_v8, %s1963_s19  ;;  %v253_v8 = vpack.c.bf16 %v248_v7, %v247_v6  ;;  %v364_v6 = vperm.slane %v2158_v5, 0 }
  0x92   :  { %1731 = vmatmul.msk.bf16.vlgmr.msrb.gmra.mxu0 %vm175_vm14, %v253_v8 }
 0x102   :  { %v77_v11 = vpop.permute.xlu0 %76 }
 0x103   :  { %v84_v12 = vsel %vm82_vm2, %v77_v11, 0 }
 0x104   :  { %93 = vmatpush.bf16.msra.mxu1 %v84_v12  ;;  %v207_v12 = vlaneseq }
 0x106   :  { %v2094_v17 = vshrl.u32 %v207_v12, 7 }
 0x107   :  { %1725 = vmatmul.msk.bf16.vlgmr.msra.gmra.mxu1 %vm78_vm3, %v72_v13 }
 0x108   :  { %v1729_v22 = vadd.s32 4294967295, %v2094_v17 }
 0x184   :  { %v95_v19 = vpop.f32.mrf.mxu1 }
 0x185   :  { %v96_v20 = vadd.f32 %v95_v19, %v74_v18  ;;  %v2097_v19 = vadd.s32 8, %v2094_v17 }
 0x187   :  { %v102_v21 = vmul.f32 0.1, %v96_v20  ;;  %vm100_vm4 = vcmp.ge.f32.partialorder %v96_v20, 0.0 }
 0x189   :  { %v104_v23 = vsel %vm100_vm4, %v96_v20, %v102_v21  ;;  %v2099_v21 = vand.u32 127, %v207_v12 }
 0x18a   :  { %v106_v27 = vadd.f32 %v104_v23, %v70_v24 }
 0x18c   :  { %v97_v25 = vpop.f32.mrf.mxu1  ;;  %v110_v32 = vmul.f32 0.1, %v106_v27  ;;  %vm108_vm6 = vcmp.ge.f32.partialorder %v106_v27, 0.0 }
 0x18d   :  { %v98_v26 = vadd.f32 %v97_v25, %v74_v18 }
 0x18e   :  { %v112_v34 = vsel %vm108_vm6, %v106_v27, %v110_v32  ;;  %vm236_vm6 = vcmp.ge.s32.totalorder %v2094_v17, 1 }
 0x18f   :  { %vm101_vm5 = vcmp.ge.f32.partialorder %v98_v26, 0.0  ;;  %v103_v28 = vmul.f32 0.1, %v98_v26 }
 0x191   :  { %v105_v30 = vsel %vm101_vm5, %v98_v26, %v103_v28  ;;  %v1728_v26 = vadd.s32 4294967288, %v2097_v19  ;;  %vm234_vm5 = vcmp.eq.s32.totalorder %v2099_v21, %v1729_v22 }
 0x192   :  { %v107_v31 = vadd.f32 %v105_v30, %v71_v29 }
 0x194   :  { %vm109_vm7 = vcmp.ge.f32.partialorder %v107_v31, 0.0  ;;  %v111_v33 = vmul.f32 0.1, %v107_v31 }
 0x196   :  { %v113_v35 = vsel %vm109_vm7, %v107_v31, %v111_v33  ;;  %vm238_vm7 = vmand %vm234_vm5, %vm236_vm6  ;;  %v231_v31 = vadd.s32 5, %v1728_v26  ;;  %vm278_vm5 = vcmp.eq.s32.totalorder %v2094_v17, 0 }
 0x197   :  { %v114_v36 = vpack.c.bf16 %v113_v35, %v112_v34 }
 0x198   :  { %v1730_v34 = vadd.s32 4294967295, %v231_v31 }
 0x199   :  { %1726 = vmatmul.msk.bf16.vlgmr.msra.gmra.mxu2 %vm116_vm8, %v114_v36 }
 0x21c   :  { %v129_v37 = vpop.f32.mrf.mxu2 }
 0x21d   :  { %v135_v51 = vadd.f32 %v134_v46, %v129_v37 }
 0x224   :  { %v131_v38 = vpop.f32.mrf.mxu2 }
 0x225   :  { %v137_v39 = vpack.c.bf16 %v131_v38, %v129_v37  ;;  %v136_v52 = vadd.f32 %v134_v46, %v131_v38  ;;  %v1965_v37 = vmov 0.0   ;;  %v269_v46 = vpop.f32.mrf.mxu0 }
 0x227   :  { %140 = vrot.lane.b32.xlu0 %v137_v39, %s1964_s2 }
 0x299   :  { %v141_v40 = vpop.permute.xlu0 %140 }
 0x29a   :  { %v143_v41 = vsel %vm82_vm2, %v141_v40, 0  ;;  %v340_v40 = vld [vmem:[%s2744_s7 + $0x20] sm:$0xff] }
 0x29b   :  { %152 = vmatpush.bf16.msra.mxu3 %v143_v41  ;;  %v342_v41 = vld [vmem:[%s2744_s7 + $0x30] sm:$0xff] }
 0x29e   :  { %1727 = vmatmul.msk.bf16.vlgmr.msra.gmra.mxu3 %vm78_vm3, %v72_v13 }
 0x321   :  { %v154_v43 = vpop.f32.mrf.mxu3 }
 0x322   :  { %v155_v44 = vadd.f32 %v154_v43, %v138_v42  ;;  %v336_v43 = vld [vmem:[%s2744_s7] sm:$0xff] }
 0x324   :  { %v161_v45 = vmul.f32 0.1, %v155_v44  ;;  %vm159_vm9 = vcmp.ge.f32.partialorder %v155_v44, 0.0 }
 0x326   :  { %v163_v49 = vsel %vm159_vm9, %v155_v44, %v161_v45  ;;  %vm240_vm9 = vcmp.le.s32.totalorder %v2094_v17, 5  ;;  %v338_v44 = vld [vmem:[%s2744_s7 + $0x10] sm:$0xff] }
 0x327   :  { %v165_v54 = vadd.f32 %v163_v49, %v135_v51  ;;  %v2132_v45 = vpack.c.bf16 %v338_v44, %v336_v43 }
 0x329   :  { %v156_v47 = vpop.f32.mrf.mxu3  ;;  %v169_v58 = vmul.f32 0.1, %v165_v54  ;;  %vm167_vm13 = vcmp.ge.f32.partialorder %v165_v54, 0.0 }
 0x32a   :  { %v157_v48 = vadd.f32 %v156_v47, %v138_v42  ;;  %v2123_v42 = vpack.c.bf16 %v342_v41, %v340_v40  ;;  %v246_v47 = vld [vmem:[%s2743_s6] sm:$0x3] }
 0x32b   :  { %v171_v61 = vsel %vm167_vm13, %v165_v54, %v169_v58  ;;  %vm242_vm13 = vmand %vm238_vm7, %vm240_vm9  ;;  %vm279_vm7 = vcmp.eq.s32.totalorder %v1728_v26, 0 }
 0x32c   :  { %vm160_vm10 = vcmp.ge.f32.partialorder %v157_v48, 0.0  ;;  %v162_v50 = vmul.f32 0.1, %v157_v48  ;;  %v173_v62 = vmul.f32 %v171_v61, %v171_v61  ;;  %v244_v38 = vsel %vm242_vm13, 1.0, %v1965_v37  ;;  %374 = vmatpush.bf16.msrb.mxu2 %v2123_v42 }
 0x32d   :  { %v281_v58 = vsel %vm279_vm7, 1.0, %v1965_v37 }
 0x32e   :  { %v164_v53 = vsel %vm160_vm10, %v157_v48, %v162_v50  ;;  %v176_v63 = vsel %vm175_vm14, %v173_v62, 0.0  ;;  %v256_v48 = vperm.slane %v246_v47, 0  ;;  %v271_v50 = vpop.f32.mrf.mxu0 }
 0x32f   :  { %v166_v55 = vadd.f32 %v164_v53, %v136_v52  ;;  %v316_v53 = vperm.slane %v246_v47, 1 }
 0x330   :  { %375 = vmatpush.bf16.msrb.mxu2 %v2132_v45  ;;  %v270_v49 = vadd.f32 %v269_v46, %v256_v48  ;;  %v272_v54 = vadd.f32 %v271_v50, %v256_v48 }
 0x331   :  { %vm168_vm11 = vcmp.ge.f32.partialorder %v166_v55, 0.0  ;;  %v170_v56 = vmul.f32 0.1, %v166_v55  ;;  %v318_v62 = vmul.f32 %v316_v53, %v281_v58 }
 0x333   :  { %v172_v57 = vsel %vm168_vm11, %v166_v55, %v170_v56  ;;  %v280_v56 = vsel %vm278_vm5, 1.0, %v1965_v37 }
 0x334   :  { %v174_v59 = vmul.f32 %v172_v57, %v172_v57 }
 0x336   :  { %v180_v60 = vsel %vm179_vm12, %v174_v59, 0.0 }
 0x337   :  { %181 = vadd.xlane.f32.xlu1 %v180_v60  ;;  %v317_v60 = vmul.f32 %v316_v53, %v280_v56 }
 0x33f   :  { %177 = vadd.xlane.f32.xlu1 %v176_v63 }
 0x3aa   :  { %v182_v9 = vpop.xlane.xlu1 %181 }
 0x3ab   :  { %v184_v10 = vmax.f32 %v182_v9, 1e-24 }
 0x3ad   :  { %1842 = vrsqrt.f32 %v184_v10  ;;  %vm201_vm2 = vweird.f32 %v184_v10 }
 0x3b2   :  { %v178_v11 = vpop.xlane.xlu1 %177 }
 0x3b3   :  { %v1843_v13 = vpop.eup %1842  ;;  %v183_v14 = vmax.f32 %v178_v11, 1e-24 }
 0x3b4   :  { %v196_v15 = vmul.f32 %v1843_v13, %v184_v10  ;;  %vm202_vm15 = vweird.f32 %v1843_v13 }
 0x3b5   :  { %1844 = vrsqrt.f32 %v183_v14  ;;  %vm203_vm4 = vmor %vm201_vm2, %vm202_vm15  ;;  %vm191_vm11 = vweird.f32 %v183_v14  ;;  %vm237_vm2 = vcmp.ge.s32.totalorder %v1728_v26, 1 }
 0x3b6   :  { %v197_v16 = vmul.f32 %v1843_v13, %v196_v15 }
 0x3b8   :  { %v198_v18 = vmul.f32 0.5, %v197_v16 }
 0x3ba   :  { %v199_v20 = vsub.f32 1.5, %v198_v18 }
 0x3bb   :  { %v1845_v23 = vpop.eup %1844 }
 0x3bc   :  { %v186_v24 = vmul.f32 %v1845_v23, %v183_v14  ;;  %v200_v25 = vmul.f32 %v1843_v13, %v199_v20  ;;  %vm192_vm10 = vweird.f32 %v1845_v23 }
 0x3bd   :  { %vm193_vm15 = vmor %vm191_vm11, %vm192_vm10 }
 0x3be   :  { %v187_v27 = vmul.f32 %v1845_v23, %v186_v24  ;;  %v204_v28 = vsel %vm203_vm4, %v1843_v13, %v200_v25  ;;  %v1971_v25 = vmov 0  }
 0x3bf   :  { %v206_v29 = vmul.f32 %v204_v28, %v172_v57  ;;  %v277_v57 = vsel %vm237_vm2, 1.0, %v1965_v37  ;;  %v1972_v28 = vmov 5  }
 0x3c0   :  { %v188_v30 = vmul.f32 0.5, %v187_v27 }
 0x3c1   :  { %1732 = vmatpush.msk.msrb.mxu1 %vm51_vm0, %v206_v29  ;;  %vm235_vm0 = vcmp.eq.s32.totalorder %v2099_v21, %v1730_v34 }
 0x3c2   :  { %v189_v32 = vsub.f32 1.5, %v188_v30  ;;  %vm239_vm4 = vmand %vm235_vm0, %vm237_vm2 }
 0x3c3   :  { %v245_v39 = vsel %vm239_vm4, 1.0, %v1965_v37 }
 0x3c4   :  { %v190_v33 = vmul.f32 %v1845_v23, %v189_v32 }
 0x3c6   :  { %v194_v35 = vsel %vm193_vm15, %v1845_v23, %v190_v33  ;;  %v1973_v33 = vmov -1e+30  }
 0x3c7   :  { %v205_v36 = vmul.f32 %v194_v35, %v171_v61  ;;  %v283_v61 = vmul.f32 %v277_v57, %v272_v54 }
 0x3c9   :  { %308 = vmatpush.msrb.mxu1 %v205_v36 }
 0x3ca   :  { %1733 = vmatmul.msk.f32.vlgmr.msrb.gmra.mxu1 %vm78_vm3, %v244_v38 }
 0x3d2   :  { %1734 = vmatmul.msk.f32.gmra.mxu1 %vm78_vm3, %v245_v39  ;;  %vm274_vm3 = vmand %vm236_vm6, %vm240_vm9  ;;  %vm321_vm6 = vcmp.ge.s32.totalorder %v2099_v21, 8 }
 0x3d3   :  { %v276_v51 = vsel %vm274_vm3, 1.0, %v1965_v37  ;;  %v322_v26 = vsel %vm321_vm6, 1, %v1971_v25  ;;  %v1736_v29 = vsel %vm321_vm6, 0, %v1972_v28  ;;  %vm1789_vm9 = vmneg %vm321_vm6 }
 0x3d4   :  { %v282_v55 = vmul.f32 %v276_v51, %v270_v49  ;;  %v323_v27 = vmul.u32 8, %v322_v26  ;;  %v2197_v31 = vsel %vm321_vm6, 7, %v1736_v29 }
 0x3d6   :  { %v2193_v30 = vsub.s32 %v2099_v21, %v323_v27 }
 0x3d8   :  { %vm331_vm10 = vcmp.le.s32.totalorder %v2193_v30, %v2197_v31 }
 0x3d9   :  { %vm332_vm11 = vmand %vm1789_vm9, %vm331_vm10 }
 0x3da   :  { %v2206_v34 = vsel %vm332_vm11, 0.0, %v1973_v33  ;;  %vm333_vm13 = vmand %vm321_vm6, %vm331_vm10 }
 0x3db   :  { %v2217_v48 = vsel %vm333_vm13, 0.0, %v1973_v33 }
 0x447   :  { %v310_v52 = vpop.f32.mrf.mxu1 }
 0x448   :  { %v311_v59 = vadd.f32 %v310_v52, %v282_v55 }
 0x44a   :  { %v2148_v1 = vadd.f32 %v317_v60, %v311_v59 }
 0x44f   :  { %v313_v63 = vpop.f32.mrf.mxu1 }
 0x450   :  { %v314_v0 = vadd.f32 %v313_v63, %v283_v61 }
 0x452   :  { %v2150_v2 = vadd.f32 %v318_v62, %v314_v0 }
 0x454   :  { %v361_v3 = vpack.c.bf16 %v2150_v2, %v2148_v1 }
 0x456   :  { %1739 = vmatmul.msk.bf16.vlgmr.msrb.gmra.mxu2 %vm175_vm14, %v361_v3 }
 0x4d9   :  { %v377_v4 = vpop.f32.mrf.mxu2 }
 0x4da   :  { %v378_v8 = vadd.f32 %v377_v4, %v364_v6 }
 0x4e1   :  { %v379_v7 = vpop.f32.mrf.mxu2 }
 0x4e2   :  { %v380_v9 = vadd.f32 %v379_v7, %v364_v6 }
 0x4e4   :  { %v2161_v10 = vpack.c.bf16 %v380_v9, %v378_v8 }
 0x4e6   :  { %578 = vrot.lane.b32.xlu1 %v2161_v10, %s1966_s1  ;;  %479 = vrot.lane.b32.xlu0 %v2161_v10, %s1967_s3 }
 0x4e7   :  { %384 = vrot.lane.b32.xlu2 %v2161_v10, %s1964_s2 }
 0x4ee   :  { %576 = vrot.lane.b32.xlu0 %v2161_v10, %s1963_s19 }
 0x4ef   :  { %481 = vrot.lane.b32.xlu2 %v2161_v10, %s1968_s28 }
 0x4f7   :  { %675 = vrot.lane.b32.xlu2 %v2161_v10, %s1969_s29 }
 0x4ff   :  { %673 = vrot.lane.b32.xlu2 %v2161_v10, %s1970_s30 }
 0x541   :  { %v385_v11 = vpop.permute.xlu2 %384 }
 0x542   :  { %v390_v12 = vsel %vm47_vm1, %v385_v11, 0 }
 0x543   :  { %399 = vmatpush.bf16.xpose.msrb.mxu3 %v390_v12 }
 0x549   :  { %v482_v13 = vpop.permute.xlu2 %481 }
 0x54a   :  { %v487_v14 = vsel %vm47_vm1, %v482_v13, 0  ;;  %1740 = vmatmul.msk.bf16.vlgmr.msrb.gmra.mxu3 %vm47_vm1, %v2161_v10 }
 0x54b   :  { %496 = vmatpush.bf16.xpose.msra.mxu1 %v487_v14 }
 0x551   :  { %v676_v15 = vpop.permute.xlu2 %675 }
 0x552   :  { %v681_v16 = vsel %vm47_vm1, %v676_v15, 0 }
 0x553   :  { %690 = vmatpush.bf16.xpose.msrb.mxu1 %v681_v16 }
 0x558   :  { %v579_v18 = vpop.permute.xlu1 %578  ;;  %v480_v20 = vpop.permute.xlu0 %479 }
 0x559   :  { %v584_v22 = vsel %vm47_vm1, %v579_v18, 0  ;;  %1742 = vmatmul.msk.bf16.vlgmr.msra.gmra.mxu1 %vm47_vm1, %v480_v20  ;;  %v674_v24 = vpop.permute.xlu2 %673 }
 0x55a   :  { %593 = vmatpush.bf16.xpose.msra.mxu3 %v584_v22 }
 0x560   :  { %v577_v23 = vpop.permute.xlu0 %576 }
 0x561   :  { %1744 = vmatmul.msk.bf16.vlgmr.msra.gmra.mxu3 %vm47_vm1, %v577_v23 }
 0x569   :  { %1746 = vmatmul.msk.bf16.vlgmr.msrb.gmra.mxu1 %vm47_vm1, %v674_v24 }
 0x5cd   :  { %v401_v32 = vpop.f32.mrf.mxu3 }
 0x5ce   :  { %v406_v35 = vmul.f32 0.35355338, %v401_v32 }
 0x5d0   :  { %v408_v36 = vadd.f32 %v406_v35, %v2206_v34 }
 0x5d2   :  { %v410_v38 = vsel %vm116_vm8, %v408_v36, -inf }
 0x5d3   :  { %411 = vmax.xlane.f32.xlu1 %v410_v38 }
 0x5d5   :  { %v403_v44 = vpop.f32.mrf.mxu3 }
 0x5d6   :  { %v498_v39 = vpop.f32.mrf.mxu1  ;;  %v407_v50 = vmul.f32 0.35355338, %v403_v44 }
 0x5d7   :  { %v503_v40 = vmul.f32 0.35355338, %v498_v39 }
 0x5d8   :  { %v409_v55 = vadd.f32 %v407_v50, %v2217_v48 }
 0x5d9   :  { %v505_v41 = vadd.f32 %v503_v40, %v2206_v34 }
 0x5da   :  { %v413_v58 = vsel %vm116_vm8, %v409_v55, -inf }
 0x5db   :  { %v507_v43 = vsel %vm116_vm8, %v505_v41, -inf }
 0x5dc   :  { %508 = vmax.xlane.f32.xlu0 %v507_v43 }
 0x5de   :  { %v500_v46 = vpop.f32.mrf.mxu1 }
 0x5df   :  { %v504_v47 = vmul.f32 0.35355338, %v500_v46 }
 0x5e1   :  { %v506_v49 = vadd.f32 %v504_v47, %v2217_v48 }
 0x5e3   :  { %v510_v51 = vsel %vm116_vm8, %v506_v49, -inf }
 0x5e4   :  { %v595_v52 = vpop.f32.mrf.mxu3  ;;  %511 = vmax.xlane.f32.xlu2 %v510_v51 }
 0x5e5   :  { %v600_v57 = vmul.f32 0.35355338, %v595_v52 }
 0x5e6   :  { %v692_v53 = vpop.f32.mrf.mxu1 }
 0x5e7   :  { %v697_v54 = vmul.f32 0.35355338, %v692_v53  ;;  %v602_v3 = vadd.f32 %v600_v57, %v2206_v34 }
 0x5e9   :  { %v699_v56 = vadd.f32 %v697_v54, %v2206_v34  ;;  %v604_v7 = vsel %vm116_vm8, %v602_v3, -inf }
 0x5eb   :  { %v701_v59 = vsel %vm116_vm8, %v699_v56, -inf }
 0x5ec   :  { %v597_v60 = vpop.f32.mrf.mxu3  ;;  %414 = vmax.xlane.f32.xlu2 %v413_v58  ;;  %702 = vmax.xlane.f32.xlu0 %v701_v59 }
 0x5ed   :  { %v601_v61 = vmul.f32 0.35355338, %v597_v60 }
 0x5ee   :  { %v694_v62 = vpop.f32.mrf.mxu1 }
 0x5ef   :  { %v698_v63 = vmul.f32 0.35355338, %v694_v62  ;;  %v603_v0 = vadd.f32 %v601_v61, %v2217_v48 }
 0x5f1   :  { %v607_v4 = vsel %vm116_vm8, %v603_v0, -inf  ;;  %v700_v6 = vadd.f32 %v698_v63, %v2217_v48 }
 0x5f2   :  { %608 = vmax.xlane.f32.xlu1 %v607_v4 }
 0x5f3   :  { %v704_v8 = vsel %vm116_vm8, %v700_v6, -inf }
 0x5f4   :  { %605 = vmax.xlane.f32.xlu0 %v604_v7  ;;  %705 = vmax.xlane.f32.xlu2 %v704_v8 }
 0x60c   :  { %556 = vrot.lane.b32.xlu2 %v2161_v10, %s1974_s11 }
 0x646   :  { %v412_v9 = vpop.xlane.xlu1 %411 }
 0x647   :  { %v416_v11 = vsub.f32 %v408_v36, %v412_v9 }
 0x649   :  { %v418_v12 = vmul.f32 1.442695, %v416_v11 }
 0x64b   :  { %1846 = vpow2.f32 %v418_v12 }
 0x64f   :  { %v509_v13 = vpop.xlane.xlu0 %508 }
 0x650   :  { %v513_v14 = vsub.f32 %v505_v41, %v509_v13 }
 0x651   :  { %v2233_v15 = vpop.eup %1846 }
 0x652   :  { %v515_v16 = vmul.f32 1.442695, %v513_v14  ;;  %v422_v18 = vsel %vm116_vm8, %v2233_v15, 0.0 }
 0x653   :  { %423 = vadd.xlane.f32.xlu1 %v422_v18 }
 0x654   :  { %1848 = vpow2.f32 %v515_v16 }
 0x657   :  { %v512_v20 = vpop.xlane.xlu2 %511 }
 0x658   :  { %v514_v22 = vsub.f32 %v506_v49, %v512_v20 }
 0x65a   :  { %v2237_v23 = vpop.eup %1848  ;;  %v517_v24 = vmul.f32 1.442695, %v514_v22 }
 0x65b   :  { %v519_v26 = vsel %vm116_vm8, %v2237_v23, 0.0 }
 0x65c   :  { %1850 = vpow2.f32 %v517_v24  ;;  %520 = vadd.xlane.f32.xlu2 %v519_v26 }
 0x65f   :  { %v703_v27 = vpop.xlane.xlu0 %702  ;;  %v415_v28 = vpop.xlane.xlu2 %414 }
 0x660   :  { %v707_v29 = vsub.f32 %v699_v56, %v703_v27  ;;  %v417_v32 = vsub.f32 %v409_v55, %v415_v28 }
 0x662   :  { %v2241_v33 = vpop.eup %1850  ;;  %v709_v35 = vmul.f32 1.442695, %v707_v29  ;;  %v420_v36 = vmul.f32 1.442695, %v417_v32 }
 0x663   :  { %v522_v38 = vsel %vm116_vm8, %v2241_v33, 0.0 }
 0x664   :  { %1852 = vpow2.f32 %v709_v35  ;;  %523 = vadd.xlane.f32.xlu0 %v522_v38 }
 0x665   :  { %1854 = vpow2.f32 %v420_v36  ;;  %v609_v41 = vpop.xlane.xlu1 %608 }
 0x666   :  { %v611_v51 = vsub.f32 %v603_v0, %v609_v41 }
 0x667   :  { %v606_v39 = vpop.xlane.xlu0 %605  ;;  %v706_v40 = vpop.xlane.xlu2 %705 }
 0x668   :  { %v610_v43 = vsub.f32 %v602_v3, %v606_v39  ;;  %v708_v44 = vsub.f32 %v700_v6, %v706_v40  ;;  %v614_v54 = vmul.f32 1.442695, %v611_v51 }
 0x66a   :  { %v2245_v46 = vpop.eup %1852  ;;  %v612_v47 = vmul.f32 1.442695, %v610_v43  ;;  %v711_v49 = vmul.f32 1.442695, %v708_v44 }
 0x66b   :  { %v2247_v50 = vpop.eup %1854  ;;  %v713_v52 = vsel %vm116_vm8, %v2245_v46, 0.0 }
 0x66c   :  { %1856 = vpow2.f32 %v612_v47  ;;  %714 = vadd.xlane.f32.xlu0 %v713_v52  ;;  %v425_v53 = vsel %vm116_vm8, %v2247_v50, 0.0 }
 0x66d   :  { %1858 = vpow2.f32 %v711_v49  ;;  %426 = vadd.xlane.f32.xlu2 %v425_v53 }
 0x66e   :  { %1860 = vpow2.f32 %v614_v54 }
 0x66f   :  { %v557_v55 = vpop.permute.xlu2 %556 }
 0x670   :  { %569 = vmatpush.bf16.msra.mxu2 %v557_v55 }
 0x672   :  { %v2253_v56 = vpop.eup %1856 }
 0x673   :  { %v2255_v57 = vpop.eup %1858  ;;  %v616_v58 = vsel %vm116_vm8, %v2253_v56, 0.0 }
 0x674   :  { %617 = vadd.xlane.f32.xlu0 %v616_v58  ;;  %v716_v59 = vsel %vm116_vm8, %v2255_v57, 0.0  ;;  %v2261_v60 = vpop.eup %1860 }
 0x675   :  { %717 = vadd.xlane.f32.xlu1 %v716_v59  ;;  %v619_v61 = vsel %vm116_vm8, %v2261_v60, 0.0 }
 0x67d   :  { %620 = vadd.xlane.f32.xlu1 %v619_v61 }
 0x685   :  { %653 = vrot.lane.b32.xlu2 %v2161_v10, %s1975_s12 }
 0x688   :  { %459 = vrot.lane.b32.xlu0 %v2161_v10, %s1976_s13 }
 0x690   :  { %807 = vrot.lane.b32.xlu0 %v2123_v42, %s1978_s15 }
 0x696   :  { %750 = vrot.lane.b32.xlu1 %v2161_v10, %s1977_s14 }
 0x6c6   :  { %v2271_v4 = vpop.xlane.xlu1 %423 }
 0x6cf   :  { %v521_v62 = vpop.xlane.xlu2 %520 }
 0x6d0   :  { %1862 = vrcp.f32 %v521_v62  ;;  %v536_v14 = vand.u32 2147483648, %v521_v62  ;;  %vm530_vm0 = vweird.f32 %v521_v62  ;;  %v534_v18 = vand.u32 2147483647, %v521_v62 }
 0x6d2   :  { %v537_v28 = vor.u32 1.1754944e-38, %v536_v14  ;;  %vm535_vm5 = vcmp.eq.f32.partialorder %v534_v18, 8.507059e+37 }
 0x6d6   :  { %v1863_v63 = vpop.eup %1862 }
 0x6d7   :  { %v526_v0 = vmul.f32 %v1863_v63, %v521_v62  ;;  %v524_v3 = vpop.xlane.xlu0 %523  ;;  %vm531_vm15 = vweird.f32 %v1863_v63 }
 0x6d8   :  { %1864 = vrcp.f32 %v524_v3  ;;  %v551_v20 = vand.u32 2147483648, %v524_v3  ;;  %vm532_vm2 = vmor %vm530_vm0, %vm531_vm15  ;;  %v549_v24 = vand.u32 2147483647, %v524_v3  ;;  %vm545_vm3 = vweird.f32 %v524_v3 }
 0x6d9   :  { %v527_v6 = vsub.f32 1.0, %v526_v0  ;;  %1866 = vrcp.f32 %v2271_v4  ;;  %vm433_vm0 = vweird.f32 %v2271_v4  ;;  %v439_v0 = vand.u32 2147483648, %v2271_v4 }
 0x6da   :  { %v552_v32 = vor.u32 1.1754944e-38, %v551_v20  ;;  %vm550_vm9 = vcmp.eq.f32.partialorder %v549_v24, 8.507059e+37 }
 0x6db   :  { %v528_v7 = vmul.f32 %v1863_v63, %v527_v6  ;;  %v437_v6 = vand.u32 2147483647, %v2271_v4 }
 0x6dd   :  { %v529_v12 = vadd.f32 %v1863_v63, %v528_v7 }
 0x6de   :  { %v1865_v8 = vpop.eup %1864 }
 0x6df   :  { %v541_v9 = vmul.f32 %v1865_v8, %v524_v3  ;;  %v2274_v11 = vpop.xlane.xlu0 %714  ;;  %v2276_v10 = vpop.eup %1866  ;;  %vm546_vm4 = vweird.f32 %v1865_v8  ;;  %v533_v27 = vsel %vm532_vm2, %v1863_v63, %v529_v12 }
 0x6e0   :  { %v427_v13 = vpop.xlane.xlu2 %426  ;;  %v429_v26 = vmul.f32 %v2276_v10, %v2271_v4  ;;  %vm547_vm7 = vmor %vm545_vm3, %vm546_vm4  ;;  %v538_v36 = vsel %vm535_vm5, %v537_v28, %v533_v27  ;;  %vm434_vm13 = vweird.f32 %v2276_v10  ;;  %vm438_vm5 = vcmp.eq.f32.partialorder %v437_v6, 8.507059e+37 }
 0x6e1   :  { %v542_v16 = vsub.f32 1.0, %v541_v9  ;;  %1868 = vrcp.f32 %v427_v13  ;;  %v539_v49 = vmul.f32 %v2237_v23, %v538_v36  ;;  %vm448_vm15 = vweird.f32 %v427_v13  ;;  %vm435_vm4 = vmor %vm433_vm0, %vm434_vm13 }
 0x6e2   :  { %v430_v39 = vsub.f32 1.0, %v429_v26  ;;  %1870 = vrcp.f32 %v2274_v11  ;;  %v452_v61 = vand.u32 2147483647, %v427_v13 }
 0x6e3   :  { %v543_v22 = vmul.f32 %v1865_v8, %v542_v16  ;;  %v440_v16 = vor.u32 1.1754944e-38, %v439_v0 }
 0x6e4   :  { %v431_v52 = vmul.f32 %v2276_v10, %v430_v39  ;;  %vm453_vm3 = vcmp.eq.f32.partialorder %v452_v61, 8.507059e+37 }
 0x6e5   :  { %v544_v29 = vadd.f32 %v1865_v8, %v543_v22 }
 0x6e6   :  { %v432_v23 = vadd.f32 %v2276_v10, %v431_v52 }
 0x6e7   :  { %v1869_v35 = vpop.eup %1868  ;;  %v548_v38 = vsel %vm547_vm7, %v1865_v8, %v544_v29  ;;  %v2280_v43 = vpop.xlane.xlu0 %617  ;;  %vm724_vm7 = vweird.f32 %v2274_v11 }
 0x6e8   :  { %v553_v40 = vsel %vm550_vm9, %v552_v32, %v548_v38  ;;  %v444_v41 = vmul.f32 %v1869_v35, %v427_v13  ;;  %v2282_v44 = vpop.xlane.xlu1 %717  ;;  %vm449_vm11 = vweird.f32 %v1869_v35  ;;  %v2291_v58 = vpop.eup %1870  ;;  %v436_v12 = vsel %vm435_vm4, %v2276_v10, %v432_v23 }
 0x6e9   :  { %v554_v47 = vmul.f32 %v2241_v33, %v553_v40  ;;  %1872 = vrcp.f32 %v2282_v44  ;;  %v454_v33 = vand.u32 2147483648, %v427_v13  ;;  %vm450_vm2 = vmor %vm448_vm15, %vm449_vm11  ;;  %v720_v7 = vmul.f32 %v2291_v58, %v2274_v11 }
 0x6ea   :  { %v445_v51 = vsub.f32 1.0, %v444_v41  ;;  %1874 = vrcp.f32 %v2280_v43  ;;  %v441_v4 = vsel %vm438_vm5, %v440_v16, %v436_v12  ;;  %vm725_vm11 = vweird.f32 %v2291_v58 }
 0x6eb   :  { %v555_v54 = vpack.c.bf16 %v554_v47, %v539_v49  ;;  %v455_v9 = vor.u32 1.1754944e-38, %v454_v33  ;;  %v721_v20 = vsub.f32 1.0, %v720_v7  ;;  %v442_v10 = vmul.f32 %v2233_v15, %v441_v4  ;;  %vm2337_vm4 = vmor %vm724_vm7, %vm725_vm11 }
 0x6ec   :  { %v446_v53 = vmul.f32 %v1869_v35, %v445_v51  ;;  %v728_v15 = vand.u32 2147483647, %v2274_v11  ;;  %v745_v40 = vand.u32 2147483648, %v2282_v44  ;;  %vm739_vm13 = vweird.f32 %v2282_v44 }
 0x6ed   :  { %1743 = vmatmul.msk.bf16.vlgmr.msra.gmra.mxu2 %vm116_vm8, %v555_v54  ;;  %v722_v29 = vmul.f32 %v2291_v58, %v721_v20  ;;  %v743_v49 = vand.u32 2147483647, %v2282_v44  ;;  %v730_v51 = vand.u32 2147483648, %v2274_v11  ;;  %vm627_vm5 = vweird.f32 %v2280_v43 }
 0x6ee   :  { %v447_v55 = vadd.f32 %v1869_v35, %v446_v53  ;;  %v633_v61 = vand.u32 2147483648, %v2280_v43  ;;  %v746_v0 = vor.u32 1.1754944e-38, %v745_v40 }
 0x6ef   :  { %v2293_v59 = vpop.eup %1872  ;;  %v723_v47 = vadd.f32 %v2291_v58, %v722_v29 }
 0x6f0   :  { %v2297_v62 = vpop.xlane.xlu1 %620  ;;  %v2299_v63 = vpop.eup %1874  ;;  %v735_v3 = vmul.f32 %v2293_v59, %v2282_v44  ;;  %v451_v8 = vsel %vm450_vm2, %v1869_v35, %v447_v55  ;;  %vm740_vm9 = vweird.f32 %v2293_v59  ;;  %v634_v12 = vor.u32 1.1754944e-38, %v633_v61 }
 0x6f1   :  { %1876 = vrcp.f32 %v2297_v62  ;;  %v623_v13 = vmul.f32 %v2299_v63, %v2280_v43  ;;  %v456_v18 = vsel %vm453_vm3, %v455_v9, %v451_v8  ;;  %v654_v35 = vpop.permute.xlu2 %653  ;;  %vm628_vm0 = vweird.f32 %v2299_v63  ;;  %vm2330_vm2 = vmor %vm739_vm13, %vm740_vm9 }
 0x6f2   :  { %v736_v14 = vsub.f32 1.0, %v735_v3  ;;  %v457_v24 = vmul.f32 %v2247_v50, %v456_v18  ;;  %v648_v54 = vand.u32 2147483648, %v2297_v62  ;;  %vm642_vm3 = vweird.f32 %v2297_v62  ;;  %vm629_vm11 = vmor %vm627_vm5, %vm628_vm0 }
 0x6f3   :  { %v624_v26 = vsub.f32 1.0, %v623_v13  ;;  %v646_v23 = vand.u32 2147483647, %v2297_v62  ;;  %v727_v11 = vsel %vm2337_vm4, %v2291_v58, %v723_v47  ;;  %v631_v3 = vand.u32 2147483647, %v2280_v43 }
 0x6f4   :  { %v737_v27 = vmul.f32 %v2293_v59, %v736_v14  ;;  %v458_v50 = vpack.c.bf16 %v457_v24, %v442_v10  ;;  %vm744_vm9 = vcmp.eq.f32.partialorder %v743_v49, 8.507059e+37  ;;  %v649_v7 = vor.u32 1.1754944e-38, %v648_v54 }
 0x6f5   :  { %v625_v38 = vmul.f32 %v2299_v63, %v624_v26  ;;  %vm729_vm13 = vcmp.eq.f32.partialorder %v728_v15, 8.507059e+37  ;;  %vm798_vm0 = vcmask 195584  }
 0x6f6   :  { %v738_v39 = vadd.f32 %v2293_v59, %v737_v27 }
 0x6f7   :  { %v1877_v22 = vpop.eup %1876  ;;  %v626_v44 = vadd.f32 %v2299_v63, %v625_v38 }
 0x6f8   :  { %v638_v28 = vmul.f32 %v1877_v22, %v2297_v62  ;;  %vm643_vm15 = vweird.f32 %v1877_v22  ;;  %v742_v33 = vsel %vm2330_vm2, %v2293_v59, %v738_v39  ;;  %v731_v59 = vor.u32 1.1754944e-38, %v730_v51 }
 0x6f9   :  { %vm644_vm7 = vmor %vm642_vm3, %vm643_vm15  ;;  %v747_v62 = vsel %vm744_vm9, %v746_v0, %v742_v33  ;;  %v630_v8 = vsel %vm629_vm11, %v2299_v63, %v626_v44  ;;  %vm647_vm2 = vcmp.eq.f32.partialorder %v646_v23, 8.507059e+37  ;;  %vm632_vm15 = vcmp.eq.f32.partialorder %v631_v3, 8.507059e+37 }
 0x6fa   :  { %v460_v32 = vpop.permute.xlu0 %459  ;;  %v639_v36 = vsub.f32 1.0, %v638_v28  ;;  %v732_v9 = vsel %vm729_vm13, %v731_v59, %v727_v11  ;;  %v748_v58 = vmul.f32 %v2255_v57, %v747_v62  ;;  %v635_v14 = vsel %vm632_vm15, %v634_v12, %v630_v8 }
 0x6fb   :  { %472 = vmatpush.bf16.msra.mxu0 %v460_v32  ;;  %v733_v43 = vmul.f32 %v2245_v46, %v732_v9  ;;  %v636_v20 = vmul.f32 %v2253_v56, %v635_v14  ;;  %v802_v44 = vperm.slane %v2158_v5, 1  ;;  %v1982_v62 = vmov 32.0  }
 0x6fc   :  { %v640_v41 = vmul.f32 %v1877_v22, %v639_v36  ;;  %1878 = vrcp.f32 %v1982_v62 }
 0x6fd   :  { %v749_v4 = vpack.c.bf16 %v748_v58, %v733_v43 }
 0x6fe   :  { %1741 = vmatmul.msk.bf16.vlgmr.msra.gmra.mxu0 %vm116_vm8, %v458_v50  ;;  %v641_v53 = vadd.f32 %v1877_v22, %v640_v41 }
 0x6ff   :  { %666 = vmatpush.bf16.msrb.mxu0 %v654_v35 }
 0x700   :  { %v645_v6 = vsel %vm644_vm7, %v1877_v22, %v641_v53 }
 0x701   :  { %v650_v13 = vsel %vm647_vm2, %v649_v7, %v645_v6 }
 0x702   :  { %v651_v16 = vmul.f32 %v2261_v60, %v650_v13  ;;  %v808_v29 = vpop.permute.xlu0 %807  ;;  %v1879_v7 = vpop.eup %1878 }
 0x703   :  { %820 = vmatpush.bf16.msrb.mxu3 %v808_v29  ;;  %v837_v8 = vmul.f32 32.0, %v1879_v7  ;;  %vm841_vm4 = vweird.f32 %v1879_v7 }
 0x704   :  { %v652_v63 = vpack.c.bf16 %v651_v16, %v636_v20 }
 0x705   :  { %v838_v9 = vsub.f32 1.0, %v837_v8  ;;  %v357_v8 = vld [vmem:[%s2745_s8 + $0x68] sm:$0xff] }
 0x707   :  { %v839_v12 = vmul.f32 %v1879_v7, %v838_v9 }
 0x708   :  { %v751_v18 = vpop.permute.xlu1 %750 }
 0x709   :  { %763 = vmatpush.bf16.msrb.mxu2 %v751_v18  ;;  %v840_v13 = vadd.f32 %v1879_v7, %v839_v12  ;;  %v354_v12 = vld [vmem:[%s2745_s8 + $0x50] sm:$0xff] }
 0x70b   :  { %v2382_v58 = vsel %vm841_vm4, %v1879_v7, %v840_v13  ;;  %v356_v7 = vld [vmem:[%s2745_s8 + $0x60] sm:$0xff]  ;;  %v355_v13 = vld [vmem:[%s2745_s8 + $0x58] sm:$0xff] }
 0x70c   :  { %1747 = vmatmul.msk.bf16.vlgmr.msrb.gmra.mxu2 %vm116_vm8, %v749_v4  ;;  %v933_v9 = vpack.c.bf16 %v357_v8, %v356_v7 }
 0x70e   :  { %1745 = vmatmul.msk.bf16.vlgmr.msrb.gmra.mxu0 %vm116_vm8, %v652_v63 }
 0x770   :  { %v571_v57 = vpop.f32.mrf.mxu2 }
 0x778   :  { %v573_v22 = vpop.f32.mrf.mxu2 }
 0x779   :  { %v1812_v24 = vpack.i.bf16 %v573_v22, %v571_v57  ;;  %v341_v22 = vld [vmem:[%s2744_s7 + $0x28] sm:$0xff] }
 0x77b   :  { %v474_v46 = vpop.f32.mrf.mxu0  ;;  %1813 = vrot.lane.b32.xlu2 %v1812_v24, %s1979_s16  ;;  %v343_v24 = vld [vmem:[%s2744_s7 + $0x38] sm:$0xff] }
 0x783   :  { %v476_v60 = vpop.f32.mrf.mxu0  ;;  %805 = vrot.lane.b32.xlu2 %v2132_v45, %s1978_s15 }
 0x78b   :  { %v668_v56 = vpop.f32.mrf.mxu0 }
 0x78f   :  { %v765_v26 = vpop.f32.mrf.mxu2 }
 0x793   :  { %v670_v27 = vpop.f32.mrf.mxu0 }
 0x794   :  { %v1817_v28 = vpack.i.bf16 %v670_v27, %v668_v56  ;;  %v337_v27 = vld [vmem:[%s2744_s7 + $0x8] sm:$0xff] }
 0x796   :  { %1818 = vrot.lane.b32.xlu1 %v1817_v28, %s1980_s17  ;;  %v339_v28 = vld [vmem:[%s2744_s7 + $0x18] sm:$0xff] }
 0x797   :  { %v767_v10 = vpop.f32.mrf.mxu2 }
 0x798   :  { %v1822_v42 = vpack.i.bf16 %v767_v10, %v765_v26  ;;  %v888_v10 = vpack.c.bf16 %v339_v28, %v337_v27 }
 0x79a   :  { %1823 = vrot.lane.b32.xlu0 %v1822_v42, %s1981_s18 }
 0x7d5   :  { %v1814_v32 = vpop.permute.xlu2 %1813 }
 0x7d6   :  { %v1816_v38 = vunpack.i.h.bf16 %v1814_v32  ;;  %v1815_v45 = vunpack.i.l.bf16 %v1814_v32 }
 0x7d8   :  { %v795_v40 = vsel %vm47_vm1, %v476_v60, %v1816_v38  ;;  %v794_v41 = vsel %vm47_vm1, %v474_v46, %v1815_v45  ;;  %v889_v60 = vpack.c.bf16 %v343_v24, %v341_v22  ;;  %v346_v22 = vld [vmem:[%s2745_s8 + $0x10] sm:$0xff]  ;;  %v347_v24 = vld [vmem:[%s2745_s8 + $0x18] sm:$0xff] }
 0x7da   :  { %900 = vmatpush.bf16.msra.mxu0 %v889_v60  ;;  %v344_v60 = vld [vmem:[%s2745_s8] sm:$0xff] }
 0x7dd   :  { %v806_v35 = vpop.permute.xlu2 %805 }
 0x7de   :  { %821 = vmatpush.bf16.msrb.mxu3 %v806_v35  ;;  %901 = vmatpush.bf16.msra.mxu0 %v888_v10 }
 0x808   :  { %v1819_v36 = vpop.permute.xlu1 %1818 }
 0x809   :  { %v1821_v39 = vunpack.i.h.bf16 %v1819_v36  ;;  %v1820_v50 = vunpack.i.l.bf16 %v1819_v36 }
 0x80b   :  { %v796_v51 = vsel %vm116_vm8, %v794_v41, %v1820_v50  ;;  %v797_v52 = vsel %vm116_vm8, %v795_v40, %v1821_v39 }
 0x80c   :  { %v1824_v15 = vpop.permute.xlu0 %1823 }
 0x80d   :  { %v1826_v47 = vunpack.i.h.bf16 %v1824_v15  ;;  %v1825_v49 = vunpack.i.l.bf16 %v1824_v15 }
 0x80f   :  { %v799_v53 = vsel %vm798_vm0, %v796_v51, %v1825_v49  ;;  %v800_v54 = vsel %vm798_vm0, %v797_v52, %v1826_v47  ;;  %v881_v52 = vperm.slane %v2158_v5, 2 }
 0x810   :  { %v801_v55 = vpack.c.bf16 %v800_v54, %v799_v53 }
 0x812   :  { %1748 = vmatmul.msk.bf16.vlgmr.msrb.gmra.mxu3 %vm175_vm14, %v801_v55 }
 0x895   :  { %v823_v33 = vpop.f32.mrf.mxu3 }
 0x896   :  { %v824_v23 = vadd.f32 %v823_v33, %v802_v44 }
 0x898   :  { %v828_v61 = vadd.f32 %v824_v23, %v2148_v1 }
 0x89a   :  { %v830_v0 = vsel %vm175_vm14, %v828_v61, 0.0 }
 0x89b   :  { %831 = vadd.xlane.f32.xlu1 %v830_v0 }
 0x89d   :  { %v825_v11 = vpop.f32.mrf.mxu3 }
 0x89e   :  { %v826_v3 = vadd.f32 %v825_v11, %v802_v44  ;;  %v884_v44 = vperm.slane %v2158_v5, 3 }
 0x8a0   :  { %v829_v6 = vadd.f32 %v826_v3, %v2150_v2 }
 0x8a2   :  { %v833_v59 = vsel %vm175_vm14, %v829_v6, 0.0 }
 0x8a3   :  { %834 = vadd.xlane.f32.xlu0 %v833_v59  ;;  %v359_v59 = vld [vmem:[%s2745_s8 + $0x78] sm:$0xff] }
 0x90e   :  { %v832_v1 = vpop.xlane.xlu1 %831 }
 0x90f   :  { %v843_v14 = vmul.f32 %v2382_v58, %v832_v1  ;;  %v932_v1 = vpack.c.bf16 %v355_v13, %v354_v12 }
 0x911   :  { %v845_v43 = vsub.f32 %v828_v61, %v843_v14  ;;  %v352_v14 = vld [vmem:[%s2745_s8 + $0x40] sm:$0xff] }
 0x913   :  { %v847_v16 = vmul.f32 %v845_v43, %v845_v43 }
 0x915   :  { %v849_v2 = vsel %vm175_vm14, %v847_v16, 0.0 }
 0x916   :  { %v835_v18 = vpop.xlane.xlu0 %834  ;;  %850 = vadd.xlane.f32.xlu2 %v849_v2  ;;  %v350_v2 = vld [vmem:[%s2745_s8 + $0x30] sm:$0xff] }
 0x917   :  { %v844_v20 = vmul.f32 %v2382_v58, %v835_v18  ;;  %v351_v18 = vld [vmem:[%s2745_s8 + $0x38] sm:$0xff] }
 0x919   :  { %v846_v4 = vsub.f32 %v829_v6, %v844_v20  ;;  %v358_v6 = vld [vmem:[%s2745_s8 + $0x70] sm:$0xff]  ;;  %v930_v20 = vpack.c.bf16 %v351_v18, %v350_v2 }
 0x91a   :  { %v934_v62 = vpack.c.bf16 %v359_v59, %v358_v6 }
 0x91b   :  { %v848_v63 = vmul.f32 %v846_v4, %v846_v4 }
 0x91c   :  { %936 = vmatpush.bf16.msra.mxu1 %v934_v62 }
 0x91d   :  { %v852_v57 = vsel %vm175_vm14, %v848_v63, 0.0  ;;  %v349_v63 = vld [vmem:[%s2745_s8 + $0x28] sm:$0xff] }
 0x91e   :  { %853 = vadd.xlane.f32.xlu1 %v852_v57 }
 0x920   :  { %937 = vmatpush.bf16.msra.mxu1 %v933_v9 }
 0x924   :  { %938 = vmatpush.bf16.msra.mxu1 %v932_v1 }
 0x989   :  { %v851_v46 = vpop.xlane.xlu2 %850 }
 0x98a   :  { %v855_v56 = vmul.f32 %v851_v46, %v2382_v58  ;;  %v928_v46 = vpack.c.bf16 %v347_v24, %v346_v22  ;;  %v1750_v24 = vld [vmem:[%s2744_s7 + $0x40] sm:$0xff] }
 0x98c   :  { %v857_v26 = vadd.f32 1e-05, %v855_v56  ;;  %v345_v56 = vld [vmem:[%s2745_s8 + $0x8] sm:$0xff] }
 0x98d   :  { %v927_v27 = vpack.c.bf16 %v345_v56, %v344_v60 }
 0x98e   :  { %1880 = vrsqrt.f32 %v857_v26  ;;  %vm865_vm5 = vweird.f32 %v857_v26 }
 0x991   :  { %v854_v42 = vpop.xlane.xlu1 %853 }
 0x992   :  { %v856_v29 = vmul.f32 %v854_v42, %v2382_v58 }
 0x994   :  { %v1881_v32 = vpop.eup %1880  ;;  %v858_v35 = vadd.f32 1e-05, %v856_v29 }
 0x995   :  { %v860_v36 = vmul.f32 %v1881_v32, %v857_v26  ;;  %vm866_vm3 = vweird.f32 %v1881_v32  ;;  %v890_v26 = vperm.slane %v2158_v5, 4 }
 0x996   :  { %1882 = vrsqrt.f32 %v858_v35  ;;  %vm867_vm7 = vmor %vm865_vm5, %vm866_vm3  ;;  %vm875_vm11 = vweird.f32 %v858_v35 }
 0x997   :  { %v861_v38 = vmul.f32 %v1881_v32, %v860_v36 }
 0x999   :  { %v862_v45 = vmul.f32 0.5, %v861_v38 }
 0x99b   :  { %v863_v39 = vsub.f32 1.5, %v862_v45 }
 0x99c   :  { %v1883_v50 = vpop.eup %1882 }
 0x99d   :  { %v864_v15 = vmul.f32 %v1881_v32, %v863_v39  ;;  %v870_v40 = vmul.f32 %v1883_v50, %v858_v35  ;;  %vm876_vm9 = vweird.f32 %v1883_v50 }
 0x99e   :  { %vm877_vm13 = vmor %vm875_vm11, %vm876_vm9 }
 0x99f   :  { %v871_v41 = vmul.f32 %v1883_v50, %v870_v40  ;;  %v868_v47 = vsel %vm867_vm7, %v1881_v32, %v864_v15 }
 0x9a0   :  { %v879_v53 = vmul.f32 %v868_v47, %v845_v43  ;;  %v353_v43 = vld [vmem:[%s2745_s8 + $0x48] sm:$0xff] }
 0x9a1   :  { %v872_v49 = vmul.f32 0.5, %v871_v41  ;;  %v931_v16 = vpack.c.bf16 %v353_v43, %v352_v14 }
 0x9a2   :  { %v882_v33 = vmul.f32 %v881_v52, %v879_v53 }
 0x9a3   :  { %v873_v51 = vsub.f32 1.5, %v872_v49  ;;  %939 = vmatpush.bf16.msra.mxu1 %v931_v16 }
 0x9a4   :  { %v2404_v0 = vadd.f32 %v884_v44, %v882_v33 }
 0x9a5   :  { %v874_v54 = vmul.f32 %v1883_v50, %v873_v51 }
 0x9a7   :  { %v878_v55 = vsel %vm877_vm13, %v1883_v50, %v874_v54  ;;  %940 = vmatpush.bf16.msra.mxu1 %v930_v20  ;;  %v1756_v20 = vld [vmem:[%s2744_s7 + $0x70] sm:$0xff] }
 0x9a8   :  { %v880_v23 = vmul.f32 %v878_v55, %v846_v4  ;;  %v348_v4 = vld [vmem:[%s2745_s8 + $0x20] sm:$0xff] }
 0x9a9   :  { %v929_v57 = vpack.c.bf16 %v349_v63, %v348_v4 }
 0x9aa   :  { %v883_v61 = vmul.f32 %v881_v52, %v880_v23  ;;  %v935_v23 = vperm.slane %v2158_v5, 5 }
 0x9ab   :  { %941 = vmatpush.bf16.msra.mxu1 %v929_v57 }
 0x9ac   :  { %v2406_v11 = vadd.f32 %v884_v44, %v883_v61 }
 0x9ae   :  { %v887_v3 = vpack.c.bf16 %v2406_v11, %v2404_v0 }
 0x9af   :  { %942 = vmatpush.bf16.msra.mxu1 %v928_v46  ;;  %v1752_v46 = vld [vmem:[%s2744_s7 + $0x50] sm:$0xff] }
 0x9b0   :  { %1749 = vmatmul.msk.bf16.vlgmr.msra.gmra.mxu0 %vm175_vm14, %v887_v3  ;;  %v2485_v60 = vpack.c.bf16 %v1752_v46, %v1750_v24 }
 0x9b3   :  { %943 = vmatpush.bf16.msra.mxu1 %v927_v27 }
 0xa2d   :  { %v903_v28 = vpop.f32.mrf.mxu0 }
 0xa2e   :  { %v904_v10 = vadd.f32 %v903_v28, %v890_v26 }
 0xa30   :  { %v910_v42 = vmul.f32 0.044715, %v904_v10  ;;  %v908_v52 = vmul.f32 0.5, %v904_v10 }
 0xa32   :  { %v912_v29 = vmul.f32 %v910_v42, %v904_v10 }
 0xa34   :  { %v914_v32 = vmul.f32 %v912_v29, %v904_v10 }
 0xa35   :  { %v905_v35 = vpop.f32.mrf.mxu0 }
 0xa36   :  { %v916_v36 = vadd.f32 %v914_v32, %v904_v10  ;;  %v906_v38 = vadd.f32 %v905_v35, %v890_v26 }
 0xa38   :  { %v911_v45 = vmul.f32 0.044715, %v906_v38  ;;  %v918_v39 = vmul.f32 0.7978846, %v916_v36  ;;  %v909_v53 = vmul.f32 0.5, %v906_v38 }
 0xa3a   :  { %v913_v50 = vmul.f32 %v911_v45, %v906_v38  ;;  %1884 = vtanh.f32 %v918_v39 }
 0xa3c   :  { %v915_v15 = vmul.f32 %v913_v50, %v906_v38 }
 0xa3e   :  { %v917_v40 = vadd.f32 %v915_v15, %v906_v38 }
 0xa40   :  { %v919_v41 = vmul.f32 0.7978846, %v917_v40  ;;  %v1885_v47 = vpop.eup %1884  ;;  %v1936_v40 = vld [vmem:[%s2746_s9] sm:$0xff] }
 0xa41   :  { %v922_v49 = vadd.f32 1.0, %v1885_v47 }
 0xa42   :  { %1886 = vtanh.f32 %v919_v41  ;;  %v996_v41 = vperm.slane %v1936_v40, 6 }
 0xa43   :  { %v924_v55 = vmul.f32 %v922_v49, %v908_v52  ;;  %v999_v52 = vperm.slane %v1936_v40, 7 }
 0xa48   :  { %v1887_v51 = vpop.eup %1886 }
 0xa49   :  { %v923_v54 = vadd.f32 1.0, %v1887_v51 }
 0xa4b   :  { %v925_v44 = vmul.f32 %v923_v54, %v909_v53 }
 0xa4d   :  { %v926_v33 = vpack.c.bf16 %v925_v44, %v924_v55 }
 0xa4f   :  { %944 = vmatmul.bf16.vlgmr.msra.gmra.mxu1 %v926_v33 }
 0xacc   :  { %v945_v61 = vpop.f32.mrf.mxu1 }
 0xacd   :  { %v946_v3 = vadd.f32 %v945_v61, %v935_v23 }
 0xacf   :  { %v950_v6 = vadd.f32 %v946_v3, %v2404_v0  ;;  %v2502_v3 = vld [vmem:[%s2746_s9 + $0x8] sm:$0xff] }
 0xad0   :  { %v1657_v21 = vperm.slane %v2502_v3, 6 }
 0xad1   :  { %v952_v59 = vsel %vm175_vm14, %v950_v6, 0.0 }
 0xad2   :  { %953 = vadd.xlane.f32.xlu0 %v952_v59 }
 0xad4   :  { %v947_v62 = vpop.f32.mrf.mxu1 }
 0xad5   :  { %v948_v7 = vadd.f32 %v947_v62, %v935_v23 }
 0xad7   :  { %v951_v8 = vadd.f32 %v948_v7, %v2406_v11  ;;  %v1754_v11 = vld [vmem:[%s2744_s7 + $0x60] sm:$0xff] }
 0xad8   :  { %v2475_v63 = vpack.c.bf16 %v1756_v20, %v1754_v11 }
 0xad9   :  { %v955_v9 = vsel %vm175_vm14, %v951_v8, 0.0 }
 0xada   :  { %956 = vadd.xlane.f32.xlu2 %v955_v9  ;;  %1043 = vmatpush.bf16.msra.mxu2 %v2475_v63 }
 0xade   :  { %1044 = vmatpush.bf16.msra.mxu2 %v2485_v60 }
 0xb45   :  { %v954_v12 = vpop.xlane.xlu0 %953 }
 0xb46   :  { %v958_v13 = vmul.f32 %v954_v12, %v2382_v58 }
 0xb48   :  { %v960_v1 = vsub.f32 %v950_v6, %v958_v13  ;;  %v1033_v6 = vperm.slane %v2502_v3, 0 }
 0xb4a   :  { %v962_v14 = vmul.f32 %v960_v1, %v960_v1 }
 0xb4c   :  { %v964_v5 = vsel %vm175_vm14, %v962_v14, 0.0 }
 0xb4d   :  { %v957_v43 = vpop.xlane.xlu2 %956  ;;  %965 = vadd.xlane.f32.xlu1 %v964_v5 }
 0xb4e   :  { %v959_v0 = vmul.f32 %v957_v43, %v2382_v58 }
 0xb50   :  { %v961_v16 = vsub.f32 %v951_v8, %v959_v0 }
 0xb52   :  { %v963_v2 = vmul.f32 %v961_v16, %v961_v16 }
 0xb54   :  { %v967_v18 = vsel %vm175_vm14, %v963_v2, 0.0 }
 0xb55   :  { %968 = vadd.xlane.f32.xlu0 %v967_v18 }
 0xbc0   :  { %v966_v4 = vpop.xlane.xlu1 %965 }
 0xbc1   :  { %v970_v57 = vmul.f32 %v966_v4, %v2382_v58 }
 0xbc3   :  { %v972_v22 = vadd.f32 1e-05, %v970_v57 }
 0xbc5   :  { %1888 = vrsqrt.f32 %v972_v22  ;;  %vm980_vm15 = vweird.f32 %v972_v22 }
 0xbc8   :  { %v969_v56 = vpop.xlane.xlu0 %968 }
 0xbc9   :  { %v971_v26 = vmul.f32 %v969_v56, %v2382_v58 }
 0xbcb   :  { %v1889_v27 = vpop.eup %1888  ;;  %v973_v28 = vadd.f32 1e-05, %v971_v26 }
 0xbcc   :  { %v975_v10 = vmul.f32 %v1889_v27, %v972_v22  ;;  %vm981_vm2 = vweird.f32 %v1889_v27 }
 0xbcd   :  { %1890 = vrsqrt.f32 %v973_v28  ;;  %vm982_vm4 = vmor %vm980_vm15, %vm981_vm2  ;;  %vm990_vm5 = vweird.f32 %v973_v28 }
 0xbce   :  { %v976_v42 = vmul.f32 %v1889_v27, %v975_v10 }
 0xbd0   :  { %v977_v29 = vmul.f32 0.5, %v976_v42 }
 0xbd2   :  { %v978_v32 = vsub.f32 1.5, %v977_v29 }
 0xbd3   :  { %v1891_v35 = vpop.eup %1890 }
 0xbd4   :  { %v979_v36 = vmul.f32 %v1889_v27, %v978_v32  ;;  %v985_v38 = vmul.f32 %v1891_v35, %v973_v28  ;;  %vm991_vm3 = vweird.f32 %v1891_v35 }
 0xbd5   :  { %vm992_vm7 = vmor %vm990_vm5, %vm991_vm3 }
 0xbd6   :  { %v986_v45 = vmul.f32 %v1891_v35, %v985_v38  ;;  %v983_v39 = vsel %vm982_vm4, %v1889_v27, %v979_v36 }
 0xbd7   :  { %v994_v47 = vmul.f32 %v983_v39, %v960_v1 }
 0xbd8   :  { %v987_v50 = vmul.f32 0.5, %v986_v45 }
 0xbd9   :  { %v997_v53 = vmul.f32 %v996_v41, %v994_v47 }
 0xbda   :  { %v988_v15 = vsub.f32 1.5, %v987_v50 }
 0xbdb   :  { %v2492_v44 = vadd.f32 %v999_v52, %v997_v53 }
 0xbdc   :  { %v989_v49 = vmul.f32 %v1891_v35, %v988_v15 }
 0xbde   :  { %v993_v51 = vsel %vm992_vm7, %v1891_v35, %v989_v49 }
 0xbdf   :  { %v995_v54 = vmul.f32 %v993_v51, %v961_v16 }
 0xbe1   :  { %v998_v55 = vmul.f32 %v996_v41, %v995_v54 }
 0xbe3   :  { %v2494_v33 = vadd.f32 %v999_v52, %v998_v55 }
 0xbe5   :  { %v1030_v23 = vpack.c.bf16 %v2494_v33, %v2492_v44 }
 0xbe7   :  { %1775 = vmatmul.msk.bf16.vlgmr.msra.gmra.mxu2 %vm175_vm14, %v1030_v23 }
 0xc6a   :  { %v1046_v61 = vpop.f32.mrf.mxu2 }
 0xc6b   :  { %v1047_v62 = vadd.f32 %v1046_v61, %v1033_v6 }
 0xc72   :  { %v1048_v59 = vpop.f32.mrf.mxu2 }
 0xc73   :  { %v1049_v7 = vadd.f32 %v1048_v59, %v1033_v6 }
 0xc75   :  { %v2505_v8 = vpack.c.bf16 %v1049_v7, %v1047_v62 }
 0xc77   :  { %1053 = vrot.lane.b32.xlu2 %v2505_v8, %s1964_s2 }
 0xc7f   :  { %1128 = vrot.lane.b32.xlu2 %v2505_v8, %s1976_s13 }
 0xc87   :  { %1344 = vrot.lane.b32.xlu2 %v2505_v8, %s1969_s29 }
 0xc8f   :  { %1342 = vrot.lane.b32.xlu2 %v2505_v8, %s1970_s30 }
 0xcd1   :  { %v1054_v9 = vpop.permute.xlu2 %1053 }
 0xcd2   :  { %v1059_v12 = vsel %vm47_vm1, %v1054_v9, 0 }
 0xcd3   :  { %1068 = vmatpush.bf16.xpose.msra.mxu3 %v1059_v12 }
 0xcd9   :  { %v1129_v13 = vpop.permute.xlu2 %1128 }
 0xcda   :  { %1776 = vmatmul.msk.bf16.vlgmr.msra.gmra.mxu3 %vm47_vm1, %v2505_v8  ;;  %1141 = vmatpush.bf16.msrb.mxu0 %v1129_v13 }
 0xce1   :  { %v1345_v28 = vpop.permute.xlu2 %1344 }
 0xce2   :  { %v1350_v29 = vsel %vm47_vm1, %v1345_v28, 0 }
 0xce9   :  { %v1343_v35 = vpop.permute.xlu2 %1342 }
 0xd5d   :  { %v1070_v1 = vpop.f32.mrf.mxu3 }
 0xd5e   :  { %v1075_v14 = vmul.f32 0.35355338, %v1070_v1 }
 0xd60   :  { %v1077_v5 = vadd.f32 %v1075_v14, %v2206_v34 }
 0xd62   :  { %v1079_v43 = vsel %vm116_vm8, %v1077_v5, -inf }
 0xd63   :  { %1080 = vmax.xlane.f32.xlu1 %v1079_v43 }
 0xd65   :  { %v1072_v0 = vpop.f32.mrf.mxu3 }
 0xd66   :  { %v1076_v16 = vmul.f32 0.35355338, %v1072_v0 }
 0xd68   :  { %v1078_v2 = vadd.f32 %v1076_v16, %v2217_v48 }
 0xd6a   :  { %v1082_v18 = vsel %vm116_vm8, %v1078_v2, -inf }
 0xd6b   :  { %1083 = vmax.xlane.f32.xlu0 %v1082_v18 }
 0xd7c   :  { %1150 = vrot.lane.b32.xlu1 %v2505_v8, %s1968_s28 }
 0xd7f   :  { %1148 = vrot.lane.b32.xlu0 %v2505_v8, %s1967_s3 }
 0xdd6   :  { %v1081_v11 = vpop.xlane.xlu1 %1080 }
 0xdd7   :  { %v1085_v20 = vsub.f32 %v1077_v5, %v1081_v11 }
 0xdd9   :  { %v1087_v4 = vmul.f32 1.442695, %v1085_v20 }
 0xddb   :  { %1892 = vpow2.f32 %v1087_v4 }
 0xdde   :  { %v1084_v57 = vpop.xlane.xlu0 %1083 }
 0xddf   :  { %v1086_v22 = vsub.f32 %v1078_v2, %v1084_v57 }
 0xde1   :  { %v1893_v24 = vpop.eup %1892  ;;  %v1089_v46 = vmul.f32 1.442695, %v1086_v22 }
 0xde2   :  { %v1091_v56 = vsel %vm116_vm8, %v1893_v24, 0.0 }
 0xde3   :  { %1894 = vpow2.f32 %v1089_v46  ;;  %1092 = vadd.xlane.f32.xlu1 %v1091_v56 }
 0xde9   :  { %v1895_v26 = vpop.eup %1894 }
 0xdea   :  { %v1094_v27 = vsel %vm116_vm8, %v1895_v26, 0.0 }
 0xdeb   :  { %1095 = vadd.xlane.f32.xlu0 %v1094_v27 }
 0xdee   :  { %v1151_v10 = vpop.permute.xlu1 %1150 }
 0xdef   :  { %v1156_v42 = vsel %vm47_vm1, %v1151_v10, 0 }
 0xdf0   :  { %1165 = vmatpush.bf16.xpose.msrb.mxu2 %v1156_v42 }
 0xdf1   :  { %v1149_v32 = vpop.permute.xlu0 %1148 }
 0xdf7   :  { %1778 = vmatmul.msk.bf16.vlgmr.msrb.gmra.mxu2 %vm47_vm1, %v1149_v32 }
 0xdf8   :  { %1359 = vmatpush.bf16.xpose.msra.mxu2 %v1350_v29 }
 0xdfc   :  { %1245 = vrot.lane.b32.xlu1 %v2505_v8, %s1963_s19 }
 0xdff   :  { %1247 = vrot.lane.b32.xlu0 %v2505_v8, %s1966_s1 }
 0xe07   :  { %1782 = vmatmul.msk.bf16.vlgmr.msra.gmra.mxu2 %vm47_vm1, %v1343_v35 }
 0xe56   :  { %v1093_v36 = vpop.xlane.xlu1 %1092 }
 0xe57   :  { %1896 = vrcp.f32 %v1093_v36  ;;  %v1108_v49 = vand.u32 2147483648, %v1093_v36  ;;  %vm1102_vm11 = vweird.f32 %v1093_v36  ;;  %v1106_v51 = vand.u32 2147483647, %v1093_v36 }
 0xe59   :  { %v1109_v61 = vor.u32 1.1754944e-38, %v1108_v49  ;;  %vm1107_vm15 = vcmp.eq.f32.partialorder %v1106_v51, 8.507059e+37 }
 0xe5d   :  { %v1897_v38 = vpop.eup %1896 }
 0xe5e   :  { %v1098_v45 = vmul.f32 %v1897_v38, %v1093_v36  ;;  %v1096_v39 = vpop.xlane.xlu0 %1095  ;;  %vm1103_vm9 = vweird.f32 %v1897_v38 }
 0xe5f   :  { %1898 = vrcp.f32 %v1096_v39  ;;  %vm1104_vm13 = vmor %vm1102_vm11, %vm1103_vm9  ;;  %v1123_v53 = vand.u32 2147483648, %v1096_v39  ;;  %v1121_v23 = vand.u32 2147483647, %v1096_v39  ;;  %vm1117_vm4 = vweird.f32 %v1096_v39 }
 0xe60   :  { %v1099_v50 = vsub.f32 1.0, %v1098_v45 }
 0xe61   :  { %v1124_v62 = vor.u32 1.1754944e-38, %v1123_v53  ;;  %vm1122_vm5 = vcmp.eq.f32.partialorder %v1121_v23, 8.507059e+37 }
 0xe62   :  { %v1100_v15 = vmul.f32 %v1897_v38, %v1099_v50 }
 0xe64   :  { %v1101_v41 = vadd.f32 %v1897_v38, %v1100_v15 }
 0xe65   :  { %v1899_v40 = vpop.eup %1898 }
 0xe66   :  { %v1113_v47 = vmul.f32 %v1899_v40, %v1096_v39  ;;  %v1105_v54 = vsel %vm1104_vm13, %v1897_v38, %v1101_v41  ;;  %vm1118_vm2 = vweird.f32 %v1899_v40 }
 0xe67   :  { %v1110_v59 = vsel %vm1107_vm15, %v1109_v61, %v1105_v54  ;;  %vm1119_vm3 = vmor %vm1117_vm4, %vm1118_vm2 }
 0xe68   :  { %v1114_v52 = vsub.f32 1.0, %v1113_v47  ;;  %v1111_v12 = vmul.f32 %v1893_v24, %v1110_v59 }
 0xe6a   :  { %v1115_v55 = vmul.f32 %v1899_v40, %v1114_v52 }
 0xe6c   :  { %v1116_v6 = vadd.f32 %v1899_v40, %v1115_v55 }
 0xe6e   :  { %v1120_v7 = vsel %vm1119_vm3, %v1899_v40, %v1116_v6  ;;  %v1246_v11 = vpop.permute.xlu1 %1245 }
 0xe6f   :  { %v1125_v9 = vsel %vm1122_vm5, %v1124_v62, %v1120_v7 }
 0xe70   :  { %v1126_v13 = vmul.f32 %v1895_v26, %v1125_v9 }
 0xe71   :  { %v1248_v1 = vpop.permute.xlu0 %1247 }
 0xe72   :  { %v1253_v14 = vsel %vm47_vm1, %v1248_v1, 0  ;;  %v1127_v5 = vpack.c.bf16 %v1126_v13, %v1111_v12 }
 0xe73   :  { %1262 = vmatpush.bf16.xpose.msra.mxu0 %v1253_v14 }
 0xe74   :  { %1777 = vmatmul.msk.bf16.vlgmr.msrb.gmra.mxu0 %vm116_vm8, %v1127_v5 }
 0xe7a   :  { %v1167_v43 = vpop.f32.mrf.mxu2 }
 0xe7b   :  { %v1172_v0 = vmul.f32 0.35355338, %v1167_v43 }
 0xe7d   :  { %v1174_v16 = vadd.f32 %v1172_v0, %v2206_v34 }
 0xe7f   :  { %v1176_v2 = vsel %vm116_vm8, %v1174_v16, -inf }
 0xe80   :  { %1177 = vmax.xlane.f32.xlu2 %v1176_v2 }
 0xe82   :  { %v1169_v18 = vpop.f32.mrf.mxu2 }
 0xe83   :  { %v1173_v20 = vmul.f32 0.35355338, %v1169_v18 }
 0xe84   :  { %1780 = vmatmul.msk.bf16.vlgmr.msra.gmra.mxu0 %vm47_vm1, %v1246_v11 }
 0xe85   :  { %v1175_v4 = vadd.f32 %v1173_v20, %v2217_v48 }
 0xe87   :  { %v1179_v57 = vsel %vm116_vm8, %v1175_v4, -inf }
 0xe88   :  { %1180 = vmax.xlane.f32.xlu0 %v1179_v57 }
 0xe8a   :  { %v1361_v22 = vpop.f32.mrf.mxu2 }
 0xe8b   :  { %v1366_v24 = vmul.f32 0.35355338, %v1361_v22 }
 0xe8d   :  { %v1368_v46 = vadd.f32 %v1366_v24, %v2206_v34 }
 0xe8f   :  { %v1370_v56 = vsel %vm116_vm8, %v1368_v46, -inf }
 0xe90   :  { %1371 = vmax.xlane.f32.xlu1 %v1370_v56 }
 0xe92   :  { %v1363_v26 = vpop.f32.mrf.mxu2 }
 0xe93   :  { %v1367_v27 = vmul.f32 0.35355338, %v1363_v26 }
 0xe95   :  { %v1369_v28 = vadd.f32 %v1367_v27, %v2217_v48 }
 0xe97   :  { %v1373_v10 = vsel %vm116_vm8, %v1369_v28, -inf }
 0xe98   :  { %1374 = vmax.xlane.f32.xlu2 %v1373_v10 }
 0xef1   :  { %v2547_v42 = vpop.f32.mrf.mxu0 }
 0xef3   :  { %v1178_v29 = vpop.xlane.xlu2 %1177 }
 0xef4   :  { %v1182_v32 = vsub.f32 %v1174_v16, %v1178_v29 }
 0xef6   :  { %v1184_v35 = vmul.f32 1.442695, %v1182_v32 }
 0xef8   :  { %1900 = vpow2.f32 %v1184_v35 }
 0xef9   :  { %v2549_v36 = vpop.f32.mrf.mxu0 }
 0xefb   :  { %v1181_v38 = vpop.xlane.xlu0 %1180 }
 0xefc   :  { %v1183_v45 = vsub.f32 %v1175_v4, %v1181_v38 }
 0xefe   :  { %v2551_v39 = vpop.eup %1900  ;;  %v1186_v15 = vmul.f32 1.442695, %v1183_v45 }
 0xeff   :  { %v1188_v50 = vsel %vm116_vm8, %v2551_v39, 0.0 }
 0xf00   :  { %1189 = vadd.xlane.f32.xlu2 %v1188_v50  ;;  %1902 = vpow2.f32 %v1186_v15 }
 0xf01   :  { %v1264_v40 = vpop.f32.mrf.mxu0 }
 0xf02   :  { %v1269_v41 = vmul.f32 0.35355338, %v1264_v40 }
 0xf03   :  { %v1372_v47 = vpop.xlane.xlu1 %1371 }
 0xf04   :  { %v1271_v49 = vadd.f32 %v1269_v41, %v2206_v34  ;;  %v1376_v51 = vsub.f32 %v1368_v46, %v1372_v47 }
 0xf06   :  { %v1273_v52 = vsel %vm116_vm8, %v1271_v49, -inf  ;;  %v1378_v53 = vmul.f32 1.442695, %v1376_v51  ;;  %v2557_v23 = vpop.eup %1902 }
 0xf07   :  { %1274 = vmax.xlane.f32.xlu0 %v1273_v52  ;;  %v1191_v7 = vsel %vm116_vm8, %v2557_v23, 0.0 }
 0xf08   :  { %1904 = vpow2.f32 %v1378_v53 }
 0xf09   :  { %v1266_v54 = vpop.f32.mrf.mxu0 }
 0xf0a   :  { %v1270_v55 = vmul.f32 0.35355338, %v1266_v54 }
 0xf0b   :  { %v1375_v61 = vpop.xlane.xlu2 %1374 }
 0xf0c   :  { %v1377_v6 = vsub.f32 %v1369_v28, %v1375_v61  ;;  %v1272_v59 = vadd.f32 %v1270_v55, %v2217_v48 }
 0xf0e   :  { %v1380_v62 = vmul.f32 1.442695, %v1377_v6  ;;  %v1276_v34 = vsel %vm116_vm8, %v1272_v59, -inf  ;;  %v2563_v9 = vpop.eup %1904 }
 0xf0f   :  { %1192 = vadd.xlane.f32.xlu0 %v1191_v7  ;;  %1277 = vmax.xlane.f32.xlu1 %v1276_v34  ;;  %v1382_v13 = vsel %vm116_vm8, %v2563_v9, 0.0 }
 0xf10   :  { %1906 = vpow2.f32 %v1380_v62 }
 0xf16   :  { %v2565_v12 = vpop.eup %1906 }
 0xf17   :  { %1383 = vadd.xlane.f32.xlu1 %v1382_v13  ;;  %v1385_v48 = vsel %vm116_vm8, %v2565_v12, 0.0 }
 0xf18   :  { %1386 = vadd.xlane.f32.xlu2 %v1385_v48 }
 0xf23   :  { %1225 = vrot.lane.b32.xlu0 %v2505_v8, %s1974_s11 }
 0xf2b   :  { %1475 = vrot.lane.b32.xlu0 %v2475_v63, %s1978_s15 }
 0xf73   :  { %v1190_v1 = vpop.xlane.xlu2 %1189 }
 0xf74   :  { %1908 = vrcp.f32 %v1190_v1  ;;  %v1205_v26 = vand.u32 2147483648, %v1190_v1  ;;  %vm1199_vm9 = vweird.f32 %v1190_v1  ;;  %v1203_v27 = vand.u32 2147483647, %v1190_v1 }
 0xf76   :  { %v1206_v45 = vor.u32 1.1754944e-38, %v1205_v26  ;;  %vm1204_vm2 = vcmp.eq.f32.partialorder %v1203_v27, 8.507059e+37 }
 0xf7a   :  { %v1275_v14 = vpop.xlane.xlu0 %1274  ;;  %v1909_v5 = vpop.eup %1908 }
 0xf7b   :  { %v1279_v43 = vsub.f32 %v1271_v49, %v1275_v14  ;;  %v1195_v16 = vmul.f32 %v1909_v5, %v1190_v1  ;;  %vm1200_vm7 = vweird.f32 %v1909_v5 }
 0xf7c   :  { %vm1201_vm11 = vmor %vm1199_vm9, %vm1200_vm7 }
 0xf7d   :  { %v1281_v0 = vmul.f32 1.442695, %v1279_v43  ;;  %v1196_v2 = vsub.f32 1.0, %v1195_v16 }
 0xf7f   :  { %1910 = vpow2.f32 %v1281_v0  ;;  %v1197_v57 = vmul.f32 %v1909_v5, %v1196_v2 }
 0xf81   :  { %v1198_v46 = vadd.f32 %v1909_v5, %v1197_v57 }
 0xf82   :  { %v1193_v18 = vpop.xlane.xlu0 %1192  ;;  %v1278_v11 = vpop.xlane.xlu1 %1277 }
 0xf83   :  { %1912 = vrcp.f32 %v1193_v18  ;;  %v1280_v20 = vsub.f32 %v1272_v59, %v1278_v11  ;;  %v1220_v10 = vand.u32 2147483648, %v1193_v18  ;;  %v1202_v32 = vsel %vm1201_vm11, %v1909_v5, %v1198_v46 }
 0xf84   :  { %v1218_v38 = vand.u32 2147483647, %v1193_v18  ;;  %vm1214_vm15 = vweird.f32 %v1193_v18  ;;  %v1207_v40 = vsel %vm1204_vm2, %v1206_v45, %v1202_v32 }
 0xf85   :  { %v2575_v4 = vpop.eup %1910  ;;  %v1283_v22 = vmul.f32 1.442695, %v1280_v20  ;;  %v1221_v41 = vor.u32 1.1754944e-38, %v1220_v10  ;;  %v1208_v51 = vmul.f32 %v2551_v39, %v1207_v40 }
 0xf86   :  { %v1285_v63 = vsel %vm116_vm8, %v2575_v4, 0.0  ;;  %vm1219_vm3 = vcmp.eq.f32.partialorder %v1218_v38, 8.507059e+37 }
 0xf87   :  { %1286 = vadd.xlane.f32.xlu1 %v1285_v63  ;;  %1914 = vpow2.f32 %v1283_v22 }
 0xf89   :  { %v1913_v24 = vpop.eup %1912 }
 0xf8a   :  { %v1210_v56 = vmul.f32 %v1913_v24, %v1193_v18  ;;  %vm1215_vm13 = vweird.f32 %v1913_v24  ;;  %v1384_v55 = vpop.xlane.xlu1 %1383 }
 0xf8b   :  { %vm1216_vm4 = vmor %vm1214_vm15, %vm1215_vm13  ;;  %v1387_v61 = vpop.xlane.xlu2 %1386  ;;  %1916 = vrcp.f32 %v1384_v55  ;;  %v1397_v43 = vand.u32 2147483647, %v1384_v55  ;;  %v1399_v0 = vand.u32 2147483648, %v1384_v55  ;;  %vm1393_vm9 = vweird.f32 %v1384_v55 }
 0xf8c   :  { %v1211_v28 = vsub.f32 1.0, %v1210_v56  ;;  %1918 = vrcp.f32 %v1387_v61  ;;  %v1414_v2 = vand.u32 2147483648, %v1387_v61  ;;  %vm1408_vm13 = vweird.f32 %v1387_v61 }
 0xf8d   :  { %v2579_v29 = vpop.eup %1914  ;;  %v1412_v57 = vand.u32 2147483647, %v1387_v61  ;;  %vm1398_vm15 = vcmp.eq.f32.partialorder %v1397_v43, 8.507059e+37 }
 0xf8e   :  { %v1212_v35 = vmul.f32 %v1913_v24, %v1211_v28  ;;  %v1288_v50 = vsel %vm116_vm8, %v2579_v29, 0.0  ;;  %v1415_v56 = vor.u32 1.1754944e-38, %v1414_v2 }
 0xf8f   :  { %1289 = vadd.xlane.f32.xlu2 %v1288_v50 }
 0xf90   :  { %v1213_v15 = vadd.f32 %v1913_v24, %v1212_v35 }
 0xf91   :  { %v1917_v39 = vpop.eup %1916 }
 0xf92   :  { %v1217_v47 = vsel %vm1216_vm4, %v1913_v24, %v1213_v15  ;;  %v1389_v6 = vmul.f32 %v1917_v39, %v1384_v55  ;;  %vm1394_vm5 = vweird.f32 %v1917_v39  ;;  %v1400_v24 = vor.u32 1.1754944e-38, %v1399_v0 }
 0xf93   :  { %v1222_v49 = vsel %vm1219_vm3, %v1221_v41, %v1217_v47  ;;  %vm2592_vm11 = vmor %vm1393_vm9, %vm1394_vm5  ;;  %vm1413_vm3 = vcmp.eq.f32.partialorder %v1412_v57, 8.507059e+37 }
 0xf94   :  { %v1223_v52 = vmul.f32 %v2557_v23, %v1222_v49  ;;  %v1919_v23 = vpop.eup %1918  ;;  %v1390_v7 = vsub.f32 1.0, %v1389_v6 }
 0xf95   :  { %v1226_v53 = vpop.permute.xlu0 %1225  ;;  %v1404_v59 = vmul.f32 %v1919_v23, %v1387_v61  ;;  %vm1409_vm7 = vweird.f32 %v1919_v23 }
 0xf96   :  { %1238 = vmatpush.bf16.msrb.mxu3 %v1226_v53  ;;  %v1224_v54 = vpack.c.bf16 %v1223_v52, %v1208_v51  ;;  %v1391_v48 = vmul.f32 %v1917_v39, %v1390_v7  ;;  %vm1410_vm2 = vmor %vm1408_vm13, %vm1409_vm7 }
 0xf97   :  { %v1405_v34 = vsub.f32 1.0, %v1404_v59 }
 0xf99   :  { %1779 = vmatmul.msk.bf16.vlgmr.msrb.gmra.mxu3 %vm116_vm8, %v1224_v54  ;;  %v1406_v1 = vmul.f32 %v1919_v23, %v1405_v34 }
 0xf9b   :  { %v1407_v16 = vadd.f32 %v1919_v23, %v1406_v1 }
 0xf9d   :  { %v1476_v11 = vpop.permute.xlu0 %1475  ;;  %v1411_v46 = vsel %vm1410_vm2, %v1919_v23, %v1407_v16 }
 0xf9e   :  { %1488 = vmatpush.bf16.msrb.mxu0 %v1476_v11  ;;  %v1416_v35 = vsel %vm1413_vm3, %v1415_v56, %v1411_v46 }
 0xf9f   :  { %v1417_v49 = vmul.f32 %v2565_v12, %v1416_v35 }
 0xfa0   :  { %1419 = vrot.lane.b32.xlu1 %v2505_v8, %s1977_s14 }
 0xfa7   :  { %1322 = vrot.lane.b32.xlu2 %v2505_v8, %s1975_s12 }
 0xfaf   :  { %1473 = vrot.lane.b32.xlu2 %v2485_v60, %s1978_s15  ;;  %v1392_v60 = vadd.f32 %v1917_v39, %v1391_v48  ;;  %s1712_s15 = sshll.u32 %s2747_s10, 4  ;;  %s1713_s15 = int_to_ptr.hbm [resolvable:$true] %s1712_s15 }
 0xfb1   :  { %v1396_v22 = vsel %vm2592_vm11, %v1917_v39, %v1392_v60 }
 0xfb2   :  { %v1401_v10 = vsel %vm1398_vm15, %v1400_v24, %v1396_v22 }
 0xfb3   :  { %v1402_v47 = vmul.f32 %v2563_v9, %v1401_v10 }
 0xfb5   :  { %v1418_v23 = vpack.c.bf16 %v1417_v49, %v1402_v47 }
 0xffa   :  { %v1287_v62 = vpop.xlane.xlu1 %1286 }
 0xffb   :  { %1920 = vrcp.f32 %v1287_v62  ;;  %v1302_v32 = vand.u32 2147483648, %v1287_v62  ;;  %vm1296_vm5 = vweird.f32 %v1287_v62  ;;  %v1300_v38 = vand.u32 2147483647, %v1287_v62 }
 0xffd   :  { %v1303_v51 = vor.u32 1.1754944e-38, %v1302_v32  ;;  %vm1301_vm11 = vcmp.eq.f32.partialorder %v1300_v38, 8.507059e+37 }
0x1001   :  { %v1921_v13 = vpop.eup %1920 }
0x1002   :  { %v1292_v14 = vmul.f32 %v1921_v13, %v1287_v62  ;;  %v1290_v8 = vpop.xlane.xlu2 %1289  ;;  %vm1297_vm4 = vweird.f32 %v1921_v13 }
0x1003   :  { %1922 = vrcp.f32 %v1290_v8  ;;  %vm1298_vm9 = vmor %vm1296_vm5, %vm1297_vm4  ;;  %v1317_v50 = vand.u32 2147483648, %v1290_v8  ;;  %v1315_v41 = vand.u32 2147483647, %v1290_v8  ;;  %vm1311_vm13 = vweird.f32 %v1290_v8 }
0x1004   :  { %v1293_v5 = vsub.f32 1.0, %v1292_v14 }
0x1005   :  { %v1318_v54 = vor.u32 1.1754944e-38, %v1317_v50  ;;  %vm1316_vm15 = vcmp.eq.f32.partialorder %v1315_v41, 8.507059e+37 }
0x1006   :  { %v1294_v18 = vmul.f32 %v1921_v13, %v1293_v5 }
0x1008   :  { %v1295_v26 = vadd.f32 %v1921_v13, %v1294_v18 }
0x1009   :  { %v1923_v63 = vpop.eup %1922 }
0x100a   :  { %v1307_v27 = vmul.f32 %v1923_v63, %v1290_v8  ;;  %v1323_v28 = vpop.permute.xlu2 %1322  ;;  %v1299_v15 = vsel %vm1298_vm9, %v1921_v13, %v1295_v26  ;;  %vm1312_vm7 = vweird.f32 %v1923_v63  ;;  %v1470_v26 = vperm.slane %v2502_v3, 1 }
0x100b   :  { %1335 = vmatpush.bf16.msrb.mxu1 %v1323_v28  ;;  %v1304_v53 = vsel %vm1301_vm11, %v1303_v51, %v1299_v15  ;;  %vm1313_vm2 = vmor %vm1311_vm13, %vm1312_vm7 }
0x100c   :  { %v1308_v45 = vsub.f32 1.0, %v1307_v27  ;;  %v1305_v6 = vmul.f32 %v2575_v4, %v1304_v53  ;;  %v1757_v53 = vld [vmem:[%s2744_s7 + $0x78] sm:$0xff] }
0x100e   :  { %v1309_v40 = vmul.f32 %v1923_v63, %v1308_v45 }
0x1010   :  { %v1310_v52 = vadd.f32 %v1923_v63, %v1309_v40 }
0x1012   :  { %v1420_v55 = vpop.permute.xlu1 %1419  ;;  %v1314_v61 = vsel %vm1313_vm2, %v1923_v63, %v1310_v52 }
0x1013   :  { %1432 = vmatpush.bf16.msra.mxu3 %v1420_v55  ;;  %v1319_v39 = vsel %vm1316_vm15, %v1318_v54, %v1314_v61 }
0x1014   :  { %v1320_v59 = vmul.f32 %v2579_v29, %v1319_v39  ;;  %v1474_v29 = vpop.permute.xlu2 %1473 }
0x1015   :  { %1489 = vmatpush.bf16.msrb.mxu0 %v1474_v29 }
0x1016   :  { %1783 = vmatmul.msk.bf16.vlgmr.msra.gmra.mxu3 %vm116_vm8, %v1418_v23  ;;  %v1321_v9 = vpack.c.bf16 %v1320_v59, %v1305_v6  ;;  %v1751_v23 = vld [vmem:[%s2744_s7 + $0x48] sm:$0xff]  ;;  %v1753_v6 = vld [vmem:[%s2744_s7 + $0x58] sm:$0xff] }
0x1017   :  { %v1549_v59 = vpack.c.bf16 %v1753_v6, %v1751_v23 }
0x1018   :  { %1781 = vmatmul.msk.bf16.vlgmr.msrb.gmra.mxu1 %vm116_vm8, %v1321_v9 }
0x101c   :  { %v1240_v12 = vpop.f32.mrf.mxu3 }
0x1024   :  { %v1242_v62 = vpop.f32.mrf.mxu3 }
0x1025   :  { %v1827_v7 = vpack.i.bf16 %v1242_v62, %v1240_v12 }
0x1027   :  { %1828 = vrot.lane.b32.xlu0 %v1827_v7, %s1979_s16 }
0x1095   :  { %v1337_v34 = vpop.f32.mrf.mxu1 }
0x1099   :  { %v1434_v13 = vpop.f32.mrf.mxu3  ;;  %v1829_v8 = vpop.permute.xlu0 %1828 }
0x109a   :  { %v1831_v5 = vunpack.i.h.bf16 %v1829_v8  ;;  %v1830_v60 = vunpack.i.l.bf16 %v1829_v8 }
0x109c   :  { %v1464_v18 = vsel %vm47_vm1, %v2549_v36, %v1831_v5  ;;  %v1463_v11 = vsel %vm47_vm1, %v2547_v42, %v1830_v60 }
0x109d   :  { %v1339_v48 = vpop.f32.mrf.mxu1 }
0x109e   :  { %v1832_v1 = vpack.i.bf16 %v1339_v48, %v1337_v34 }
0x10a0   :  { %1833 = vrot.lane.b32.xlu0 %v1832_v1, %s1980_s17  ;;  %s1983_s17 = smov [#allocation2]  }
0x10a1   :  { %v1436_v14 = vpop.f32.mrf.mxu3 }
0x10a2   :  { %v1837_v4 = vpack.i.bf16 %v1436_v14, %v1434_v13 }
0x10a4   :  { %1838 = vrot.lane.b32.xlu1 %v1837_v4, %s1981_s18  ;;  %s1710_s18 = sshll.u32 %s1983_s17, 4  ;;  %s1711_s18 = int_to_ptr.vmem [resolvable:$true] %s1710_s18 }
0x1112   :  { %v1834_v43 = vpop.permute.xlu0 %1833 }
0x1113   :  { %v1836_v0 = vunpack.i.h.bf16 %v1834_v43  ;;  %v1835_v16 = vunpack.i.l.bf16 %v1834_v43 }
0x1115   :  { %v1466_v22 = vsel %vm116_vm8, %v1464_v18, %v1836_v0  ;;  %v1465_v63 = vsel %vm116_vm8, %v1463_v11, %v1835_v16  ;;  %v1542_v0 = vperm.slane %v2502_v3, 2  ;;  %v1545_v11 = vperm.slane %v2502_v3, 3 }
0x1116   :  { %v1839_v2 = vpop.permute.xlu1 %1838 }
0x1117   :  { %v1841_v20 = vunpack.i.h.bf16 %v1839_v2  ;;  %v1840_v57 = vunpack.i.l.bf16 %v1839_v2 }
0x1119   :  { %v1467_v24 = vsel %vm798_vm0, %v1465_v63, %v1840_v57  ;;  %v1468_v46 = vsel %vm798_vm0, %v1466_v22, %v1841_v20 }
0x111a   :  { %v1469_v56 = vpack.c.bf16 %v1468_v46, %v1467_v24 }
0x111c   :  { %1784 = vmatmul.msk.bf16.vlgmr.msrb.gmra.mxu0 %vm175_vm14, %v1469_v56  ;;  %v1772_v56 = vld [vmem:[%s2745_s8 + $0xf0] sm:$0xff] }
0x1199   :  { %v1491_v27 = vpop.f32.mrf.mxu0 }
0x119a   :  { %v1492_v36 = vadd.f32 %v1491_v27, %v1470_v26 }
0x119c   :  { %v1496_v28 = vadd.f32 %v1492_v36, %v2492_v44  ;;  %v1770_v36 = vld [vmem:[%s2745_s8 + $0xe0] sm:$0xff] }
0x119e   :  { %v1498_v42 = vsel %vm175_vm14, %v1496_v28, 0.0 }
0x119f   :  { %1499 = vadd.xlane.f32.xlu0 %v1498_v42 }
0x11a1   :  { %v1493_v10 = vpop.f32.mrf.mxu0 }
0x11a2   :  { %v1494_v32 = vadd.f32 %v1493_v10, %v1470_v26  ;;  %v1773_v26 = vld [vmem:[%s2745_s8 + $0xf8] sm:$0xff]  ;;  %v1768_v10 = vld [vmem:[%s2745_s8 + $0xd0] sm:$0xff] }
0x11a3   :  { %v1595_v27 = vpack.c.bf16 %v1773_v26, %v1772_v56 }
0x11a4   :  { %v1497_v35 = vadd.f32 %v1494_v32, %v2494_v33  ;;  %v1755_v33 = vld [vmem:[%s2744_s7 + $0x68] sm:$0xff]  ;;  %v1769_v32 = vld [vmem:[%s2745_s8 + $0xd8] sm:$0xff] }
0x11a5   :  { %v1550_v55 = vpack.c.bf16 %v1757_v53, %v1755_v33  ;;  %1597 = vmatpush.bf16.msrb.mxu2 %v1595_v27  ;;  %v1758_v53 = vld [vmem:[%s2745_s8 + $0x80] sm:$0xff] }
0x11a6   :  { %v1501_v38 = vsel %vm175_vm14, %v1497_v35, 0.0 }
0x11a7   :  { %1502 = vadd.xlane.f32.xlu1 %v1501_v38  ;;  %1561 = vmatpush.bf16.msra.mxu1 %v1550_v55  ;;  %v1766_v38 = vld [vmem:[%s2745_s8 + $0xc0] sm:$0xff]  ;;  %v1551_v55 = vperm.slane %v2502_v3, 4 }
0x11ab   :  { %1562 = vmatpush.bf16.msra.mxu1 %v1549_v59 }
0x1212   :  { %v1500_v45 = vpop.xlane.xlu0 %1499 }
0x1213   :  { %v1504_v50 = vmul.f32 %v1500_v45, %v2382_v58  ;;  %v1767_v45 = vld [vmem:[%s2745_s8 + $0xc8] sm:$0xff] }
0x1215   :  { %v1506_v15 = vsub.f32 %v1496_v28, %v1504_v50  ;;  %v1771_v28 = vld [vmem:[%s2745_s8 + $0xe8] sm:$0xff]  ;;  %v1592_v50 = vpack.c.bf16 %v1767_v45, %v1766_v38 }
0x1216   :  { %v1594_v42 = vpack.c.bf16 %v1771_v28, %v1770_v36 }
0x1217   :  { %v1508_v40 = vmul.f32 %v1506_v15, %v1506_v15 }
0x1218   :  { %1598 = vmatpush.bf16.msrb.mxu2 %v1594_v42 }
0x1219   :  { %v1510_v41 = vsel %vm175_vm14, %v1508_v40, 0.0  ;;  %v1765_v40 = vld [vmem:[%s2745_s8 + $0xb8] sm:$0xff] }
0x121a   :  { %v1503_v47 = vpop.xlane.xlu1 %1502  ;;  %1511 = vadd.xlane.f32.xlu2 %v1510_v41 }
0x121b   :  { %v1505_v44 = vmul.f32 %v1503_v47, %v2382_v58  ;;  %v1762_v47 = vld [vmem:[%s2745_s8 + $0xa0] sm:$0xff] }
0x121d   :  { %v1507_v49 = vsub.f32 %v1497_v35, %v1505_v44  ;;  %v1593_v35 = vpack.c.bf16 %v1769_v32, %v1768_v10  ;;  %v1763_v44 = vld [vmem:[%s2745_s8 + $0xa8] sm:$0xff] }
0x121f   :  { %v1509_v51 = vmul.f32 %v1507_v49, %v1507_v49  ;;  %1599 = vmatpush.bf16.msrb.mxu2 %v1593_v35 }
0x1221   :  { %v1513_v52 = vsel %vm175_vm14, %v1509_v51, 0.0  ;;  %v1760_v51 = vld [vmem:[%s2745_s8 + $0x90] sm:$0xff] }
0x1222   :  { %1514 = vadd.xlane.f32.xlu0 %v1513_v52  ;;  %v1761_v52 = vld [vmem:[%s2745_s8 + $0x98] sm:$0xff] }
0x1223   :  { %1600 = vmatpush.bf16.msrb.mxu2 %v1592_v50  ;;  %v1589_v33 = vpack.c.bf16 %v1761_v52, %v1760_v51 }
0x128d   :  { %v1512_v54 = vpop.xlane.xlu2 %1511 }
0x128e   :  { %v1516_v61 = vmul.f32 %v1512_v54, %v2382_v58  ;;  %v1759_v54 = vld [vmem:[%s2745_s8 + $0x88] sm:$0xff] }
0x1290   :  { %v1518_v39 = vadd.f32 1e-05, %v1516_v61  ;;  %v1588_v61 = vpack.c.bf16 %v1759_v54, %v1758_v53  ;;  %v1663_v54 = vsel %vm321_vm6, 5, %v1971_v25  ;;  %vm1668_vm6 = vcmp.ge.s32.totalorder %v2193_v30, 1 }
0x1292   :  { %1924 = vrsqrt.f32 %v1518_v39  ;;  %vm1526_vm0 = vweird.f32 %v1518_v39 }
0x1295   :  { %v1515_v9 = vpop.xlane.xlu0 %1514 }
0x1296   :  { %v1517_v12 = vmul.f32 %v1515_v9, %v2382_v58 }
0x1298   :  { %v1925_v62 = vpop.eup %1924  ;;  %v1519_v7 = vadd.f32 1e-05, %v1517_v12 }
0x1299   :  { %v1521_v34 = vmul.f32 %v1925_v62, %v1518_v39  ;;  %vm1527_vm1 = vweird.f32 %v1925_v62 }
0x129a   :  { %1926 = vrsqrt.f32 %v1519_v7  ;;  %vm1528_vm4 = vmor %vm1526_vm0, %vm1527_vm1  ;;  %vm1536_vm5 = vweird.f32 %v1519_v7 }
0x129b   :  { %v1522_v13 = vmul.f32 %v1925_v62, %v1521_v34 }
0x129d   :  { %v1523_v48 = vmul.f32 0.5, %v1522_v13 }
0x129f   :  { %v1524_v1 = vsub.f32 1.5, %v1523_v48 }
0x12a0   :  { %v1927_v14 = vpop.eup %1926 }
0x12a1   :  { %v1525_v4 = vmul.f32 %v1925_v62, %v1524_v1  ;;  %v1531_v29 = vmul.f32 %v1927_v14, %v1519_v7  ;;  %vm1537_vm3 = vweird.f32 %v1927_v14 }
0x12a2   :  { %vm1538_vm9 = vmor %vm1536_vm5, %vm1537_vm3 }
0x12a3   :  { %v1532_v8 = vmul.f32 %v1927_v14, %v1531_v29  ;;  %v1529_v5 = vsel %vm1528_vm4, %v1925_v62, %v1525_v4 }
0x12a4   :  { %v1540_v16 = vmul.f32 %v1529_v5, %v1506_v15  ;;  %v1764_v15 = vld [vmem:[%s2745_s8 + $0xb0] sm:$0xff] }
0x12a5   :  { %v1533_v60 = vmul.f32 0.5, %v1532_v8  ;;  %v1591_v41 = vpack.c.bf16 %v1765_v40, %v1764_v15 }
0x12a6   :  { %v1543_v20 = vmul.f32 %v1542_v0, %v1540_v16 }
0x12a7   :  { %v1534_v43 = vsub.f32 1.5, %v1533_v60  ;;  %1601 = vmatpush.bf16.msrb.mxu2 %v1591_v41 }
0x12a8   :  { %v2641_v63 = vadd.f32 %v1545_v11, %v1543_v20 }
0x12a9   :  { %v1535_v2 = vmul.f32 %v1927_v14, %v1534_v43 }
0x12ab   :  { %v1539_v18 = vsel %vm1538_vm9, %v1927_v14, %v1535_v2 }
0x12ac   :  { %v1541_v57 = vmul.f32 %v1539_v18, %v1507_v49  ;;  %v1590_v49 = vpack.c.bf16 %v1763_v44, %v1762_v47 }
0x12ae   :  { %v1544_v22 = vmul.f32 %v1542_v0, %v1541_v57  ;;  %1602 = vmatpush.bf16.msrb.mxu2 %v1590_v49 }
0x12b0   :  { %v2643_v24 = vadd.f32 %v1545_v11, %v1544_v22  ;;  %v1596_v11 = vperm.slane %v2502_v3, 5 }
0x12b2   :  { %v1548_v46 = vpack.c.bf16 %v2643_v24, %v2641_v63  ;;  %1603 = vmatpush.bf16.msrb.mxu2 %v1589_v33 }
0x12b4   :  { %1785 = vmatmul.msk.bf16.vlgmr.msra.gmra.mxu1 %vm175_vm14, %v1548_v46 }
0x12b6   :  { %1604 = vmatpush.bf16.msrb.mxu2 %v1588_v61 }
0x1331   :  { %v1564_v39 = vpop.f32.mrf.mxu1 }
0x1332   :  { %v1565_v23 = vadd.f32 %v1564_v39, %v1551_v55 }
0x1334   :  { %v1571_v6 = vmul.f32 0.044715, %v1565_v23  ;;  %v1569_v60 = vmul.f32 0.5, %v1565_v23 }
0x1336   :  { %v1573_v59 = vmul.f32 %v1571_v6, %v1565_v23 }
0x1338   :  { %v1575_v9 = vmul.f32 %v1573_v59, %v1565_v23 }
0x1339   :  { %v1566_v12 = vpop.f32.mrf.mxu1 }
0x133a   :  { %v1577_v62 = vadd.f32 %v1575_v9, %v1565_v23  ;;  %v1567_v7 = vadd.f32 %v1566_v12, %v1551_v55  ;;  %v1664_v23 = vadd.s32 %v1663_v54, %v2193_v30 }
0x133c   :  { %v1572_v34 = vmul.f32 0.044715, %v1567_v7  ;;  %v1579_v13 = vmul.f32 0.7978846, %v1577_v62  ;;  %v1570_v43 = vmul.f32 0.5, %v1567_v7  ;;  %v1786_v9 = vadd.s32 4294967295, %v1664_v23 }
0x133e   :  { %v1574_v48 = vmul.f32 %v1572_v34, %v1567_v7  ;;  %1928 = vtanh.f32 %v1579_v13  ;;  %vm1666_vm1 = vcmp.eq.s32.totalorder %v2094_v17, %v1786_v9  ;;  %vm1667_vm5 = vcmp.eq.s32.totalorder %v2097_v19, %v1786_v9 }
0x133f   :  { %vm1669_vm4 = vmand %vm1666_vm1, %vm1668_vm6 }
0x1340   :  { %v1576_v1 = vmul.f32 %v1574_v48, %v1567_v7  ;;  %vm1671_vm3 = vmand %vm1669_vm4, %vm331_vm10 }
0x1341   :  { %vm1670_vm9 = vmand %vm1667_vm5, %vm1668_vm6 }
0x1342   :  { %v1578_v14 = vadd.f32 %v1576_v1, %v1567_v7  ;;  %v1660_v1 = vperm.slane %v2502_v3, 7 }
0x1344   :  { %v1580_v4 = vmul.f32 0.7978846, %v1578_v14  ;;  %v1929_v29 = vpop.eup %1928 }
0x1345   :  { %v1583_v8 = vadd.f32 1.0, %v1929_v29  ;;  %v1673_v29 = vsel %vm1671_vm3, 1.0, %v1965_v37 }
0x1346   :  { %1930 = vtanh.f32 %v1580_v4 }
0x1347   :  { %v1585_v16 = vmul.f32 %v1583_v8, %v1569_v60 }
0x134c   :  { %v1931_v5 = vpop.eup %1930 }
0x134d   :  { %v1584_v0 = vadd.f32 1.0, %v1931_v5 }
0x134f   :  { %v1586_v2 = vmul.f32 %v1584_v0, %v1570_v43 }
0x1351   :  { %v1587_v18 = vpack.c.bf16 %v1586_v2, %v1585_v16 }
0x1353   :  { %1605 = vmatmul.bf16.vlgmr.msrb.gmra.mxu2 %v1587_v18 }
0x13d6   :  { %v1606_v20 = vpop.f32.mrf.mxu2 }
0x13d7   :  { %v1607_v57 = vadd.f32 %v1606_v20, %v1596_v11 }
0x13d9   :  { %v1611_v22 = vadd.f32 %v1607_v57, %v2641_v63 }
0x13db   :  { %v1613_v46 = vsel %vm175_vm14, %v1611_v22, 0.0 }
0x13dc   :  { %1614 = vadd.xlane.f32.xlu2 %v1613_v46 }
0x13de   :  { %v1608_v56 = vpop.f32.mrf.mxu2 }
0x13df   :  { %v1609_v26 = vadd.f32 %v1608_v56, %v1596_v11 }
0x13e1   :  { %v1612_v27 = vadd.f32 %v1609_v26, %v2643_v24 }
0x13e3   :  { %v1616_v36 = vsel %vm175_vm14, %v1612_v27, 0.0 }
0x13e4   :  { %1617 = vadd.xlane.f32.xlu1 %v1616_v36 }
0x144f   :  { %v1615_v28 = vpop.xlane.xlu2 %1614 }
0x1450   :  { %v1619_v42 = vmul.f32 %v1615_v28, %v2382_v58 }
0x1452   :  { %v1621_v10 = vsub.f32 %v1611_v22, %v1619_v42 }
0x1454   :  { %v1623_v32 = vmul.f32 %v1621_v10, %v1621_v10 }
0x1456   :  { %v1625_v35 = vsel %vm175_vm14, %v1623_v32, 0.0 }
0x1457   :  { %v1618_v38 = vpop.xlane.xlu1 %1617  ;;  %1626 = vadd.xlane.f32.xlu1 %v1625_v35 }
0x1458   :  { %v1620_v63 = vmul.f32 %v1618_v38, %v2382_v58 }
0x145a   :  { %v1622_v45 = vsub.f32 %v1612_v27, %v1620_v63 }
0x145c   :  { %v1624_v50 = vmul.f32 %v1622_v45, %v1622_v45 }
0x145e   :  { %v1628_v15 = vsel %vm175_vm14, %v1624_v50, 0.0 }
0x145f   :  { %1629 = vadd.xlane.f32.xlu0 %v1628_v15 }
0x14ca   :  { %v1627_v24 = vpop.xlane.xlu1 %1626 }
0x14cb   :  { %v1631_v40 = vmul.f32 %v1627_v24, %v2382_v58 }
0x14cd   :  { %v1633_v41 = vadd.f32 1e-05, %v1631_v40 }
0x14cf   :  { %1932 = vrsqrt.f32 %v1633_v41  ;;  %vm1641_vm11 = vweird.f32 %v1633_v41 }
0x14d2   :  { %v1630_v47 = vpop.xlane.xlu0 %1629 }
0x14d3   :  { %v1632_v44 = vmul.f32 %v1630_v47, %v2382_v58 }
0x14d5   :  { %v1933_v49 = vpop.eup %1932  ;;  %v1634_v51 = vadd.f32 1e-05, %v1632_v44 }
0x14d6   :  { %v1636_v52 = vmul.f32 %v1933_v49, %v1633_v41  ;;  %vm1642_vm7 = vweird.f32 %v1933_v49 }
0x14d7   :  { %1934 = vrsqrt.f32 %v1634_v51  ;;  %vm1643_vm13 = vmor %vm1641_vm11, %vm1642_vm7  ;;  %vm1651_vm15 = vweird.f32 %v1634_v51 }
0x14d8   :  { %v1637_v33 = vmul.f32 %v1933_v49, %v1636_v52  ;;  %vm1672_vm7 = vmand %vm1670_vm9, %vm331_vm10 }
0x14d9   :  { %v1674_v3 = vsel %vm1672_vm7, 1.0, %v1965_v37 }
0x14da   :  { %v1638_v53 = vmul.f32 0.5, %v1637_v33 }
0x14dc   :  { %v1639_v55 = vsub.f32 1.5, %v1638_v53 }
0x14dd   :  { %v1935_v61 = vpop.eup %1934 }
0x14de   :  { %v1646_v39 = vmul.f32 %v1935_v61, %v1634_v51  ;;  %v1640_v6 = vmul.f32 %v1933_v49, %v1639_v55  ;;  %vm1652_vm2 = vweird.f32 %v1935_v61 }
0x14df   :  { %vm1653_vm0 = vmor %vm1651_vm15, %vm1652_vm2 }
0x14e0   :  { %v1647_v59 = vmul.f32 %v1935_v61, %v1646_v39  ;;  %v1644_v12 = vsel %vm1643_vm13, %v1933_v49, %v1640_v6 }
0x14e1   :  { %v1655_v25 = vmul.f32 %v1644_v12, %v1621_v10 }
0x14e2   :  { %v1648_v58 = vmul.f32 0.5, %v1647_v59 }
0x14e3   :  { %v1658_v14 = vmul.f32 %v1657_v21, %v1655_v25 }
0x14e4   :  { %v1649_v62 = vsub.f32 1.5, %v1648_v58 }
0x14e5   :  { %v1661_v4 = vadd.f32 %v1660_v1, %v1658_v14 }
0x14e6   :  { %v1650_v7 = vmul.f32 %v1935_v61, %v1649_v62 }
0x14e8   :  { %v1654_v34 = vsel %vm1653_vm0, %v1935_v61, %v1650_v7 }
0x14e9   :  { %v1656_v13 = vmul.f32 %v1654_v34, %v1622_v45 }
0x14eb   :  { %v1659_v48 = vmul.f32 %v1657_v21, %v1656_v13 }
0x14ed   :  { %v1662_v17 = vadd.f32 %v1660_v1, %v1659_v48 }
0x14ef   :  { %1695 = vmatpush.msrb.mxu3 %v1662_v17 }
0x14f1   :  { %1696 = vmatpush.msrb.mxu3 %v1661_v4 }
0x14f2   :  { %1787 = vmatmul.msk.f32.vlgmr.msrb.gmra.mxu3 %vm116_vm8, %v1673_v29 }
0x14fa   :  { %1788 = vmatmul.msk.f32.gmra.mxu3 %vm116_vm8, %v1674_v3 }
0x1575   :  { %v1698_v8 = vpop.f32.mrf.mxu3 }
0x1576   :  { %1704 = vst.msk [vmem:[#allocation2] sm:$0xff] %vm175_vm14, %v1698_v8 }
0x157d   :  { %v1701_v19 = vpop.f32.mrf.mxu3 }
0x157e   :  { %1705 = vst.msk [vmem:[#allocation2 + $0x8] sm:$0xf] %vm179_vm12, %v1701_v19 }
0x157f   :  { %1718 = dma.vmem_to_hbm [thread:$0]  %s1711_s18, 256, %s1713_s15, [#allocation3], %s1984_s0, %s1984_s0, %s1979_s16  }
0x1580   :  { %1961 = dma.done.wait [#allocation3], 256  }
0x1581   :  { %1962 = vsyncadd [#allocation3], 4294967040 }
0x1582   :  { %1723 = vsyncpa [#allocation3], 1 }

</bundles_post_ra>
